<compile_context>
chip_gen: v7x
topology: tpu7x:2x2x1
jax: 0.10.0
libtpu: 0.0.40
codegen_flags: <defaults>
</compile_context>

<pallas_src>
import numpy as np
import jax
import jax.numpy as jnp
from jax.experimental import pallas as pl
from jax.experimental.pallas import tpu as pltpu

INPUT_DIM = 4
HIDDEN_DIM = 10      # hidden_dim in the PyTorch script
OUTPUT_DIM = 1       # output_dim in the PyTorch script
NUM_LAYERS = 2       # `layers` argument of Net
BATCH = 2
SEQ = 8

LANE = 128           # lane width; each gate block / feature dim padded to this
GATES = 4            # PyTorch gate order: i, f, g, o
H0_OFF = 16          # lane offset of layer-0's hidden state within its block


def lstm_fc_kernel(x_ref, wx0_ref, w_ref, b_ref, wfc_ref, bfc_ref, out_ref):
    """Single-invocation kernel: hoisted input projection, wavefronted layers.

    x_ref  : (T*B, LANE)          time-major rows (row = t*B + b), x in lanes [0,D)
    wx0_ref: (LANE, 4*LANE)       layer-0 input->gates weight (x lanes -> gate cols)
    w_ref  : (2, LANE, 4*LANE)    [0]=layer-0 recurrent W_h0, [1]=layer-1 fused W_1
    b_ref  : (2, 1, 4*LANE)       [0]=layer-0 bias (folded into projection), [1]=layer-1 bias
    wfc_ref: (1, LANE)            fc weight row (lanes [0, H) valid)
    bfc_ref: (1,)   SMEM          fc bias scalar
    out_ref: (B, LANE)            lane-dense output; cols [0, OUTPUT_DIM) valid
    """
    TB = x_ref.shape[0]
    B = out_ref.shape[0]
    T = TB // B
    G = GATES * LANE

    wh0 = w_ref[0]
    w1 = w_ref[1]

    # Hoisted layer-0 input projection: one M=T*B matmul, bias folded in.
    # Entirely off the serial recurrence chain.
    gx0 = jnp.dot(x_ref[...], wx0_ref[...],
                  preferred_element_type=jnp.float32) + b_ref[0]

    # Pre-broadcast layer-1's bias once (JAX does not CSE broadcast_in_dim).
    bias1 = jnp.broadcast_to(b_ref[1], (B, G))

    def gates_to_state(gates, c):
        i = jax.nn.sigmoid(gates[:, 0 * LANE:1 * LANE])
        f = jax.nn.sigmoid(gates[:, 1 * LANE:2 * LANE])
        g = jnp.tanh(gates[:, 2 * LANE:3 * LANE])
        o = jax.nn.sigmoid(gates[:, 3 * LANE:4 * LANE])
        c_new = f * c + i * g
        h_new = o * jnp.tanh(c_new)
        # Padded gate lanes are 0 -> i=f=o=0.5, g=0 -> padded h/c stay exactly 0.
        return h_new, c_new

    zeros = jnp.zeros((B, LANE), jnp.float32)
    h0, c0, h1, c1 = zeros, zeros, zeros, zeros

    # Wavefront: wave s computes layer-0 at t=s and layer-1 at t=s-1; the two
    # cells within a wave are independent, so the serial chain is T+1 cells.
    # T is small and static: fully unroll so state stays in vregs.
    for s in range(T + 1):
        h0_prev = h0                                  # layer-0 output at t=s-1
        if s < T:
            g0 = gx0[s * B:(s + 1) * B, :] + jnp.dot(
                h0, wh0, preferred_element_type=jnp.float32)
            h0, c0 = gates_to_state(g0, c0)
        if s >= 1:
            # h0_prev lives in lanes [16, 26), h1 in lanes [0, 10): a single
            # VPU add fuses them (no concat) and keeps K at 128.
            g1 = jnp.dot(h0_prev + h1, w1,
                         preferred_element_type=jnp.float32) + bias1
            h1, c1 = gates_to_state(g1, c1)

    # fc(h_last): OUTPUT_DIM == 1, so a VPU multiply + XLU lane reduction
    # replaces the padded MXU matmul; broadcast the scalar result lane-dense.
    y = jnp.sum(h1 * wfc_ref[...], axis=-1, keepdims=True) + bfc_ref[0]
    out_ref[...] = jnp.broadcast_to(y, (B, LANE))


def net_forward(x, packed):
    """x: (B, T, D_in) batch-first (like PyTorch). Returns (B, OUTPUT_DIM)."""
    wx0, w, b, wfc, bfc = packed
    B, T, D = x.shape
    # Time-major rows, lane-padded: (T*B, LANE) so the hoisted layer-0 input
    # projection is a single matmul with T*B LHS rows inside the kernel.
    x_tm = jnp.transpose(x, (1, 0, 2)).reshape(T * B, D)
    x_pad = jnp.zeros((T * B, LANE), jnp.float32).at[:, :D].set(x_tm)

    vmem = pl.BlockSpec(memory_space=pltpu.MemorySpace.VMEM)
    smem = pl.BlockSpec(memory_space=pltpu.MemorySpace.SMEM)
    out_pad = pl.pallas_call(
        lstm_fc_kernel,
        out_shape=jax.ShapeDtypeStruct((B, LANE), jnp.float32),
        in_specs=[vmem, vmem, vmem, vmem, vmem, smem],
        out_specs=vmem,
    )(x_pad, wx0, w, b, wfc, bfc)
    return out_pad[:, :OUTPUT_DIM]


net_forward = jax.jit(net_forward)


def init_raw_params(key):
    """PyTorch-shaped params, uniform(-1/sqrt(H), 1/sqrt(H)) like nn.LSTM/Linear."""
    H, D, O = HIDDEN_DIM, INPUT_DIM, OUTPUT_DIM
    bound = 1.0 / np.sqrt(H)
    keys = jax.random.split(key, 10)
    u = lambda k, shape: jax.random.uniform(k, shape, jnp.float32, -bound, bound)

    w_ih0 = u(keys[0], (4 * H, D))
    w_hh0 = u(keys[1], (4 * H, H))
    b_ih0 = u(keys[2], (4 * H,))
    b_hh0 = u(keys[3], (4 * H,))
    w_ih1 = u(keys[4], (4 * H, H))
    w_hh1 = u(keys[5], (4 * H, H))
    b_ih1 = u(keys[6], (4 * H,))
    b_hh1 = u(keys[7], (4 * H,))
    w_fc = u(keys[8], (O, H))
    b_fc = u(keys[9], (O,))
    return (w_ih0, w_hh0, b_ih0, b_hh0,
            w_ih1, w_hh1, b_ih1, b_hh1, w_fc, b_fc)


def pack_params(raw):
    """Pack PyTorch-shaped params into the kernel's lane-aligned layout.

    Layer-0's gate columns carry a +H0_OFF lane offset so its hidden state
    lands in lanes [H0_OFF, H0_OFF+H); layer-1's gate columns start at lane 0
    so its hidden state lands in lanes [0, H).  The two ranges are disjoint,
    letting layer-1's fused input be built with a single add.  All padded
    weight/bias entries are zero so padded h/c lanes stay exactly 0.
    """
    (w_ih0, w_hh0, b_ih0, b_hh0,
     w_ih1, w_hh1, b_ih1, b_hh1, w_fc, b_fc) = [np.asarray(p, np.float32)
                                                for p in raw]
    H, D = HIDDEN_DIM, INPUT_DIM
    G = GATES * LANE

    wx0 = np.zeros((LANE, G), np.float32)   # layer-0: x lanes -> gate cols
    wh0 = np.zeros((LANE, G), np.float32)   # layer-0: h0 lanes -> gate cols
    b0 = np.zeros((1, G), np.float32)
    w1 = np.zeros((LANE, G), np.float32)    # layer-1: fused [h1 | h0] -> gate cols
    b1 = np.zeros((1, G), np.float32)
    for g in range(GATES):
        rows = slice(g * H, (g + 1) * H)
        cols0 = slice(g * LANE + H0_OFF, g * LANE + H0_OFF + H)  # layer-0 gates
        cols1 = slice(g * LANE, g * LANE + H)                    # layer-1 gates
        wx0[:D, cols0] = w_ih0[rows, :].T
        wh0[H0_OFF:H0_OFF + H, cols0] = w_hh0[rows, :].T
        b0[0, cols0] = b_ih0[rows] + b_hh0[rows]
        w1[H0_OFF:H0_OFF + H, cols1] = w_ih1[rows, :].T   # input = h0 (lanes 16..26)
        w1[:H, cols1] = w_hh1[rows, :].T                  # recurrent h1 (lanes 0..10)
        b1[0, cols1] = b_ih1[rows] + b_hh1[rows]

    w = jnp.asarray(np.stack([wh0, w1]))                  # (2, 128, 512)
    b = jnp.asarray(np.stack([b0, b1]))                   # (2, 1, 512)

    wfc = np.zeros((1, LANE), np.float32)
    wfc[0, :H] = w_fc[0, :]                               # OUTPUT_DIM == 1
    bfc = jnp.asarray(b_fc.reshape(1,))
    return jnp.asarray(wx0), w, b, jnp.asarray(wfc), bfc


def reference_forward(x, raw):
    """Pure numpy reference matching torch.nn.LSTM + Linear semantics."""
    (w_ih0, w_hh0, b_ih0, b_hh0,
     w_ih1, w_hh1, b_ih1, b_hh1, w_fc, b_fc) = [np.asarray(p) for p in raw]
    x = np.asarray(x)
    B, T, D = x.shape
    H = HIDDEN_DIM

    def sigmoid(z):
        return 1.0 / (1.0 + np.exp(-z))

    def run_layer(inp, w_ih, w_hh, b_ih, b_hh):
        h = np.zeros((B, H), np.float32)
        c = np.zeros((B, H), np.float32)
        outs = []
        for t in range(T):
            g = inp[:, t] @ w_ih.T + b_ih + h @ w_hh.T + b_hh
            i = sigmoid(g[:, 0 * H:1 * H])
            f = sigmoid(g[:, 1 * H:2 * H])
            gg = np.tanh(g[:, 2 * H:3 * H])
            o = sigmoid(g[:, 3 * H:4 * H])
            c = f * c + i * gg
            h = o * np.tanh(c)
            outs.append(h)
        return np.stack(outs, axis=1)

    y0 = run_layer(x, w_ih0, w_hh0, b_ih0, b_hh0)
    y1 = run_layer(y0, w_ih1, w_hh1, b_ih1, b_hh1)
    return y1[:, -1] @ w_fc.T + b_fc


if __name__ == "__main__":
    key = jax.random.PRNGKey(0)
    k_x, k_p = jax.random.split(key)
    x = jax.random.normal(k_x, (BATCH, SEQ, INPUT_DIM), jnp.float32)

    raw = init_raw_params(k_p)
    packed = pack_params(raw)

    out = net_forward(x, packed)
    out = jax.block_until_ready(out)

    ref = reference_forward(x, raw)
    assert out.shape == (BATCH, OUTPUT_DIM)
    assert np.allclose(np.asarray(out), ref, atol=1e-4, rtol=1e-4)
    print("KERNEL_OK")
</pallas_src>

<mosaic_0001>
module attributes {stable_mosaic.version = 11 : i64} {
  func.func @lstm_fc_kernel(%arg0: memref<16x128xf32, #tpu.memory_space<vmem>>, %arg1: memref<128x512xf32, #tpu.memory_space<vmem>>, %arg2: memref<2x128x512xf32, #tpu.memory_space<vmem>>, %arg3: memref<2x1x512xf32, #tpu.memory_space<vmem>>, %arg4: memref<1x128xf32, #tpu.memory_space<vmem>>, %arg5: memref<1xf32, #tpu.memory_space<smem>>, %arg6: memref<2x128xf32, #tpu.memory_space<vmem>>) attributes {dimension_semantics = [], scalar_prefetch = 0 : i64, scratch_operands = 0 : i64, tpu.core_type = #tpu.core_type<tc>} {
    %c0 = arith.constant 0 : index
    %c0_0 = arith.constant 0 : index
    %c0_1 = arith.constant 0 : index
    %0 = vector.load %arg2[%c0, %c0_0, %c0_1] : memref<2x128x512xf32, #tpu.memory_space<vmem>>, vector<1x128x512xf32>
    %1 = vector.shape_cast %0 : vector<1x128x512xf32> to vector<128x512xf32>
    %c1 = arith.constant 1 : index
    %c0_2 = arith.constant 0 : index
    %c0_3 = arith.constant 0 : index
    %2 = vector.load %arg2[%c1, %c0_2, %c0_3] : memref<2x128x512xf32, #tpu.memory_space<vmem>>, vector<1x128x512xf32>
    %3 = vector.shape_cast %2 : vector<1x128x512xf32> to vector<128x512xf32>
    %c0_4 = arith.constant 0 : index
    %c0_5 = arith.constant 0 : index
    %4 = vector.load %arg0[%c0_4, %c0_5] : memref<16x128xf32, #tpu.memory_space<vmem>>, vector<16x128xf32>
    %c0_6 = arith.constant 0 : index
    %c0_7 = arith.constant 0 : index
    %5 = vector.load %arg1[%c0_6, %c0_7] : memref<128x512xf32, #tpu.memory_space<vmem>>, vector<128x512xf32>
    %cst = arith.constant dense<0.000000e+00> : vector<16x512xf32>
    %6 = tpu.matmul %4, %5, %cst {dimension_numbers = #tpu.dot_dimension_numbers<[1], [0], [0], [1], [0, 0, 1, 1], [], []>} : vector<16x128xf32>, vector<128x512xf32>, vector<16x512xf32> -> vector<16x512xf32>
    %c0_8 = arith.constant 0 : index
    %c0_9 = arith.constant 0 : index
    %c0_10 = arith.constant 0 : index
    %7 = vector.load %arg3[%c0_8, %c0_9, %c0_10] : memref<2x1x512xf32, #tpu.memory_space<vmem>>, vector<1x1x512xf32>
    %8 = vector.shape_cast %7 : vector<1x1x512xf32> to vector<1x512xf32>
    %9 = vector.broadcast %8 : vector<1x512xf32> to vector<16x512xf32>
    %10 = arith.addf %6, %9 : vector<16x512xf32>
    %c1_11 = arith.constant 1 : index
    %c0_12 = arith.constant 0 : index
    %c0_13 = arith.constant 0 : index
    %11 = vector.load %arg3[%c1_11, %c0_12, %c0_13] : memref<2x1x512xf32, #tpu.memory_space<vmem>>, vector<1x1x512xf32>
    %12 = vector.shape_cast %11 : vector<1x1x512xf32> to vector<1x512xf32>
    %13 = vector.shape_cast %12 : vector<1x512xf32> to vector<1x512xf32>
    %14 = vector.broadcast %13 : vector<1x512xf32> to vector<2x512xf32>
    %cst_14 = arith.constant 0.000000e+00 : f32
    %15 = vector.broadcast %cst_14 : f32 to vector<2x128xf32>
    %16 = vector.extract_strided_slice %10 {offsets = [0, 0], sizes = [2, 512], strides = [1, 1]} : vector<16x512xf32> to vector<2x512xf32>
    %cst_15 = arith.constant dense<0.000000e+00> : vector<2x512xf32>
    %17 = tpu.matmul %15, %1, %cst_15 {dimension_numbers = #tpu.dot_dimension_numbers<[1], [0], [0], [1], [0, 0, 1, 1], [], []>} : vector<2x128xf32>, vector<128x512xf32>, vector<2x512xf32> -> vector<2x512xf32>
    %18 = arith.addf %16, %17 : vector<2x512xf32>
    %19 = vector.extract_strided_slice %18 {offsets = [0, 0], sizes = [2, 128], strides = [1, 1]} : vector<2x512xf32> to vector<2x128xf32>
    %20 = arith.negf %19 : vector<2x128xf32>
    %21 = math.exp %20 : vector<2x128xf32>
    %cst_16 = arith.constant 1.000000e+00 : f32
    %22 = vector.broadcast %cst_16 : f32 to vector<2x128xf32>
    %23 = arith.addf %22, %21 : vector<2x128xf32>
    %24 = arith.divf %22, %23 : vector<2x128xf32>
    %25 = vector.extract_strided_slice %18 {offsets = [0, 128], sizes = [2, 128], strides = [1, 1]} : vector<2x512xf32> to vector<2x128xf32>
    %26 = arith.negf %25 : vector<2x128xf32>
    %27 = math.exp %26 : vector<2x128xf32>
    %cst_17 = arith.constant 1.000000e+00 : f32
    %28 = vector.broadcast %cst_17 : f32 to vector<2x128xf32>
    %29 = arith.addf %28, %27 : vector<2x128xf32>
    %30 = arith.divf %28, %29 : vector<2x128xf32>
    %31 = vector.extract_strided_slice %18 {offsets = [0, 256], sizes = [2, 128], strides = [1, 1]} : vector<2x512xf32> to vector<2x128xf32>
    %32 = math.tanh %31 : vector<2x128xf32>
    %33 = vector.extract_strided_slice %18 {offsets = [0, 384], sizes = [2, 128], strides = [1, 1]} : vector<2x512xf32> to vector<2x128xf32>
    %34 = arith.negf %33 : vector<2x128xf32>
    %35 = math.exp %34 : vector<2x128xf32>
    %cst_18 = arith.constant 1.000000e+00 : f32
    %36 = vector.broadcast %cst_18 : f32 to vector<2x128xf32>
    %37 = arith.addf %36, %35 : vector<2x128xf32>
    %38 = arith.divf %36, %37 : vector<2x128xf32>
    %39 = arith.mulf %30, %15 : vector<2x128xf32>
    %40 = arith.mulf %24, %32 : vector<2x128xf32>
    %41 = arith.addf %39, %40 : vector<2x128xf32>
    %42 = math.tanh %41 : vector<2x128xf32>
    %43 = arith.mulf %38, %42 : vector<2x128xf32>
    %44 = vector.extract_strided_slice %10 {offsets = [2, 0], sizes = [2, 512], strides = [1, 1]} : vector<16x512xf32> to vector<2x512xf32>
    %cst_19 = arith.constant dense<0.000000e+00> : vector<2x512xf32>
    %45 = tpu.matmul %43, %1, %cst_19 {dimension_numbers = #tpu.dot_dimension_numbers<[1], [0], [0], [1], [0, 0, 1, 1], [], []>} : vector<2x128xf32>, vector<128x512xf32>, vector<2x512xf32> -> vector<2x512xf32>
    %46 = arith.addf %44, %45 : vector<2x512xf32>
    %47 = vector.extract_strided_slice %46 {offsets = [0, 0], sizes = [2, 128], strides = [1, 1]} : vector<2x512xf32> to vector<2x128xf32>
    %48 = arith.negf %47 : vector<2x128xf32>
    %49 = math.exp %48 : vector<2x128xf32>
    %cst_20 = arith.constant 1.000000e+00 : f32
    %50 = vector.broadcast %cst_20 : f32 to vector<2x128xf32>
    %51 = arith.addf %50, %49 : vector<2x128xf32>
    %52 = arith.divf %50, %51 : vector<2x128xf32>
    %53 = vector.extract_strided_slice %46 {offsets = [0, 128], sizes = [2, 128], strides = [1, 1]} : vector<2x512xf32> to vector<2x128xf32>
    %54 = arith.negf %53 : vector<2x128xf32>
    %55 = math.exp %54 : vector<2x128xf32>
    %cst_21 = arith.constant 1.000000e+00 : f32
    %56 = vector.broadcast %cst_21 : f32 to vector<2x128xf32>
    %57 = arith.addf %56, %55 : vector<2x128xf32>
    %58 = arith.divf %56, %57 : vector<2x128xf32>
    %59 = vector.extract_strided_slice %46 {offsets = [0, 256], sizes = [2, 128], strides = [1, 1]} : vector<2x512xf32> to vector<2x128xf32>
    %60 = math.tanh %59 : vector<2x128xf32>
    %61 = vector.extract_strided_slice %46 {offsets = [0, 384], sizes = [2, 128], strides = [1, 1]} : vector<2x512xf32> to vector<2x128xf32>
    %62 = arith.negf %61 : vector<2x128xf32>
    %63 = math.exp %62 : vector<2x128xf32>
    %cst_22 = arith.constant 1.000000e+00 : f32
    %64 = vector.broadcast %cst_22 : f32 to vector<2x128xf32>
    %65 = arith.addf %64, %63 : vector<2x128xf32>
    %66 = arith.divf %64, %65 : vector<2x128xf32>
    %67 = arith.mulf %58, %41 : vector<2x128xf32>
    %68 = arith.mulf %52, %60 : vector<2x128xf32>
    %69 = arith.addf %67, %68 : vector<2x128xf32>
    %70 = math.tanh %69 : vector<2x128xf32>
    %71 = arith.mulf %66, %70 : vector<2x128xf32>
    %72 = arith.addf %43, %15 : vector<2x128xf32>
    %cst_23 = arith.constant dense<0.000000e+00> : vector<2x512xf32>
    %73 = tpu.matmul %72, %3, %cst_23 {dimension_numbers = #tpu.dot_dimension_numbers<[1], [0], [0], [1], [0, 0, 1, 1], [], []>} : vector<2x128xf32>, vector<128x512xf32>, vector<2x512xf32> -> vector<2x512xf32>
    %74 = arith.addf %73, %14 : vector<2x512xf32>
    %75 = vector.extract_strided_slice %74 {offsets = [0, 0], sizes = [2, 128], strides = [1, 1]} : vector<2x512xf32> to vector<2x128xf32>
    %76 = arith.negf %75 : vector<2x128xf32>
    %77 = math.exp %76 : vector<2x128xf32>
    %cst_24 = arith.constant 1.000000e+00 : f32
    %78 = vector.broadcast %cst_24 : f32 to vector<2x128xf32>
    %79 = arith.addf %78, %77 : vector<2x128xf32>
    %80 = arith.divf %78, %79 : vector<2x128xf32>
    %81 = vector.extract_strided_slice %74 {offsets = [0, 128], sizes = [2, 128], strides = [1, 1]} : vector<2x512xf32> to vector<2x128xf32>
    %82 = arith.negf %81 : vector<2x128xf32>
    %83 = math.exp %82 : vector<2x128xf32>
    %cst_25 = arith.constant 1.000000e+00 : f32
    %84 = vector.broadcast %cst_25 : f32 to vector<2x128xf32>
    %85 = arith.addf %84, %83 : vector<2x128xf32>
    %86 = arith.divf %84, %85 : vector<2x128xf32>
    %87 = vector.extract_strided_slice %74 {offsets = [0, 256], sizes = [2, 128], strides = [1, 1]} : vector<2x512xf32> to vector<2x128xf32>
    %88 = math.tanh %87 : vector<2x128xf32>
    %89 = vector.extract_strided_slice %74 {offsets = [0, 384], sizes = [2, 128], strides = [1, 1]} : vector<2x512xf32> to vector<2x128xf32>
    %90 = arith.negf %89 : vector<2x128xf32>
    %91 = math.exp %90 : vector<2x128xf32>
    %cst_26 = arith.constant 1.000000e+00 : f32
    %92 = vector.broadcast %cst_26 : f32 to vector<2x128xf32>
    %93 = arith.addf %92, %91 : vector<2x128xf32>
    %94 = arith.divf %92, %93 : vector<2x128xf32>
    %95 = arith.mulf %86, %15 : vector<2x128xf32>
    %96 = arith.mulf %80, %88 : vector<2x128xf32>
    %97 = arith.addf %95, %96 : vector<2x128xf32>
    %98 = math.tanh %97 : vector<2x128xf32>
    %99 = arith.mulf %94, %98 : vector<2x128xf32>
    %100 = vector.extract_strided_slice %10 {offsets = [4, 0], sizes = [2, 512], strides = [1, 1]} : vector<16x512xf32> to vector<2x512xf32>
    %cst_27 = arith.constant dense<0.000000e+00> : vector<2x512xf32>
    %101 = tpu.matmul %71, %1, %cst_27 {dimension_numbers = #tpu.dot_dimension_numbers<[1], [0], [0], [1], [0, 0, 1, 1], [], []>} : vector<2x128xf32>, vector<128x512xf32>, vector<2x512xf32> -> vector<2x512xf32>
    %102 = arith.addf %100, %101 : vector<2x512xf32>
    %103 = vector.extract_strided_slice %102 {offsets = [0, 0], sizes = [2, 128], strides = [1, 1]} : vector<2x512xf32> to vector<2x128xf32>
    %104 = arith.negf %103 : vector<2x128xf32>
    %105 = math.exp %104 : vector<2x128xf32>
    %cst_28 = arith.constant 1.000000e+00 : f32
    %106 = vector.broadcast %cst_28 : f32 to vector<2x128xf32>
    %107 = arith.addf %106, %105 : vector<2x128xf32>
    %108 = arith.divf %106, %107 : vector<2x128xf32>
    %109 = vector.extract_strided_slice %102 {offsets = [0, 128], sizes = [2, 128], strides = [1, 1]} : vector<2x512xf32> to vector<2x128xf32>
    %110 = arith.negf %109 : vector<2x128xf32>
    %111 = math.exp %110 : vector<2x128xf32>
    %cst_29 = arith.constant 1.000000e+00 : f32
    %112 = vector.broadcast %cst_29 : f32 to vector<2x128xf32>
    %113 = arith.addf %112, %111 : vector<2x128xf32>
    %114 = arith.divf %112, %113 : vector<2x128xf32>
    %115 = vector.extract_strided_slice %102 {offsets = [0, 256], sizes = [2, 128], strides = [1, 1]} : vector<2x512xf32> to vector<2x128xf32>
    %116 = math.tanh %115 : vector<2x128xf32>
    %117 = vector.extract_strided_slice %102 {offsets = [0, 384], sizes = [2, 128], strides = [1, 1]} : vector<2x512xf32> to vector<2x128xf32>
    %118 = arith.negf %117 : vector<2x128xf32>
    %119 = math.exp %118 : vector<2x128xf32>
    %cst_30 = arith.constant 1.000000e+00 : f32
    %120 = vector.broadcast %cst_30 : f32 to vector<2x128xf32>
    %121 = arith.addf %120, %119 : vector<2x128xf32>
    %122 = arith.divf %120, %121 : vector<2x128xf32>
    %123 = arith.mulf %114, %69 : vector<2x128xf32>
    %124 = arith.mulf %108, %116 : vector<2x128xf32>
    %125 = arith.addf %123, %124 : vector<2x128xf32>
    %126 = math.tanh %125 : vector<2x128xf32>
    %127 = arith.mulf %122, %126 : vector<2x128xf32>
    %128 = arith.addf %71, %99 : vector<2x128xf32>
    %cst_31 = arith.constant dense<0.000000e+00> : vector<2x512xf32>
    %129 = tpu.matmul %128, %3, %cst_31 {dimension_numbers = #tpu.dot_dimension_numbers<[1], [0], [0], [1], [0, 0, 1, 1], [], []>} : vector<2x128xf32>, vector<128x512xf32>, vector<2x512xf32> -> vector<2x512xf32>
    %130 = arith.addf %129, %14 : vector<2x512xf32>
    %131 = vector.extract_strided_slice %130 {offsets = [0, 0], sizes = [2, 128], strides = [1, 1]} : vector<2x512xf32> to vector<2x128xf32>
    %132 = arith.negf %131 : vector<2x128xf32>
    %133 = math.exp %132 : vector<2x128xf32>
    %cst_32 = arith.constant 1.000000e+00 : f32
    %134 = vector.broadcast %cst_32 : f32 to vector<2x128xf32>
    %135 = arith.addf %134, %133 : vector<2x128xf32>
    %136 = arith.divf %134, %135 : vector<2x128xf32>
    %137 = vector.extract_strided_slice %130 {offsets = [0, 128], sizes = [2, 128], strides = [1, 1]} : vector<2x512xf32> to vector<2x128xf32>
    %138 = arith.negf %137 : vector<2x128xf32>
    %139 = math.exp %138 : vector<2x128xf32>
    %cst_33 = arith.constant 1.000000e+00 : f32
    %140 = vector.broadcast %cst_33 : f32 to vector<2x128xf32>
    %141 = arith.addf %140, %139 : vector<2x128xf32>
    %142 = arith.divf %140, %141 : vector<2x128xf32>
    %143 = vector.extract_strided_slice %130 {offsets = [0, 256], sizes = [2, 128], strides = [1, 1]} : vector<2x512xf32> to vector<2x128xf32>
    %144 = math.tanh %143 : vector<2x128xf32>
    %145 = vector.extract_strided_slice %130 {offsets = [0, 384], sizes = [2, 128], strides = [1, 1]} : vector<2x512xf32> to vector<2x128xf32>
    %146 = arith.negf %145 : vector<2x128xf32>
    %147 = math.exp %146 : vector<2x128xf32>
    %cst_34 = arith.constant 1.000000e+00 : f32
    %148 = vector.broadcast %cst_34 : f32 to vector<2x128xf32>
    %149 = arith.addf %148, %147 : vector<2x128xf32>
    %150 = arith.divf %148, %149 : vector<2x128xf32>
    %151 = arith.mulf %142, %97 : vector<2x128xf32>
    %152 = arith.mulf %136, %144 : vector<2x128xf32>
    %153 = arith.addf %151, %152 : vector<2x128xf32>
    %154 = math.tanh %153 : vector<2x128xf32>
    %155 = arith.mulf %150, %154 : vector<2x128xf32>
    %156 = vector.extract_strided_slice %10 {offsets = [6, 0], sizes = [2, 512], strides = [1, 1]} : vector<16x512xf32> to vector<2x512xf32>
    %cst_35 = arith.constant dense<0.000000e+00> : vector<2x512xf32>
    %157 = tpu.matmul %127, %1, %cst_35 {dimension_numbers = #tpu.dot_dimension_numbers<[1], [0], [0], [1], [0, 0, 1, 1], [], []>} : vector<2x128xf32>, vector<128x512xf32>, vector<2x512xf32> -> vector<2x512xf32>
    %158 = arith.addf %156, %157 : vector<2x512xf32>
    %159 = vector.extract_strided_slice %158 {offsets = [0, 0], sizes = [2, 128], strides = [1, 1]} : vector<2x512xf32> to vector<2x128xf32>
    %160 = arith.negf %159 : vector<2x128xf32>
    %161 = math.exp %160 : vector<2x128xf32>
    %cst_36 = arith.constant 1.000000e+00 : f32
    %162 = vector.broadcast %cst_36 : f32 to vector<2x128xf32>
    %163 = arith.addf %162, %161 : vector<2x128xf32>
    %164 = arith.divf %162, %163 : vector<2x128xf32>
    %165 = vector.extract_strided_slice %158 {offsets = [0, 128], sizes = [2, 128], strides = [1, 1]} : vector<2x512xf32> to vector<2x128xf32>
    %166 = arith.negf %165 : vector<2x128xf32>
    %167 = math.exp %166 : vector<2x128xf32>
    %cst_37 = arith.constant 1.000000e+00 : f32
    %168 = vector.broadcast %cst_37 : f32 to vector<2x128xf32>
    %169 = arith.addf %168, %167 : vector<2x128xf32>
    %170 = arith.divf %168, %169 : vector<2x128xf32>
    %171 = vector.extract_strided_slice %158 {offsets = [0, 256], sizes = [2, 128], strides = [1, 1]} : vector<2x512xf32> to vector<2x128xf32>
    %172 = math.tanh %171 : vector<2x128xf32>
    %173 = vector.extract_strided_slice %158 {offsets = [0, 384], sizes = [2, 128], strides = [1, 1]} : vector<2x512xf32> to vector<2x128xf32>
    %174 = arith.negf %173 : vector<2x128xf32>
    %175 = math.exp %174 : vector<2x128xf32>
    %cst_38 = arith.constant 1.000000e+00 : f32
    %176 = vector.broadcast %cst_38 : f32 to vector<2x128xf32>
    %177 = arith.addf %176, %175 : vector<2x128xf32>
    %178 = arith.divf %176, %177 : vector<2x128xf32>
    %179 = arith.mulf %170, %125 : vector<2x128xf32>
    %180 = arith.mulf %164, %172 : vector<2x128xf32>
    %181 = arith.addf %179, %180 : vector<2x128xf32>
    %182 = math.tanh %181 : vector<2x128xf32>
    %183 = arith.mulf %178, %182 : vector<2x128xf32>
    %184 = arith.addf %127, %155 : vector<2x128xf32>
    %cst_39 = arith.constant dense<0.000000e+00> : vector<2x512xf32>
    %185 = tpu.matmul %184, %3, %cst_39 {dimension_numbers = #tpu.dot_dimension_numbers<[1], [0], [0], [1], [0, 0, 1, 1], [], []>} : vector<2x128xf32>, vector<128x512xf32>, vector<2x512xf32> -> vector<2x512xf32>
    %186 = arith.addf %185, %14 : vector<2x512xf32>
    %187 = vector.extract_strided_slice %186 {offsets = [0, 0], sizes = [2, 128], strides = [1, 1]} : vector<2x512xf32> to vector<2x128xf32>
    %188 = arith.negf %187 : vector<2x128xf32>
    %189 = math.exp %188 : vector<2x128xf32>
    %cst_40 = arith.constant 1.000000e+00 : f32
    %190 = vector.broadcast %cst_40 : f32 to vector<2x128xf32>
    %191 = arith.addf %190, %189 : vector<2x128xf32>
    %192 = arith.divf %190, %191 : vector<2x128xf32>
    %193 = vector.extract_strided_slice %186 {offsets = [0, 128], sizes = [2, 128], strides = [1, 1]} : vector<2x512xf32> to vector<2x128xf32>
    %194 = arith.negf %193 : vector<2x128xf32>
    %195 = math.exp %194 : vector<2x128xf32>
    %cst_41 = arith.constant 1.000000e+00 : f32
    %196 = vector.broadcast %cst_41 : f32 to vector<2x128xf32>
    %197 = arith.addf %196, %195 : vector<2x128xf32>
    %198 = arith.divf %196, %197 : vector<2x128xf32>
    %199 = vector.extract_strided_slice %186 {offsets = [0, 256], sizes = [2, 128], strides = [1, 1]} : vector<2x512xf32> to vector<2x128xf32>
    %200 = math.tanh %199 : vector<2x128xf32>
    %201 = vector.extract_strided_slice %186 {offsets = [0, 384], sizes = [2, 128], strides = [1, 1]} : vector<2x512xf32> to vector<2x128xf32>
    %202 = arith.negf %201 : vector<2x128xf32>
    %203 = math.exp %202 : vector<2x128xf32>
    %cst_42 = arith.constant 1.000000e+00 : f32
    %204 = vector.broadcast %cst_42 : f32 to vector<2x128xf32>
    %205 = arith.addf %204, %203 : vector<2x128xf32>
    %206 = arith.divf %204, %205 : vector<2x128xf32>
    %207 = arith.mulf %198, %153 : vector<2x128xf32>
    %208 = arith.mulf %192, %200 : vector<2x128xf32>
    %209 = arith.addf %207, %208 : vector<2x128xf32>
    %210 = math.tanh %209 : vector<2x128xf32>
    %211 = arith.mulf %206, %210 : vector<2x128xf32>
    %212 = vector.extract_strided_slice %10 {offsets = [8, 0], sizes = [2, 512], strides = [1, 1]} : vector<16x512xf32> to vector<2x512xf32>
    %cst_43 = arith.constant dense<0.000000e+00> : vector<2x512xf32>
    %213 = tpu.matmul %183, %1, %cst_43 {dimension_numbers = #tpu.dot_dimension_numbers<[1], [0], [0], [1], [0, 0, 1, 1], [], []>} : vector<2x128xf32>, vector<128x512xf32>, vector<2x512xf32> -> vector<2x512xf32>
    %214 = arith.addf %212, %213 : vector<2x512xf32>
    %215 = vector.extract_strided_slice %214 {offsets = [0, 0], sizes = [2, 128], strides = [1, 1]} : vector<2x512xf32> to vector<2x128xf32>
    %216 = arith.negf %215 : vector<2x128xf32>
    %217 = math.exp %216 : vector<2x128xf32>
    %cst_44 = arith.constant 1.000000e+00 : f32
    %218 = vector.broadcast %cst_44 : f32 to vector<2x128xf32>
    %219 = arith.addf %218, %217 : vector<2x128xf32>
    %220 = arith.divf %218, %219 : vector<2x128xf32>
    %221 = vector.extract_strided_slice %214 {offsets = [0, 128], sizes = [2, 128], strides = [1, 1]} : vector<2x512xf32> to vector<2x128xf32>
    %222 = arith.negf %221 : vector<2x128xf32>
    %223 = math.exp %222 : vector<2x128xf32>
    %cst_45 = arith.constant 1.000000e+00 : f32
    %224 = vector.broadcast %cst_45 : f32 to vector<2x128xf32>
    %225 = arith.addf %224, %223 : vector<2x128xf32>
    %226 = arith.divf %224, %225 : vector<2x128xf32>
    %227 = vector.extract_strided_slice %214 {offsets = [0, 256], sizes = [2, 128], strides = [1, 1]} : vector<2x512xf32> to vector<2x128xf32>
    %228 = math.tanh %227 : vector<2x128xf32>
    %229 = vector.extract_strided_slice %214 {offsets = [0, 384], sizes = [2, 128], strides = [1, 1]} : vector<2x512xf32> to vector<2x128xf32>
    %230 = arith.negf %229 : vector<2x128xf32>
    %231 = math.exp %230 : vector<2x128xf32>
    %cst_46 = arith.constant 1.000000e+00 : f32
    %232 = vector.broadcast %cst_46 : f32 to vector<2x128xf32>
    %233 = arith.addf %232, %231 : vector<2x128xf32>
    %234 = arith.divf %232, %233 : vector<2x128xf32>
    %235 = arith.mulf %226, %181 : vector<2x128xf32>
    %236 = arith.mulf %220, %228 : vector<2x128xf32>
    %237 = arith.addf %235, %236 : vector<2x128xf32>
    %238 = math.tanh %237 : vector<2x128xf32>
    %239 = arith.mulf %234, %238 : vector<2x128xf32>
    %240 = arith.addf %183, %211 : vector<2x128xf32>
    %cst_47 = arith.constant dense<0.000000e+00> : vector<2x512xf32>
    %241 = tpu.matmul %240, %3, %cst_47 {dimension_numbers = #tpu.dot_dimension_numbers<[1], [0], [0], [1], [0, 0, 1, 1], [], []>} : vector<2x128xf32>, vector<128x512xf32>, vector<2x512xf32> -> vector<2x512xf32>
    %242 = arith.addf %241, %14 : vector<2x512xf32>
    %243 = vector.extract_strided_slice %242 {offsets = [0, 0], sizes = [2, 128], strides = [1, 1]} : vector<2x512xf32> to vector<2x128xf32>
    %244 = arith.negf %243 : vector<2x128xf32>
    %245 = math.exp %244 : vector<2x128xf32>
    %cst_48 = arith.constant 1.000000e+00 : f32
    %246 = vector.broadcast %cst_48 : f32 to vector<2x128xf32>
    %247 = arith.addf %246, %245 : vector<2x128xf32>
    %248 = arith.divf %246, %247 : vector<2x128xf32>
    %249 = vector.extract_strided_slice %242 {offsets = [0, 128], sizes = [2, 128], strides = [1, 1]} : vector<2x512xf32> to vector<2x128xf32>
    %250 = arith.negf %249 : vector<2x128xf32>
    %251 = math.exp %250 : vector<2x128xf32>
    %cst_49 = arith.constant 1.000000e+00 : f32
    %252 = vector.broadcast %cst_49 : f32 to vector<2x128xf32>
    %253 = arith.addf %252, %251 : vector<2x128xf32>
    %254 = arith.divf %252, %253 : vector<2x128xf32>
    %255 = vector.extract_strided_slice %242 {offsets = [0, 256], sizes = [2, 128], strides = [1, 1]} : vector<2x512xf32> to vector<2x128xf32>
    %256 = math.tanh %255 : vector<2x128xf32>
    %257 = vector.extract_strided_slice %242 {offsets = [0, 384], sizes = [2, 128], strides = [1, 1]} : vector<2x512xf32> to vector<2x128xf32>
    %258 = arith.negf %257 : vector<2x128xf32>
    %259 = math.exp %258 : vector<2x128xf32>
    %cst_50 = arith.constant 1.000000e+00 : f32
    %260 = vector.broadcast %cst_50 : f32 to vector<2x128xf32>
    %261 = arith.addf %260, %259 : vector<2x128xf32>
    %262 = arith.divf %260, %261 : vector<2x128xf32>
    %263 = arith.mulf %254, %209 : vector<2x128xf32>
    %264 = arith.mulf %248, %256 : vector<2x128xf32>
    %265 = arith.addf %263, %264 : vector<2x128xf32>
    %266 = math.tanh %265 : vector<2x128xf32>
    %267 = arith.mulf %262, %266 : vector<2x128xf32>
    %268 = vector.extract_strided_slice %10 {offsets = [10, 0], sizes = [2, 512], strides = [1, 1]} : vector<16x512xf32> to vector<2x512xf32>
    %cst_51 = arith.constant dense<0.000000e+00> : vector<2x512xf32>
    %269 = tpu.matmul %239, %1, %cst_51 {dimension_numbers = #tpu.dot_dimension_numbers<[1], [0], [0], [1], [0, 0, 1, 1], [], []>} : vector<2x128xf32>, vector<128x512xf32>, vector<2x512xf32> -> vector<2x512xf32>
    %270 = arith.addf %268, %269 : vector<2x512xf32>
    %271 = vector.extract_strided_slice %270 {offsets = [0, 0], sizes = [2, 128], strides = [1, 1]} : vector<2x512xf32> to vector<2x128xf32>
    %272 = arith.negf %271 : vector<2x128xf32>
    %273 = math.exp %272 : vector<2x128xf32>
    %cst_52 = arith.constant 1.000000e+00 : f32
    %274 = vector.broadcast %cst_52 : f32 to vector<2x128xf32>
    %275 = arith.addf %274, %273 : vector<2x128xf32>
    %276 = arith.divf %274, %275 : vector<2x128xf32>
    %277 = vector.extract_strided_slice %270 {offsets = [0, 128], sizes = [2, 128], strides = [1, 1]} : vector<2x512xf32> to vector<2x128xf32>
    %278 = arith.negf %277 : vector<2x128xf32>
    %279 = math.exp %278 : vector<2x128xf32>
    %cst_53 = arith.constant 1.000000e+00 : f32
    %280 = vector.broadcast %cst_53 : f32 to vector<2x128xf32>
    %281 = arith.addf %280, %279 : vector<2x128xf32>
    %282 = arith.divf %280, %281 : vector<2x128xf32>
    %283 = vector.extract_strided_slice %270 {offsets = [0, 256], sizes = [2, 128], strides = [1, 1]} : vector<2x512xf32> to vector<2x128xf32>
    %284 = math.tanh %283 : vector<2x128xf32>
    %285 = vector.extract_strided_slice %270 {offsets = [0, 384], sizes = [2, 128], strides = [1, 1]} : vector<2x512xf32> to vector<2x128xf32>
    %286 = arith.negf %285 : vector<2x128xf32>
    %287 = math.exp %286 : vector<2x128xf32>
    %cst_54 = arith.constant 1.000000e+00 : f32
    %288 = vector.broadcast %cst_54 : f32 to vector<2x128xf32>
    %289 = arith.addf %288, %287 : vector<2x128xf32>
    %290 = arith.divf %288, %289 : vector<2x128xf32>
    %291 = arith.mulf %282, %237 : vector<2x128xf32>
    %292 = arith.mulf %276, %284 : vector<2x128xf32>
    %293 = arith.addf %291, %292 : vector<2x128xf32>
    %294 = math.tanh %293 : vector<2x128xf32>
    %295 = arith.mulf %290, %294 : vector<2x128xf32>
    %296 = arith.addf %239, %267 : vector<2x128xf32>
    %cst_55 = arith.constant dense<0.000000e+00> : vector<2x512xf32>
    %297 = tpu.matmul %296, %3, %cst_55 {dimension_numbers = #tpu.dot_dimension_numbers<[1], [0], [0], [1], [0, 0, 1, 1], [], []>} : vector<2x128xf32>, vector<128x512xf32>, vector<2x512xf32> -> vector<2x512xf32>
    %298 = arith.addf %297, %14 : vector<2x512xf32>
    %299 = vector.extract_strided_slice %298 {offsets = [0, 0], sizes = [2, 128], strides = [1, 1]} : vector<2x512xf32> to vector<2x128xf32>
    %300 = arith.negf %299 : vector<2x128xf32>
    %301 = math.exp %300 : vector<2x128xf32>
    %cst_56 = arith.constant 1.000000e+00 : f32
    %302 = vector.broadcast %cst_56 : f32 to vector<2x128xf32>
    %303 = arith.addf %302, %301 : vector<2x128xf32>
    %304 = arith.divf %302, %303 : vector<2x128xf32>
    %305 = vector.extract_strided_slice %298 {offsets = [0, 128], sizes = [2, 128], strides = [1, 1]} : vector<2x512xf32> to vector<2x128xf32>
    %306 = arith.negf %305 : vector<2x128xf32>
    %307 = math.exp %306 : vector<2x128xf32>
    %cst_57 = arith.constant 1.000000e+00 : f32
    %308 = vector.broadcast %cst_57 : f32 to vector<2x128xf32>
    %309 = arith.addf %308, %307 : vector<2x128xf32>
    %310 = arith.divf %308, %309 : vector<2x128xf32>
    %311 = vector.extract_strided_slice %298 {offsets = [0, 256], sizes = [2, 128], strides = [1, 1]} : vector<2x512xf32> to vector<2x128xf32>
    %312 = math.tanh %311 : vector<2x128xf32>
    %313 = vector.extract_strided_slice %298 {offsets = [0, 384], sizes = [2, 128], strides = [1, 1]} : vector<2x512xf32> to vector<2x128xf32>
    %314 = arith.negf %313 : vector<2x128xf32>
    %315 = math.exp %314 : vector<2x128xf32>
    %cst_58 = arith.constant 1.000000e+00 : f32
    %316 = vector.broadcast %cst_58 : f32 to vector<2x128xf32>
    %317 = arith.addf %316, %315 : vector<2x128xf32>
    %318 = arith.divf %316, %317 : vector<2x128xf32>
    %319 = arith.mulf %310, %265 : vector<2x128xf32>
    %320 = arith.mulf %304, %312 : vector<2x128xf32>
    %321 = arith.addf %319, %320 : vector<2x128xf32>
    %322 = math.tanh %321 : vector<2x128xf32>
    %323 = arith.mulf %318, %322 : vector<2x128xf32>
    %324 = vector.extract_strided_slice %10 {offsets = [12, 0], sizes = [2, 512], strides = [1, 1]} : vector<16x512xf32> to vector<2x512xf32>
    %cst_59 = arith.constant dense<0.000000e+00> : vector<2x512xf32>
    %325 = tpu.matmul %295, %1, %cst_59 {dimension_numbers = #tpu.dot_dimension_numbers<[1], [0], [0], [1], [0, 0, 1, 1], [], []>} : vector<2x128xf32>, vector<128x512xf32>, vector<2x512xf32> -> vector<2x512xf32>
    %326 = arith.addf %324, %325 : vector<2x512xf32>
    %327 = vector.extract_strided_slice %326 {offsets = [0, 0], sizes = [2, 128], strides = [1, 1]} : vector<2x512xf32> to vector<2x128xf32>
    %328 = arith.negf %327 : vector<2x128xf32>
    %329 = math.exp %328 : vector<2x128xf32>
    %cst_60 = arith.constant 1.000000e+00 : f32
    %330 = vector.broadcast %cst_60 : f32 to vector<2x128xf32>
    %331 = arith.addf %330, %329 : vector<2x128xf32>
    %332 = arith.divf %330, %331 : vector<2x128xf32>
    %333 = vector.extract_strided_slice %326 {offsets = [0, 128], sizes = [2, 128], strides = [1, 1]} : vector<2x512xf32> to vector<2x128xf32>
    %334 = arith.negf %333 : vector<2x128xf32>
    %335 = math.exp %334 : vector<2x128xf32>
    %cst_61 = arith.constant 1.000000e+00 : f32
    %336 = vector.broadcast %cst_61 : f32 to vector<2x128xf32>
    %337 = arith.addf %336, %335 : vector<2x128xf32>
    %338 = arith.divf %336, %337 : vector<2x128xf32>
    %339 = vector.extract_strided_slice %326 {offsets = [0, 256], sizes = [2, 128], strides = [1, 1]} : vector<2x512xf32> to vector<2x128xf32>
    %340 = math.tanh %339 : vector<2x128xf32>
    %341 = vector.extract_strided_slice %326 {offsets = [0, 384], sizes = [2, 128], strides = [1, 1]} : vector<2x512xf32> to vector<2x128xf32>
    %342 = arith.negf %341 : vector<2x128xf32>
    %343 = math.exp %342 : vector<2x128xf32>
    %cst_62 = arith.constant 1.000000e+00 : f32
    %344 = vector.broadcast %cst_62 : f32 to vector<2x128xf32>
    %345 = arith.addf %344, %343 : vector<2x128xf32>
    %346 = arith.divf %344, %345 : vector<2x128xf32>
    %347 = arith.mulf %338, %293 : vector<2x128xf32>
    %348 = arith.mulf %332, %340 : vector<2x128xf32>
    %349 = arith.addf %347, %348 : vector<2x128xf32>
    %350 = math.tanh %349 : vector<2x128xf32>
    %351 = arith.mulf %346, %350 : vector<2x128xf32>
    %352 = arith.addf %295, %323 : vector<2x128xf32>
    %cst_63 = arith.constant dense<0.000000e+00> : vector<2x512xf32>
    %353 = tpu.matmul %352, %3, %cst_63 {dimension_numbers = #tpu.dot_dimension_numbers<[1], [0], [0], [1], [0, 0, 1, 1], [], []>} : vector<2x128xf32>, vector<128x512xf32>, vector<2x512xf32> -> vector<2x512xf32>
    %354 = arith.addf %353, %14 : vector<2x512xf32>
    %355 = vector.extract_strided_slice %354 {offsets = [0, 0], sizes = [2, 128], strides = [1, 1]} : vector<2x512xf32> to vector<2x128xf32>
    %356 = arith.negf %355 : vector<2x128xf32>
    %357 = math.exp %356 : vector<2x128xf32>
    %cst_64 = arith.constant 1.000000e+00 : f32
    %358 = vector.broadcast %cst_64 : f32 to vector<2x128xf32>
    %359 = arith.addf %358, %357 : vector<2x128xf32>
    %360 = arith.divf %358, %359 : vector<2x128xf32>
    %361 = vector.extract_strided_slice %354 {offsets = [0, 128], sizes = [2, 128], strides = [1, 1]} : vector<2x512xf32> to vector<2x128xf32>
    %362 = arith.negf %361 : vector<2x128xf32>
    %363 = math.exp %362 : vector<2x128xf32>
    %cst_65 = arith.constant 1.000000e+00 : f32
    %364 = vector.broadcast %cst_65 : f32 to vector<2x128xf32>
    %365 = arith.addf %364, %363 : vector<2x128xf32>
    %366 = arith.divf %364, %365 : vector<2x128xf32>
    %367 = vector.extract_strided_slice %354 {offsets = [0, 256], sizes = [2, 128], strides = [1, 1]} : vector<2x512xf32> to vector<2x128xf32>
    %368 = math.tanh %367 : vector<2x128xf32>
    %369 = vector.extract_strided_slice %354 {offsets = [0, 384], sizes = [2, 128], strides = [1, 1]} : vector<2x512xf32> to vector<2x128xf32>
    %370 = arith.negf %369 : vector<2x128xf32>
    %371 = math.exp %370 : vector<2x128xf32>
    %cst_66 = arith.constant 1.000000e+00 : f32
    %372 = vector.broadcast %cst_66 : f32 to vector<2x128xf32>
    %373 = arith.addf %372, %371 : vector<2x128xf32>
    %374 = arith.divf %372, %373 : vector<2x128xf32>
    %375 = arith.mulf %366, %321 : vector<2x128xf32>
    %376 = arith.mulf %360, %368 : vector<2x128xf32>
    %377 = arith.addf %375, %376 : vector<2x128xf32>
    %378 = math.tanh %377 : vector<2x128xf32>
    %379 = arith.mulf %374, %378 : vector<2x128xf32>
    %380 = vector.extract_strided_slice %10 {offsets = [14, 0], sizes = [2, 512], strides = [1, 1]} : vector<16x512xf32> to vector<2x512xf32>
    %cst_67 = arith.constant dense<0.000000e+00> : vector<2x512xf32>
    %381 = tpu.matmul %351, %1, %cst_67 {dimension_numbers = #tpu.dot_dimension_numbers<[1], [0], [0], [1], [0, 0, 1, 1], [], []>} : vector<2x128xf32>, vector<128x512xf32>, vector<2x512xf32> -> vector<2x512xf32>
    %382 = arith.addf %380, %381 : vector<2x512xf32>
    %383 = vector.extract_strided_slice %382 {offsets = [0, 0], sizes = [2, 128], strides = [1, 1]} : vector<2x512xf32> to vector<2x128xf32>
    %384 = arith.negf %383 : vector<2x128xf32>
    %385 = math.exp %384 : vector<2x128xf32>
    %cst_68 = arith.constant 1.000000e+00 : f32
    %386 = vector.broadcast %cst_68 : f32 to vector<2x128xf32>
    %387 = arith.addf %386, %385 : vector<2x128xf32>
    %388 = arith.divf %386, %387 : vector<2x128xf32>
    %389 = vector.extract_strided_slice %382 {offsets = [0, 128], sizes = [2, 128], strides = [1, 1]} : vector<2x512xf32> to vector<2x128xf32>
    %390 = arith.negf %389 : vector<2x128xf32>
    %391 = math.exp %390 : vector<2x128xf32>
    %cst_69 = arith.constant 1.000000e+00 : f32
    %392 = vector.broadcast %cst_69 : f32 to vector<2x128xf32>
    %393 = arith.addf %392, %391 : vector<2x128xf32>
    %394 = arith.divf %392, %393 : vector<2x128xf32>
    %395 = vector.extract_strided_slice %382 {offsets = [0, 256], sizes = [2, 128], strides = [1, 1]} : vector<2x512xf32> to vector<2x128xf32>
    %396 = math.tanh %395 : vector<2x128xf32>
    %397 = vector.extract_strided_slice %382 {offsets = [0, 384], sizes = [2, 128], strides = [1, 1]} : vector<2x512xf32> to vector<2x128xf32>
    %398 = arith.negf %397 : vector<2x128xf32>
    %399 = math.exp %398 : vector<2x128xf32>
    %cst_70 = arith.constant 1.000000e+00 : f32
    %400 = vector.broadcast %cst_70 : f32 to vector<2x128xf32>
    %401 = arith.addf %400, %399 : vector<2x128xf32>
    %402 = arith.divf %400, %401 : vector<2x128xf32>
    %403 = arith.mulf %394, %349 : vector<2x128xf32>
    %404 = arith.mulf %388, %396 : vector<2x128xf32>
    %405 = arith.addf %403, %404 : vector<2x128xf32>
    %406 = math.tanh %405 : vector<2x128xf32>
    %407 = arith.mulf %402, %406 : vector<2x128xf32>
    %408 = arith.addf %351, %379 : vector<2x128xf32>
    %cst_71 = arith.constant dense<0.000000e+00> : vector<2x512xf32>
    %409 = tpu.matmul %408, %3, %cst_71 {dimension_numbers = #tpu.dot_dimension_numbers<[1], [0], [0], [1], [0, 0, 1, 1], [], []>} : vector<2x128xf32>, vector<128x512xf32>, vector<2x512xf32> -> vector<2x512xf32>
    %410 = arith.addf %409, %14 : vector<2x512xf32>
    %411 = vector.extract_strided_slice %410 {offsets = [0, 0], sizes = [2, 128], strides = [1, 1]} : vector<2x512xf32> to vector<2x128xf32>
    %412 = arith.negf %411 : vector<2x128xf32>
    %413 = math.exp %412 : vector<2x128xf32>
    %cst_72 = arith.constant 1.000000e+00 : f32
    %414 = vector.broadcast %cst_72 : f32 to vector<2x128xf32>
    %415 = arith.addf %414, %413 : vector<2x128xf32>
    %416 = arith.divf %414, %415 : vector<2x128xf32>
    %417 = vector.extract_strided_slice %410 {offsets = [0, 128], sizes = [2, 128], strides = [1, 1]} : vector<2x512xf32> to vector<2x128xf32>
    %418 = arith.negf %417 : vector<2x128xf32>
    %419 = math.exp %418 : vector<2x128xf32>
    %cst_73 = arith.constant 1.000000e+00 : f32
    %420 = vector.broadcast %cst_73 : f32 to vector<2x128xf32>
    %421 = arith.addf %420, %419 : vector<2x128xf32>
    %422 = arith.divf %420, %421 : vector<2x128xf32>
    %423 = vector.extract_strided_slice %410 {offsets = [0, 256], sizes = [2, 128], strides = [1, 1]} : vector<2x512xf32> to vector<2x128xf32>
    %424 = math.tanh %423 : vector<2x128xf32>
    %425 = vector.extract_strided_slice %410 {offsets = [0, 384], sizes = [2, 128], strides = [1, 1]} : vector<2x512xf32> to vector<2x128xf32>
    %426 = arith.negf %425 : vector<2x128xf32>
    %427 = math.exp %426 : vector<2x128xf32>
    %cst_74 = arith.constant 1.000000e+00 : f32
    %428 = vector.broadcast %cst_74 : f32 to vector<2x128xf32>
    %429 = arith.addf %428, %427 : vector<2x128xf32>
    %430 = arith.divf %428, %429 : vector<2x128xf32>
    %431 = arith.mulf %422, %377 : vector<2x128xf32>
    %432 = arith.mulf %416, %424 : vector<2x128xf32>
    %433 = arith.addf %431, %432 : vector<2x128xf32>
    %434 = math.tanh %433 : vector<2x128xf32>
    %435 = arith.mulf %430, %434 : vector<2x128xf32>
    %436 = arith.addf %407, %435 : vector<2x128xf32>
    %cst_75 = arith.constant dense<0.000000e+00> : vector<2x512xf32>
    %437 = tpu.matmul %436, %3, %cst_75 {dimension_numbers = #tpu.dot_dimension_numbers<[1], [0], [0], [1], [0, 0, 1, 1], [], []>} : vector<2x128xf32>, vector<128x512xf32>, vector<2x512xf32> -> vector<2x512xf32>
    %438 = arith.addf %437, %14 : vector<2x512xf32>
    %439 = vector.extract_strided_slice %438 {offsets = [0, 0], sizes = [2, 128], strides = [1, 1]} : vector<2x512xf32> to vector<2x128xf32>
    %440 = arith.negf %439 : vector<2x128xf32>
    %441 = math.exp %440 : vector<2x128xf32>
    %cst_76 = arith.constant 1.000000e+00 : f32
    %442 = vector.broadcast %cst_76 : f32 to vector<2x128xf32>
    %443 = arith.addf %442, %441 : vector<2x128xf32>
    %444 = arith.divf %442, %443 : vector<2x128xf32>
    %445 = vector.extract_strided_slice %438 {offsets = [0, 128], sizes = [2, 128], strides = [1, 1]} : vector<2x512xf32> to vector<2x128xf32>
    %446 = arith.negf %445 : vector<2x128xf32>
    %447 = math.exp %446 : vector<2x128xf32>
    %cst_77 = arith.constant 1.000000e+00 : f32
    %448 = vector.broadcast %cst_77 : f32 to vector<2x128xf32>
    %449 = arith.addf %448, %447 : vector<2x128xf32>
    %450 = arith.divf %448, %449 : vector<2x128xf32>
    %451 = vector.extract_strided_slice %438 {offsets = [0, 256], sizes = [2, 128], strides = [1, 1]} : vector<2x512xf32> to vector<2x128xf32>
    %452 = math.tanh %451 : vector<2x128xf32>
    %453 = vector.extract_strided_slice %438 {offsets = [0, 384], sizes = [2, 128], strides = [1, 1]} : vector<2x512xf32> to vector<2x128xf32>
    %454 = arith.negf %453 : vector<2x128xf32>
    %455 = math.exp %454 : vector<2x128xf32>
    %cst_78 = arith.constant 1.000000e+00 : f32
    %456 = vector.broadcast %cst_78 : f32 to vector<2x128xf32>
    %457 = arith.addf %456, %455 : vector<2x128xf32>
    %458 = arith.divf %456, %457 : vector<2x128xf32>
    %459 = arith.mulf %450, %433 : vector<2x128xf32>
    %460 = arith.mulf %444, %452 : vector<2x128xf32>
    %461 = arith.addf %459, %460 : vector<2x128xf32>
    %462 = math.tanh %461 : vector<2x128xf32>
    %463 = arith.mulf %458, %462 : vector<2x128xf32>
    %c0_79 = arith.constant 0 : index
    %c0_80 = arith.constant 0 : index
    %464 = vector.load %arg4[%c0_79, %c0_80] : memref<1x128xf32, #tpu.memory_space<vmem>>, vector<1x128xf32>
    %465 = vector.broadcast %464 : vector<1x128xf32> to vector<2x128xf32>
    %466 = arith.mulf %463, %465 : vector<2x128xf32>
    %cst_81 = arith.constant dense<0.000000e+00> : vector<2xf32>
    %467 = vector.multi_reduction <add>, %466, %cst_81 [1] : vector<2x128xf32> to vector<2xf32>
    %468 = vector.shape_cast %467 : vector<2xf32> to vector<2x1xf32>
    %c0_82 = arith.constant 0 : index
    %469 = memref.load %arg5[%c0_82] : memref<1xf32, #tpu.memory_space<smem>>
    %470 = vector.broadcast %469 : f32 to vector<2x1xf32>
    %471 = arith.addf %468, %470 : vector<2x1xf32>
    %472 = vector.shape_cast %471 : vector<2x1xf32> to vector<2x1xf32>
    %473 = vector.broadcast %472 : vector<2x1xf32> to vector<2x128xf32>
    %c0_83 = arith.constant 0 : index
    %c0_84 = arith.constant 0 : index
    %474 = vector.load %arg6[%c0_83, %c0_84] : memref<2x128xf32, #tpu.memory_space<vmem>>, vector<2x128xf32>
    tpu.vector_store %arg6[%c0_83, %c0_84], %473 {strides = array<i32>} : memref<2x128xf32, #tpu.memory_space<vmem>>, vector<2x128xf32>,
    return
  }
}

</mosaic_0001>

<bundles_post_ra>
// kernel: net_forward.1
= control target key start
LH: loop header
LB: loop body
LE: loop exit
PB: predicated region body
PF: predicated region fallthrough
CT: control target
= control target key end

     0   :  { %12 = vsyncpa [#allocation4], 0  ;;  %s5694_s0 = inlined_call_operand.vmem [shape: f32[16,128], index: 0, kind: input, shape index: {}]   ;;  %s5695_s1 = inlined_call_operand.hbm [shape: f32[128,512], index: 1, kind: input, shape index: {}]   ;;  %s5696_s2 = inlined_call_operand.hbm [shape: f32[2,128,512], index: 2, kind: input, shape index: {}]   ;;  %s5697_s3 = inlined_call_operand.vmem [shape: f32[2,1,512], index: 3, kind: input, shape index: {}]   ;;  %s5698_s4 = inlined_call_operand.vmem [shape: f32[1,128], index: 4, kind: input, shape index: {}]   ;;  %s5699_s5 = inlined_call_operand.<no memory space> [shape: f32[1], index: 5, kind: input, shape index: {}]   ;;  %s5700_s6 = inlined_call_operand.vmem [shape: f32[2,128], index: 6, kind: output, shape index: {}]  }
   0x1   :  { %13 = vsyncpa [#allocation6], 0  ;;  %s4755_s21 = smov [#allocation3]   ;;  %s4707_s25 = scalar_lea.hbm %s5695_s1, 8192 }
   0x2   :  { %s21_s22 = sshll.u32 %s4755_s21, 4  ;;  %p4708_p0 = scmp.ne.s32.totalorder %s5695_s1, %s4707_s25  ;;  %s22_s22 = int_to_ptr.vmem [resolvable:$true] %s21_s22 }
   0x3   :  { %p4711_p1 = scmp.lt.u32.totalorder %s4707_s25, %s5695_s1 }
   0x5   :  { %p4713_p2 = pnand %p4711_p1, %p4708_p0 }
   0x7   :  { %4716 = shalt.err (!%p4713_p2)
}
   0x8   :  { %s4717_s30 = scalar_lea.vmem %s22_s22, 8192  ;;  %p4722_p4 = scmp.lt.s32.totalorder %s22_s22, %s22_s22 }
   0x9   :  { %p4718_p3 = scmp.ne.s32.totalorder %s22_s22, %s4717_s30  ;;  %p4723_p5 = scmp.lt.s32.totalorder %s4717_s30, %s4717_s30 }
   0xb   :  { %p4724_p6 = por %p4723_p5, %p4722_p4 }
   0xd   :  { %p4725_p7 = pnand %p4724_p6, %p4718_p3 }
   0xf   :  { %4728 = shalt.err (!%p4725_p7)
}
  0x10   :  { %s4756_s7 = smov 512   ;;  %s4757_s8 = smov 32  }
  0x11   :  { %27 = dma.hbm_to_vmem [thread:$0]  %s5695_s1, 8192, %s22_s22, [#allocation4], %s4756_s7, %s4756_s7, %s4757_s8  }
  0x12   :  { %s4758_s11 = smov [#allocation5]   ;;  %s4729_s15 = scalar_lea.hbm %s5696_s2, 16384 }
  0x13   :  { %s33_s12 = sshll.u32 %s4758_s11, 4  ;;  %p4730_p8 = scmp.ne.s32.totalorder %s5696_s2, %s4729_s15  ;;  %s34_s12 = int_to_ptr.vmem [resolvable:$true] %s33_s12 }
  0x14   :  { %p4733_p9 = scmp.lt.u32.totalorder %s4729_s15, %s5696_s2 }
  0x16   :  { %p4735_p10 = pnand %p4733_p9, %p4730_p8 }
  0x18   :  { %4738 = shalt.err (!%p4735_p10)
}
  0x19   :  { %s4739_s20 = scalar_lea.vmem %s34_s12, 16384  ;;  %p4744_p12 = scmp.lt.s32.totalorder %s34_s12, %s34_s12 }
  0x1a   :  { %p4740_p11 = scmp.ne.s32.totalorder %s34_s12, %s4739_s20  ;;  %p4745_p13 = scmp.lt.s32.totalorder %s4739_s20, %s4739_s20 }
  0x1c   :  { %p4746_p0 = por %p4745_p13, %p4744_p12 }
  0x1e   :  { %p4747_p1 = pnand %p4746_p0, %p4740_p11 }
  0x20   :  { %4750 = shalt.err (!%p4747_p1)
}
  0x21   :  { %39 = dma.hbm_to_vmem [thread:$0]  %s5696_s2, 16384, %s34_s12, [#allocation6], %s4756_s7, %s4756_s7, %s4757_s8  }
  0x22   :  { %4751 = dma.done.wait [#allocation4], 8192  }
  0x23   :  { %4752 = vsyncadd [#allocation4], 4294959104 }
  0x24   :  { %4753 = dma.done.wait [#allocation6], 16384  }
  0x25   :  { %4754 = vsyncadd [#allocation6], 4294950912  ;;  %v5705_v0 = vmov 0.0   ;;  %v184_v1 = vld [vmem:[#allocation3 + $0x8] sm:$0xff]  ;;  %v186_v3 = vld [vmem:[#allocation3 + $0x18] sm:$0xff]  ;;  %vm3294_vm0 = vcmask 1041408  }
  0x26   :  { %333 = vmatprep.mubr.f32.mxu0 %v5705_v0  ;;  %410 = vmatprep.mubr.f32.mxu1 %v5705_v0  ;;  %v188_v2 = vld [vmem:[#allocation3 + $0x28] sm:$0xff]  ;;  %v190_v5 = vld [vmem:[#allocation3 + $0x38] sm:$0xff]  ;;  %v183_v6 = vld [vmem:[#allocation3] sm:$0xff] }
  0x27   :  { %v3358_v4 = vpack.c.bf16 %v188_v2, %v184_v1  ;;  %v187_v7 = vld [vmem:[#allocation3 + $0x20] sm:$0xff]  ;;  %v3390_v8 = vpack.c.bf16 %v190_v5, %v186_v3  ;;  %v185_v10 = vld [vmem:[#allocation3 + $0x10] sm:$0xff]  ;;  %v192_v12 = vld [vmem:[#allocation3 + $0x48] sm:$0xff] }
  0x28   :  { %v3360_v9 = vpack.c.bf16 %v187_v7, %v183_v6  ;;  %v189_v11 = vld [vmem:[#allocation3 + $0x30] sm:$0xff]  ;;  %v196_v14 = vld [vmem:[#allocation3 + $0x68] sm:$0xff]  ;;  %v194_v15 = vld [vmem:[#allocation3 + $0x58] sm:$0xff] }
  0x29   :  { %3359 = vmatprep.subr.bf16.mxu0 %v3358_v4  ;;  %v3392_v13 = vpack.c.bf16 %v189_v11, %v185_v10  ;;  %v198_v16 = vld [vmem:[#allocation3 + $0x78] sm:$0xff]  ;;  %3391 = vmatprep.subr.bf16.mxu1 %v3390_v8  ;;  %v3362_v17 = vpack.c.bf16 %v196_v14, %v192_v12  ;;  %v191_v19 = vld [vmem:[#allocation3 + $0x40] sm:$0xff]  ;;  %v193_v21 = vld [vmem:[#allocation3 + $0x50] sm:$0xff] }
  0x2a   :  { %3361 = vmatpush1.bf16.msra.mxu0 %v3360_v9  ;;  %v3394_v18 = vpack.c.bf16 %v198_v16, %v194_v15  ;;  %v195_v20 = vld [vmem:[#allocation3 + $0x60] sm:$0xff]  ;;  %v197_v23 = vld [vmem:[#allocation3 + $0x70] sm:$0xff]  ;;  %v200_v24 = vld [vmem:[#allocation3 + $0x88] sm:$0xff] }
  0x2b   :  { %3393 = vmatpush1.bf16.msra.mxu1 %v3392_v13  ;;  %v3364_v22 = vpack.c.bf16 %v195_v20, %v191_v19  ;;  %v204_v25 = vld [vmem:[#allocation3 + $0xa8] sm:$0xff]  ;;  %3363 = vmatprep.subr.bf16.mxu0 %v3362_v17  ;;  %v3396_v26 = vpack.c.bf16 %v197_v23, %v193_v21  ;;  %v202_v28 = vld [vmem:[#allocation3 + $0x98] sm:$0xff]  ;;  %v199_v30 = vld [vmem:[#allocation3 + $0x80] sm:$0xff] }
  0x2c   :  { %3395 = vmatprep.subr.bf16.mxu1 %v3394_v18  ;;  %v3366_v27 = vpack.c.bf16 %v204_v25, %v200_v24  ;;  %v206_v29 = vld [vmem:[#allocation3 + $0xb8] sm:$0xff]  ;;  %v203_v32 = vld [vmem:[#allocation3 + $0xa0] sm:$0xff]  ;;  %v201_v33 = vld [vmem:[#allocation3 + $0x90] sm:$0xff] }
  0x2d   :  { %v3398_v31 = vpack.c.bf16 %v206_v29, %v202_v28  ;;  %v205_v34 = vld [vmem:[#allocation3 + $0xb0] sm:$0xff]  ;;  %v3368_v35 = vpack.c.bf16 %v203_v32, %v199_v30  ;;  %v208_v36 = vld [vmem:[#allocation3 + $0xc8] sm:$0xff]  ;;  %v210_v38 = vld [vmem:[#allocation3 + $0xd8] sm:$0xff] }
  0x2e   :  { %3365 = vmatpush1.bf16.msra.mxu0 %v3364_v22  ;;  %v212_v37 = vld [vmem:[#allocation3 + $0xe8] sm:$0xff]  ;;  %v3400_v39 = vpack.c.bf16 %v205_v34, %v201_v33  ;;  %v214_v41 = vld [vmem:[#allocation3 + $0xf8] sm:$0xff]  ;;  %v207_v42 = vld [vmem:[#allocation3 + $0xc0] sm:$0xff] }
  0x2f   :  { %3397 = vmatpush1.bf16.msra.mxu1 %v3396_v26  ;;  %3367 = vmatprep.subr.bf16.mxu0 %v3366_v27  ;;  %v3370_v40 = vpack.c.bf16 %v212_v37, %v208_v36  ;;  %v211_v43 = vld [vmem:[#allocation3 + $0xe0] sm:$0xff]  ;;  %v3402_v44 = vpack.c.bf16 %v214_v41, %v210_v38  ;;  %v209_v45 = vld [vmem:[#allocation3 + $0xd0] sm:$0xff]  ;;  %v216_v47 = vld [vmem:[#allocation3 + $0x108] sm:$0xff] }
  0x30   :  { %3399 = vmatprep.subr.bf16.mxu1 %v3398_v31  ;;  %v213_v46 = vld [vmem:[#allocation3 + $0xf0] sm:$0xff]  ;;  %v220_v48 = vld [vmem:[#allocation3 + $0x128] sm:$0xff]  ;;  %v218_v49 = vld [vmem:[#allocation3 + $0x118] sm:$0xff]  ;;  %v3372_v51 = vpack.c.bf16 %v211_v43, %v207_v42 }
  0x31   :  { %v222_v50 = vld [vmem:[#allocation3 + $0x138] sm:$0xff]  ;;  %v3404_v52 = vpack.c.bf16 %v213_v46, %v209_v45  ;;  %v3374_v53 = vpack.c.bf16 %v220_v48, %v216_v47  ;;  %v215_v54 = vld [vmem:[#allocation3 + $0x100] sm:$0xff]  ;;  %v217_v56 = vld [vmem:[#allocation3 + $0x110] sm:$0xff] }
  0x32   :  { %3369 = vmatpush1.bf16.msra.mxu0 %v3368_v35  ;;  %v219_v55 = vld [vmem:[#allocation3 + $0x120] sm:$0xff]  ;;  %v3406_v57 = vpack.c.bf16 %v222_v50, %v218_v49  ;;  %v221_v58 = vld [vmem:[#allocation3 + $0x130] sm:$0xff]  ;;  %v224_v59 = vld [vmem:[#allocation3 + $0x148] sm:$0xff] }
  0x33   :  { %3401 = vmatpush1.bf16.msra.mxu1 %v3400_v39  ;;  %3371 = vmatprep.subr.bf16.mxu0 %v3370_v40  ;;  %v228_v60 = vld [vmem:[#allocation3 + $0x168] sm:$0xff]  ;;  %v226_v61 = vld [vmem:[#allocation3 + $0x158] sm:$0xff]  ;;  %v3376_v63 = vpack.c.bf16 %v219_v55, %v215_v54  ;;  %v3408_v1 = vpack.c.bf16 %v221_v58, %v217_v56  ;;  %v223_v3 = vld [vmem:[#allocation3 + $0x140] sm:$0xff] }
  0x34   :  { %3403 = vmatprep.subr.bf16.mxu1 %v3402_v44  ;;  %v230_v62 = vld [vmem:[#allocation3 + $0x178] sm:$0xff]  ;;  %v3378_v2 = vpack.c.bf16 %v228_v60, %v224_v59  ;;  %v227_v4 = vld [vmem:[#allocation3 + $0x160] sm:$0xff]  ;;  %v225_v5 = vld [vmem:[#allocation3 + $0x150] sm:$0xff] }
  0x35   :  { %v3410_v6 = vpack.c.bf16 %v230_v62, %v226_v61  ;;  %v229_v7 = vld [vmem:[#allocation3 + $0x170] sm:$0xff]  ;;  %v232_v8 = vld [vmem:[#allocation3 + $0x188] sm:$0xff]  ;;  %v234_v10 = vld [vmem:[#allocation3 + $0x198] sm:$0xff]  ;;  %v3380_v12 = vpack.c.bf16 %v227_v4, %v223_v3 }
  0x36   :  { %3373 = vmatpush1.bf16.msra.mxu0 %v3372_v51  ;;  %v236_v9 = vld [vmem:[#allocation3 + $0x1a8] sm:$0xff]  ;;  %v238_v11 = vld [vmem:[#allocation3 + $0x1b8] sm:$0xff]  ;;  %v3412_v13 = vpack.c.bf16 %v229_v7, %v225_v5  ;;  %v231_v15 = vld [vmem:[#allocation3 + $0x180] sm:$0xff] }
  0x37   :  { %3405 = vmatpush1.bf16.msra.mxu1 %v3404_v52  ;;  %3375 = vmatprep.subr.bf16.mxu0 %v3374_v53  ;;  %v3382_v14 = vpack.c.bf16 %v236_v9, %v232_v8  ;;  %v235_v16 = vld [vmem:[#allocation3 + $0x1a0] sm:$0xff]  ;;  %v233_v17 = vld [vmem:[#allocation3 + $0x190] sm:$0xff]  ;;  %v3414_v18 = vpack.c.bf16 %v238_v11, %v234_v10  ;;  %v240_v20 = vld [vmem:[#allocation3 + $0x1c8] sm:$0xff] }
  0x38   :  { %3407 = vmatprep.subr.bf16.mxu1 %v3406_v57  ;;  %v237_v19 = vld [vmem:[#allocation3 + $0x1b0] sm:$0xff]  ;;  %v244_v21 = vld [vmem:[#allocation3 + $0x1e8] sm:$0xff]  ;;  %v242_v22 = vld [vmem:[#allocation3 + $0x1d8] sm:$0xff]  ;;  %v3384_v24 = vpack.c.bf16 %v235_v16, %v231_v15 }
  0x39   :  { %v246_v23 = vld [vmem:[#allocation3 + $0x1f8] sm:$0xff]  ;;  %v3416_v25 = vpack.c.bf16 %v237_v19, %v233_v17  ;;  %v3386_v26 = vpack.c.bf16 %v244_v21, %v240_v20  ;;  %v239_v27 = vld [vmem:[#allocation3 + $0x1c0] sm:$0xff]  ;;  %v241_v29 = vld [vmem:[#allocation3 + $0x1d0] sm:$0xff] }
  0x3a   :  { %3377 = vmatpush1.bf16.msra.mxu0 %v3376_v63  ;;  %v243_v28 = vld [vmem:[#allocation3 + $0x1e0] sm:$0xff]  ;;  %v3418_v30 = vpack.c.bf16 %v246_v23, %v242_v22  ;;  %v245_v31 = vld [vmem:[#allocation3 + $0x1f0] sm:$0xff]  ;;  %v53_v32 = vld [vmem:[#allocation5 + $0x8] sm:$0xff] }
  0x3b   :  { %3409 = vmatpush1.bf16.msra.mxu1 %v3408_v1  ;;  %3379 = vmatprep.subr.bf16.mxu0 %v3378_v2  ;;  %v57_v33 = vld [vmem:[#allocation5 + $0x28] sm:$0xff]  ;;  %v55_v34 = vld [vmem:[#allocation5 + $0x18] sm:$0xff]  ;;  %v3388_v36 = vpack.c.bf16 %v243_v28, %v239_v27  ;;  %v3420_v37 = vpack.c.bf16 %v245_v31, %v241_v29  ;;  %v52_v39 = vld [vmem:[#allocation5] sm:$0xff] }
  0x3c   :  { %3411 = vmatprep.subr.bf16.mxu1 %v3410_v6  ;;  %v59_v35 = vld [vmem:[#allocation5 + $0x38] sm:$0xff]  ;;  %v4821_v38 = vpack.c.bf16 %v57_v33, %v53_v32  ;;  %v56_v40 = vld [vmem:[#allocation5 + $0x20] sm:$0xff]  ;;  %v54_v41 = vld [vmem:[#allocation5 + $0x10] sm:$0xff] }
  0x3d   :  { %v4823_v42 = vpack.c.bf16 %v59_v35, %v55_v34  ;;  %v58_v43 = vld [vmem:[#allocation5 + $0x30] sm:$0xff]  ;;  %v61_v44 = vld [vmem:[#allocation5 + $0x48] sm:$0xff]  ;;  %v63_v46 = vld [vmem:[#allocation5 + $0x58] sm:$0xff]  ;;  %v4828_v49 = vpack.c.bf16 %v56_v40, %v52_v39 }
  0x3e   :  { %3381 = vmatpush1.bf16.msra.mxu0 %v3380_v12  ;;  %v65_v45 = vld [vmem:[#allocation5 + $0x68] sm:$0xff]  ;;  %v67_v47 = vld [vmem:[#allocation5 + $0x78] sm:$0xff]  ;;  %v181_v48 = vld [vmem:[%s5694_s0] sm:$0xff]  ;;  %v4831_v50 = vpack.c.bf16 %v58_v43, %v54_v41 }
  0x3f   :  { %3413 = vmatpush1.bf16.msra.mxu1 %v3412_v13  ;;  %3383 = vmatprep.subr.bf16.mxu0 %v3382_v14  ;;  %v4833_v51 = vpack.c.bf16 %v65_v45, %v61_v44  ;;  %v60_v52 = vld [vmem:[#allocation5 + $0x40] sm:$0xff]  ;;  %v62_v54 = vld [vmem:[#allocation5 + $0x50] sm:$0xff]  ;;  %v4836_v55 = vpack.c.bf16 %v67_v47, %v63_v46  ;;  %v69_v57 = vld [vmem:[#allocation5 + $0x88] sm:$0xff] }
  0x40   :  { %3415 = vmatprep.subr.bf16.mxu1 %v3414_v18  ;;  %v64_v53 = vld [vmem:[#allocation5 + $0x60] sm:$0xff]  ;;  %v66_v56 = vld [vmem:[#allocation5 + $0x70] sm:$0xff]  ;;  %v73_v58 = vld [vmem:[#allocation5 + $0xa8] sm:$0xff] }
  0x41   :  { %v71_v59 = vld [vmem:[#allocation5 + $0x98] sm:$0xff]  ;;  %v4839_v61 = vpack.c.bf16 %v64_v53, %v60_v52  ;;  %v4843_v62 = vpack.c.bf16 %v66_v56, %v62_v54  ;;  %v4845_v63 = vpack.c.bf16 %v73_v58, %v69_v57  ;;  %v68_v1 = vld [vmem:[#allocation5 + $0x80] sm:$0xff]  ;;  %v70_v3 = vld [vmem:[#allocation5 + $0x90] sm:$0xff] }
  0x42   :  { %3385 = vmatpush1.bf16.msra.mxu0 %v3384_v24  ;;  %v75_v60 = vld [vmem:[#allocation5 + $0xb8] sm:$0xff]  ;;  %v72_v2 = vld [vmem:[#allocation5 + $0xa0] sm:$0xff]  ;;  %v74_v5 = vld [vmem:[#allocation5 + $0xb0] sm:$0xff] }
  0x43   :  { %3417 = vmatpush1.bf16.msra.mxu1 %v3416_v25  ;;  %3387 = vmatprep.subr.bf16.mxu0 %v3386_v26  ;;  %5815 = vst [vmem:[#allocation9_spill] sm:$0xff] %v4839_v61  ;;  %5816 = vst [vmem:[#allocation10_spill] sm:$0xff] %v4843_v62  ;;  %v4848_v4 = vpack.c.bf16 %v75_v60, %v71_v59  ;;  %v77_v6 = vld [vmem:[#allocation5 + $0xc8] sm:$0xff]  ;;  %v79_v8 = vld [vmem:[#allocation5 + $0xd8] sm:$0xff]  ;;  %v4853_v10 = vpack.c.bf16 %v72_v2, %v68_v1 }
  0x44   :  { %3419 = vmatprep.subr.bf16.mxu1 %v3418_v30  ;;  %5817 = vst [vmem:[#allocation11_spill] sm:$0xff] %v4845_v63  ;;  %v81_v7 = vld [vmem:[#allocation5 + $0xe8] sm:$0xff]  ;;  %v83_v9 = vld [vmem:[#allocation5 + $0xf8] sm:$0xff]  ;;  %v4860_v12 = vpack.c.bf16 %v74_v5, %v70_v3  ;;  %v76_v14 = vld [vmem:[#allocation5 + $0xc0] sm:$0xff] }
  0x45   :  { %5818 = vst [vmem:[#allocation12_spill] sm:$0xff] %v4848_v4  ;;  %5819 = vst [vmem:[#allocation13_spill] sm:$0xff] %v4853_v10  ;;  %v182_v11 = vld [vmem:[%s5694_s0 + $0x8] sm:$0xff]  ;;  %v4862_v13 = vpack.c.bf16 %v81_v7, %v77_v6  ;;  %v80_v15 = vld [vmem:[#allocation5 + $0xe0] sm:$0xff]  ;;  %v4865_v17 = vpack.c.bf16 %v83_v9, %v79_v8 }
  0x46   :  { %3389 = vmatpush1.bf16.msra.mxu0 %v3388_v36  ;;  %5820 = vst [vmem:[#allocation14_spill] sm:$0xff] %v4860_v12  ;;  %v78_v16 = vld [vmem:[#allocation5 + $0xd0] sm:$0xff]  ;;  %v85_v19 = vld [vmem:[#allocation5 + $0x108] sm:$0xff]  ;;  %v87_v21 = vld [vmem:[#allocation5 + $0x118] sm:$0xff]  ;;  %v4869_v23 = vpack.c.bf16 %v80_v15, %v76_v14 }
  0x47   :  { %3421 = vmatpush1.bf16.msra.mxu1 %v3420_v37  ;;  %3423 = vmatprep.subr.bf16.mxu0 %v4821_v38  ;;  %5821 = vst [vmem:[#allocation15_spill] sm:$0xff] %v4862_v13  ;;  %5822 = vst [vmem:[#allocation16_spill] sm:$0xff] %v4865_v17  ;;  %v82_v18 = vld [vmem:[#allocation5 + $0xf0] sm:$0xff]  ;;  %v89_v20 = vld [vmem:[#allocation5 + $0x128] sm:$0xff] }
  0x48   :  { %3455 = vmatprep.subr.bf16.mxu1 %v4823_v42  ;;  %v91_v22 = vld [vmem:[#allocation5 + $0x138] sm:$0xff]  ;;  %5823 = vst [vmem:[#allocation17_spill] sm:$0xff] %v4869_v23  ;;  %v4874_v24 = vpack.c.bf16 %v82_v18, %v78_v16  ;;  %v4876_v25 = vpack.c.bf16 %v89_v20, %v85_v19  ;;  %v84_v26 = vld [vmem:[#allocation5 + $0x100] sm:$0xff]  ;;  %v86_v28 = vld [vmem:[#allocation5 + $0x110] sm:$0xff] }
  0x49   :  { %334 = vmatmul.mubr.f32.vlgmr.msra.gmra.mrb[0].mxu0 %v181_v48  ;;  %v88_v27 = vld [vmem:[#allocation5 + $0x120] sm:$0xff]  ;;  %v4879_v29 = vpack.c.bf16 %v91_v22, %v87_v21  ;;  %v90_v30 = vld [vmem:[#allocation5 + $0x130] sm:$0xff]  ;;  %v93_v31 = vld [vmem:[#allocation5 + $0x148] sm:$0xff] }
  0x4a   :  { %411 = vmatmul.mubr.f32.vlgmr.msra.gmra.mrb[0].mxu1 %v181_v48  ;;  %3425 = vmatpush1.bf16.msra.mxu0 %v4828_v49  ;;  %5824 = vst [vmem:[#allocation18_spill] sm:$0xff] %v4874_v24  ;;  %5825 = vst [vmem:[#allocation19_spill] sm:$0xff] %v4876_v25  ;;  %v97_v32 = vld [vmem:[#allocation5 + $0x168] sm:$0xff]  ;;  %v95_v33 = vld [vmem:[#allocation5 + $0x158] sm:$0xff]  ;;  %v4882_v35 = vpack.c.bf16 %v88_v27, %v84_v26  ;;  %v4886_v36 = vpack.c.bf16 %v90_v30, %v86_v28  ;;  %v249_v30 = vlaneseq }
  0x4b   :  { %3457 = vmatpush1.bf16.msra.mxu1 %v4831_v50  ;;  %3427 = vmatprep.subr.bf16.mxu0 %v4833_v51  ;;  %5826 = vst [vmem:[#allocation20_spill] sm:$0xff] %v4879_v29  ;;  %v99_v34 = vld [vmem:[#allocation5 + $0x178] sm:$0xff]  ;;  %v4888_v37 = vpack.c.bf16 %v97_v32, %v93_v31  ;;  %v92_v39 = vld [vmem:[#allocation5 + $0x140] sm:$0xff]  ;;  %v94_v41 = vld [vmem:[#allocation5 + $0x150] sm:$0xff] }
  0x4c   :  { %3459 = vmatprep.subr.bf16.mxu1 %v4836_v55  ;;  %339 = vmatprep.mubr.f32.mxu0 %v5705_v0  ;;  %5827 = vst [vmem:[#allocation21_spill] sm:$0xff] %v4882_v35  ;;  %5828 = vst [vmem:[#allocation22_spill] sm:$0xff] %v4886_v36  ;;  %v96_v40 = vld [vmem:[#allocation5 + $0x160] sm:$0xff]  ;;  %v4891_v43 = vpack.c.bf16 %v99_v34, %v95_v33  ;;  %v98_v44 = vld [vmem:[#allocation5 + $0x170] sm:$0xff]  ;;  %v4969_v31 = vshrl.u32 %v249_v30, 7 }
  0x4d   :  { %416 = vmatprep.mubr.f32.mxu1 %v5705_v0  ;;  %340 = vmatmul.mubr.f32.gmra.mrb[2].mxu0 %v182_v11  ;;  %5829 = vst [vmem:[#allocation23_spill] sm:$0xff] %v4888_v37  ;;  %v101_v45 = vld [vmem:[#allocation5 + $0x188] sm:$0xff]  ;;  %v103_v47 = vld [vmem:[#allocation5 + $0x198] sm:$0xff]  ;;  %v4894_v52 = vpack.c.bf16 %v96_v40, %v92_v39  ;;  %v4898_v53 = vpack.c.bf16 %v98_v44, %v94_v41  ;;  %v100_v56 = vld [vmem:[#allocation5 + $0x180] sm:$0xff] }
  0x4e   :  { %3429 = vmatpush1.bf16.msra.mxu0 %v4839_v61  ;;  %417 = vmatmul.mubr.f32.gmra.mrb[2].mxu1 %v182_v11  ;;  %5830 = vst [vmem:[#allocation24_spill] sm:$0xff] %v4891_v43  ;;  %v105_v46 = vld [vmem:[#allocation5 + $0x1a8] sm:$0xff]  ;;  %v107_v48 = vld [vmem:[#allocation5 + $0x1b8] sm:$0xff]  ;;  %v104_v57 = vld [vmem:[#allocation5 + $0x1a0] sm:$0xff]  ;;  %v5704_v39 = vsub.s32 0, %v4969_v31  ;;  %v5703_v44 = vsub.s32 1, %v4969_v31 }
  0x4f   :  { %3461 = vmatpush1.bf16.msra.mxu1 %v4843_v62  ;;  %3431 = vmatprep.subr.bf16.mxu0 %v4845_v63  ;;  %5831 = vst [vmem:[#allocation25_spill] sm:$0xff] %v4894_v52  ;;  %5832 = vst [vmem:[#allocation26_spill] sm:$0xff] %v4898_v53  ;;  %v4900_v54 = vpack.c.bf16 %v105_v46, %v101_v45  ;;  %v102_v58 = vld [vmem:[#allocation5 + $0x190] sm:$0xff]  ;;  %v4903_v59 = vpack.c.bf16 %v107_v48, %v103_v47  ;;  %v109_v1 = vld [vmem:[#allocation5 + $0x1c8] sm:$0xff]  ;;  %v5701_v45 = vsub.s32 2, %v4969_v31 }
  0x50   :  { %3463 = vmatprep.subr.bf16.mxu1 %v4848_v4  ;;  %510 = vmatprep.mubr.f32.mxu0 %v5705_v0  ;;  %v106_v60 = vld [vmem:[#allocation5 + $0x1b0] sm:$0xff]  ;;  %v113_v2 = vld [vmem:[#allocation5 + $0x1e8] sm:$0xff]  ;;  %v111_v3 = vld [vmem:[#allocation5 + $0x1d8] sm:$0xff]  ;;  %v4906_v6 = vpack.c.bf16 %v104_v57, %v100_v56  ;;  %v5702_v46 = vsub.s32 3, %v4969_v31 }
  0x51   :  { %581 = vmatprep.mubr.f32.mxu1 %v5705_v0  ;;  %5833 = vst [vmem:[#allocation27_spill] sm:$0xff] %v4900_v54  ;;  %5834 = vst [vmem:[#allocation28_spill] sm:$0xff] %v4903_v59  ;;  %v115_v5 = vld [vmem:[#allocation5 + $0x1f8] sm:$0xff]  ;;  %v4910_v7 = vpack.c.bf16 %v106_v60, %v102_v58  ;;  %v4912_v8 = vpack.c.bf16 %v113_v2, %v109_v1  ;;  %v108_v9 = vld [vmem:[#allocation5 + $0x1c0] sm:$0xff] }
  0x52   :  { %3433 = vmatpush1.bf16.msra.mxu0 %v4853_v10  ;;  %5835 = vst [vmem:[#allocation29_spill] sm:$0xff] %v4906_v6  ;;  %v112_v11 = vld [vmem:[#allocation5 + $0x1e0] sm:$0xff]  ;;  %v4915_v14 = vpack.c.bf16 %v115_v5, %v111_v3  ;;  %v110_v15 = vld [vmem:[#allocation5 + $0x1d0] sm:$0xff]  ;;  %v118_v20 = vld [vmem:[#allocation5 + $0x208] sm:$0xff] }
  0x53   :  { %3465 = vmatpush1.bf16.msra.mxu1 %v4860_v12  ;;  %3435 = vmatprep.subr.bf16.mxu0 %v4862_v13  ;;  %5836 = vst [vmem:[#allocation30_spill] sm:$0xff] %v4910_v7  ;;  %5837 = vst [vmem:[#allocation31_spill] sm:$0xff] %v4912_v8  ;;  %v114_v16 = vld [vmem:[#allocation5 + $0x1f0] sm:$0xff]  ;;  %v4918_v18 = vpack.c.bf16 %v112_v11, %v108_v9  ;;  %v122_v21 = vld [vmem:[#allocation5 + $0x228] sm:$0xff] }
  0x54   :  { %3467 = vmatprep.subr.bf16.mxu1 %v4865_v17  ;;  %5838 = vst [vmem:[#allocation32_spill] sm:$0xff] %v4915_v14  ;;  %v4922_v19 = vpack.c.bf16 %v114_v16, %v110_v15  ;;  %v120_v22 = vld [vmem:[#allocation5 + $0x218] sm:$0xff]  ;;  %v4963_v26 = vpack.c.bf16 %v122_v21, %v118_v20  ;;  %v247_v41 = vld [vmem:[%s5697_s3] sm:$0xf] }
  0x55   :  { %5839 = vst [vmem:[#allocation33_spill] sm:$0xff] %v4918_v18  ;;  %v124_v27 = vld [vmem:[#allocation5 + $0x238] sm:$0xff]  ;;  %v252_v47 = vrot.slane %v247_v41, %v5704_v39  ;;  %v256_v48 = vrot.slane %v247_v41, %v5703_v44  ;;  %v260_v56 = vrot.slane %v247_v41, %v5701_v45  ;;  %v264_v58 = vrot.slane %v247_v41, %v5702_v46  ;;  %v131_v39 = vld [vmem:[#allocation5 + $0x270] sm:$0xff] }
  0x56   :  { %3437 = vmatpush1.bf16.msra.mxu0 %v4869_v23  ;;  %5840 = vst [vmem:[#allocation34_spill] sm:$0xff] %v4922_v19  ;;  %5841 = vst [vmem:[#allocation35_spill] sm:$0xff] %v4963_v26  ;;  %v4965_v28 = vpack.c.bf16 %v124_v27, %v120_v22 }
  0x57   :  { %3469 = vmatpush1.bf16.msra.mxu1 %v4874_v24  ;;  %3439 = vmatprep.subr.bf16.mxu0 %v4876_v25 }
  0x58   :  { %3471 = vmatprep.subr.bf16.mxu1 %v4879_v29  ;;  %5842 = vst [vmem:[#allocation36_spill] sm:$0xff] %v4965_v28 }
  0x5a   :  { %3441 = vmatpush1.bf16.msra.mxu0 %v4882_v35 }
  0x5b   :  { %3473 = vmatpush1.bf16.msra.mxu1 %v4886_v36  ;;  %3443 = vmatprep.subr.bf16.mxu0 %v4888_v37 }
  0x5c   :  { %3475 = vmatprep.subr.bf16.mxu1 %v4891_v43 }
  0x5e   :  { %3445 = vmatpush1.bf16.msra.mxu0 %v4894_v52 }
  0x5f   :  { %3477 = vmatpush1.bf16.msra.mxu1 %v4898_v53  ;;  %3447 = vmatprep.subr.bf16.mxu0 %v4900_v54 }
  0x60   :  { %3479 = vmatprep.subr.bf16.mxu1 %v4903_v59 }
  0x62   :  { %3449 = vmatpush1.bf16.msra.mxu0 %v4906_v6 }
  0x63   :  { %3481 = vmatpush1.bf16.msra.mxu1 %v4910_v7  ;;  %3451 = vmatprep.subr.bf16.mxu0 %v4912_v8 }
  0x64   :  { %3483 = vmatprep.subr.bf16.mxu1 %v4915_v14 }
  0x66   :  { %3453 = vmatpush1.bf16.msra.mxu0 %v4918_v18 }
  0x67   :  { %3485 = vmatpush1.bf16.msra.mxu1 %v4922_v19  ;;  %3487 = vmatprep.subr.bf16.mxu0 %v4821_v38 }
  0x68   :  { %3519 = vmatprep.subr.bf16.mxu1 %v4823_v42 }
  0x69   :  { %511 = vmatmul.mubr.f32.vlgmr.msra.gmra.mrb[4].mxu0 %v5705_v0 }
  0x6a   :  { %582 = vmatmul.mubr.f32.vlgmr.msra.gmra.mrb[4].mxu1 %v5705_v0  ;;  %3489 = vmatpush1.bf16.msra.mxu0 %v4828_v49 }
  0x6b   :  { %3521 = vmatpush1.bf16.msra.mxu1 %v4831_v50  ;;  %3491 = vmatprep.subr.bf16.mxu0 %v4833_v51 }
  0x6c   :  { %3523 = vmatprep.subr.bf16.mxu1 %v4836_v55  ;;  %680 = vmatprep.mubr.f32.mxu0 %v5705_v0 }
  0x6d   :  { %751 = vmatprep.mubr.f32.mxu1 %v5705_v0  ;;  %v134_v0 = vld [vmem:[#allocation5 + $0x288] sm:$0xff] }
  0x6e   :  { %3493 = vmatpush1.bf16.msra.mxu0 %v4839_v61 }
  0x6f   :  { %3525 = vmatpush1.bf16.msra.mxu1 %v4843_v62  ;;  %3495 = vmatprep.subr.bf16.mxu0 %v4845_v63 }
  0x70   :  { %3527 = vmatprep.subr.bf16.mxu1 %v4848_v4 }
  0x72   :  { %3497 = vmatpush1.bf16.msra.mxu0 %v4853_v10 }
  0x73   :  { %3529 = vmatpush1.bf16.msra.mxu1 %v4860_v12  ;;  %3499 = vmatprep.subr.bf16.mxu0 %v4862_v13 }
  0x74   :  { %3531 = vmatprep.subr.bf16.mxu1 %v4865_v17 }
  0x76   :  { %3501 = vmatpush1.bf16.msra.mxu0 %v4869_v23 }
  0x77   :  { %3533 = vmatpush1.bf16.msra.mxu1 %v4874_v24  ;;  %3503 = vmatprep.subr.bf16.mxu0 %v4876_v25 }
  0x78   :  { %3535 = vmatprep.subr.bf16.mxu1 %v4879_v29 }
  0x7a   :  { %3505 = vmatpush1.bf16.msra.mxu0 %v4882_v35 }
  0x7b   :  { %3537 = vmatpush1.bf16.msra.mxu1 %v4886_v36  ;;  %3507 = vmatprep.subr.bf16.mxu0 %v4888_v37 }
  0x7c   :  { %3539 = vmatprep.subr.bf16.mxu1 %v4891_v43 }
  0x7e   :  { %3509 = vmatpush1.bf16.msra.mxu0 %v4894_v52 }
  0x7f   :  { %3541 = vmatpush1.bf16.msra.mxu1 %v4898_v53  ;;  %3511 = vmatprep.subr.bf16.mxu0 %v4900_v54 }
  0x80   :  { %3543 = vmatprep.subr.bf16.mxu1 %v4903_v59 }
  0x82   :  { %3513 = vmatpush1.bf16.msra.mxu0 %v4906_v6 }
  0x83   :  { %3545 = vmatpush1.bf16.msra.mxu1 %v4910_v7  ;;  %3515 = vmatprep.subr.bf16.mxu0 %v4912_v8 }
  0x84   :  { %3547 = vmatprep.subr.bf16.mxu1 %v4915_v14 }
  0x86   :  { %3517 = vmatpush1.bf16.msra.mxu0 %v4918_v18 }
  0x87   :  { %3549 = vmatpush1.bf16.msra.mxu1 %v4922_v19  ;;  %3551 = vmatprep.subr.bf16.mxu0 %v4963_v26 }
  0x88   :  { %3583 = vmatprep.subr.bf16.mxu1 %v4965_v28 }
 0x11c   :  { %v335_v32 = vpop.f32.mrb[0].mxu0 }
 0x11d   :  { %v337_v33 = vpop.f32.mrb[1].mxu0  ;;  %v412_v34 = vpop.f32.mrb[0].mxu1  ;;  %v4994_v15 = vadd.f32 %v335_v32, %v252_v47 }
 0x11e   :  { %v414_v40 = vpop.f32.mrb[1].mxu1  ;;  %v4996_v16 = vadd.f32 %v337_v33, %v256_v48  ;;  %v5003_v32 = vadd.f32 %v412_v34, %v260_v56 }
 0x11f   :  { %5847 = vst [vmem:[#allocation41_spill] sm:$0xff] %v4994_v15 }
 0x120   :  { %v341_v57 = vpop.f32.mrb[2].mxu0  ;;  %5848 = vst [vmem:[#allocation42_spill] sm:$0xff] %v4996_v16  ;;  %5850 = vst [vmem:[#allocation44_spill] sm:$0xff] %v5003_v32 }
 0x121   :  { %v4986_v60 = vadd.f32 %v341_v57, %v252_v47  ;;  %v343_v1 = vpop.f32.mrb[3].mxu0  ;;  %v418_v2 = vpop.f32.mrb[2].mxu1 }
 0x122   :  { %v4988_v3 = vadd.f32 %v343_v1, %v256_v48  ;;  %v4990_v5 = vadd.f32 %v418_v2, %v260_v56  ;;  %v420_v9 = vpop.f32.mrb[3].mxu1  ;;  %v5000_v2 = vadd.f32 %v414_v40, %v264_v58  ;;  %v117_v56 = vld [vmem:[#allocation5 + $0x200] sm:$0xff] }
 0x123   :  { %5843 = vst [vmem:[#allocation37_spill] sm:$0xff] %v4986_v60  ;;  %v4992_v11 = vadd.f32 %v420_v9, %v264_v58  ;;  %v144_v60 = vld [vmem:[#allocation5 + $0x2d8] sm:$0xff] }
 0x124   :  { %5844 = vst [vmem:[#allocation38_spill] sm:$0xff] %v4988_v3  ;;  %5845 = vst [vmem:[#allocation39_spill] sm:$0xff] %v4990_v5  ;;  %v138_v5 = vld [vmem:[#allocation5 + $0x2a8] sm:$0xff]  ;;  %v140_v3 = vld [vmem:[#allocation5 + $0x2b8] sm:$0xff] }
 0x125   :  { %5846 = vst [vmem:[#allocation40_spill] sm:$0xff] %v4992_v11  ;;  %5849 = vst [vmem:[#allocation43_spill] sm:$0xff] %v5000_v2  ;;  %v136_v11 = vld [vmem:[#allocation5 + $0x298] sm:$0xff] }
 0x13c   :  { %v512_v20 = vpop.f32.mrb[4].mxu0 }
 0x13d   :  { %v588_v21 = vadd.f32 %v512_v20, %v4994_v15  ;;  %v583_v22 = vpop.f32.mrb[4].mxu1  ;;  %v514_v27 = vpop.f32.mrb[5].mxu0 }
 0x13e   :  { %v589_v30 = vadd.f32 %v514_v27, %v4996_v16  ;;  %v585_v41 = vpop.f32.mrb[5].mxu1  ;;  %v590_v47 = vadd.f32 %v583_v22, %v5003_v32  ;;  %v121_v22 = vld [vmem:[#allocation5 + $0x220] sm:$0xff] }
 0x13f   :  { %v3309_v57 = vmul.f32 -1.442695, %v588_v21  ;;  %v591_v9 = vadd.f32 %v585_v41, %v5000_v2  ;;  %v5009_v44 = vpack.c.bf16 %v121_v22, %v117_v56  ;;  %v133_v22 = vld [vmem:[#allocation5 + $0x280] sm:$0xff] }
 0x140   :  { %v3310_v1 = vmul.f32 -1.442695, %v589_v30 }
 0x141   :  { %4451 = vpow2.f32 %v3309_v57  ;;  %v3311_v33 = vmul.f32 -1.442695, %v591_v9  ;;  %v119_v9 = vld [vmem:[#allocation5 + $0x210] sm:$0xff]  ;;  %5851 = vst [vmem:[#allocation45_spill] sm:$0xff] %v5009_v44 }
 0x142   :  { %4453 = vpow2.f32 %v3310_v1 }
 0x143   :  { %4455 = vpow2.f32 %v3311_v33  ;;  %v123_v33 = vld [vmem:[#allocation5 + $0x230] sm:$0xff] }
 0x144   :  { %4457 = vtanh.f32 %v590_v47  ;;  %v126_v47 = vld [vmem:[#allocation5 + $0x248] sm:$0xff] }
 0x14b   :  { %v4452_v48 = vpop.eup %4451 }
 0x14c   :  { %v4454_v20 = vpop.eup %4453  ;;  %v595_v45 = vadd.f32 1.0, %v4452_v48  ;;  %v130_v48 = vld [vmem:[#allocation5 + $0x268] sm:$0xff] }
 0x14d   :  { %v601_v27 = vadd.f32 1.0, %v4454_v20  ;;  %v4456_v21 = vpop.eup %4455  ;;  %v132_v20 = vld [vmem:[#allocation5 + $0x278] sm:$0xff] }
 0x14e   :  { %4459 = vrcp.f32 %v595_v45  ;;  %v4458_v30 = vpop.eup %4457  ;;  %v608_v1 = vadd.f32 1.0, %v4456_v21  ;;  %v128_v45 = vld [vmem:[#allocation5 + $0x258] sm:$0xff]  ;;  %v125_v21 = vld [vmem:[#allocation5 + $0x240] sm:$0xff] }
 0x14f   :  { %4461 = vrcp.f32 %v601_v27 }
 0x150   :  { %4463 = vrcp.f32 %v608_v1  ;;  %v5017_v1 = vpack.c.bf16 %v132_v20, %v128_v45  ;;  %v139_v45 = vld [vmem:[#allocation5 + $0x2b0] sm:$0xff]  ;;  %v142_v20 = vld [vmem:[#allocation5 + $0x2c8] sm:$0xff] }
 0x152   :  { %5854 = vst [vmem:[#allocation48_spill] sm:$0xff] %v5017_v1 }
 0x158   :  { %v4460_v40 = vpop.eup %4459 }
 0x159   :  { %v4462_v58 = vpop.eup %4461  ;;  %v612_v57 = vmul.f32 %v4460_v40, %v4458_v30  ;;  %v5011_v30 = vpack.c.bf16 %v123_v33, %v119_v9  ;;  %v129_v40 = vld [vmem:[#allocation5 + $0x260] sm:$0xff]  ;;  %v5029_v33 = vpack.c.bf16 %v138_v5, %v134_v0 }
 0x15a   :  { %v611_v41 = vmul.f32 0.0, %v4462_v58  ;;  %v4464_v27 = vpop.eup %4463  ;;  %v137_v9 = vld [vmem:[#allocation5 + $0x2a0] sm:$0xff] }
 0x15b   :  { %5852 = vst [vmem:[#allocation46_spill] sm:$0xff] %v5011_v30  ;;  %5857 = vst [vmem:[#allocation51_spill] sm:$0xff] %v5029_v33  ;;  %v145_v5 = vld [vmem:[#allocation5 + $0x2e0] sm:$0xff] }
 0x15c   :  { %v5006_v34 = vadd.f32 %v612_v57, %v611_v41  ;;  %v5015_v57 = vpack.c.bf16 %v130_v48, %v126_v47  ;;  %v127_v41 = vld [vmem:[#allocation5 + $0x250] sm:$0xff]  ;;  %v5031_v47 = vpack.c.bf16 %v140_v3, %v136_v11  ;;  %v141_v3 = vld [vmem:[#allocation5 + $0x2c0] sm:$0xff] }
 0x15d   :  { %v5025_v56 = vpack.c.bf16 %v131_v39, %v127_v41  ;;  %v135_v48 = vld [vmem:[#allocation5 + $0x290] sm:$0xff]  ;;  %v5037_v39 = vpack.c.bf16 %v137_v9, %v133_v22  ;;  %v5049_v22 = vpack.c.bf16 %v145_v5, %v141_v3  ;;  %v157_v5 = vld [vmem:[#allocation5 + $0x340] sm:$0xff] }
 0x15e   :  { %4465 = vtanh.f32 %v5006_v34  ;;  %5853 = vst [vmem:[#allocation47_spill] sm:$0xff] %v5015_v57  ;;  %5858 = vst [vmem:[#allocation52_spill] sm:$0xff] %v5031_v47  ;;  %v5039_v0 = vpack.c.bf16 %v139_v45, %v135_v48  ;;  %v143_v41 = vld [vmem:[#allocation5 + $0x2d0] sm:$0xff]  ;;  %v149_v48 = vld [vmem:[#allocation5 + $0x300] sm:$0xff] }
 0x15f   :  { %5856 = vst [vmem:[#allocation50_spill] sm:$0xff] %v5025_v56  ;;  %5860 = vst [vmem:[#allocation53_spill] sm:$0xff] %v5037_v39  ;;  %v153_v45 = vld [vmem:[#allocation5 + $0x320] sm:$0xff] }
 0x160   :  { %5861 = vst [vmem:[#allocation54_spill] sm:$0xff] %v5039_v0  ;;  %5864 = vst [vmem:[#allocation57_spill] sm:$0xff] %v5049_v22 }
 0x168   :  { %v4466_v46 = vpop.eup %4465 }
 0x169   :  { %v5013_v58 = vmul.f32 %v4466_v46, %v4464_v27  ;;  %v5023_v46 = vpack.c.bf16 %v129_v40, %v125_v21  ;;  %v146_v27 = vld [vmem:[#allocation5 + $0x2e8] sm:$0xff]  ;;  %v5859_v21 = vmov 0.0  }
 0x16a   :  { %v5043_v11 = vpack.c.bf16 %v146_v27, %v142_v20  ;;  %v151_v20 = vld [vmem:[#allocation5 + $0x310] sm:$0xff] }
 0x16b   :  { %681 = vmatmul.mubr.f32.vlgmr.msra.gmra.mrb[6].mxu0 %v5013_v58  ;;  %752 = vmatmul.mubr.f32.vlgmr.msra.gmra.mrb[6].mxu1 %v5013_v58  ;;  %5855 = vst [vmem:[#allocation49_spill] sm:$0xff] %v5023_v46  ;;  %v155_v27 = vld [vmem:[#allocation5 + $0x330] sm:$0xff] }
 0x16c   :  { %3553 = vmatpush1.bf16.msra.mxu0 %v5009_v44  ;;  %3585 = vmatpush1.bf16.msra.mxu1 %v5011_v30  ;;  %v148_v30 = vld [vmem:[#allocation5 + $0x2f8] sm:$0xff]  ;;  %5862 = vst [vmem:[#allocation55_spill] sm:$0xff] %v5043_v11  ;;  %v5063_v3 = vpack.c.bf16 %v155_v27, %v151_v20  ;;  %v165_v20 = vld [vmem:[#allocation5 + $0x380] sm:$0xff] }
 0x16d   :  { %3555 = vmatprep.subr.bf16.mxu0 %v5015_v57  ;;  %3587 = vmatprep.subr.bf16.mxu1 %v5017_v1  ;;  %v5045_v40 = vpack.c.bf16 %v148_v30, %v144_v60  ;;  %v147_v1 = vld [vmem:[#allocation5 + $0x2f0] sm:$0xff]  ;;  %v150_v57 = vld [vmem:[#allocation5 + $0x308] sm:$0xff]  ;;  %v152_v44 = vld [vmem:[#allocation5 + $0x318] sm:$0xff] }
 0x16e   :  { %866 = vmatprep.mubr.f32.mxu0 %v5859_v21  ;;  %937 = vmatprep.mubr.f32.mxu1 %v5859_v21  ;;  %v5051_v9 = vpack.c.bf16 %v147_v1, %v143_v41  ;;  %v5061_v1 = vpack.c.bf16 %v153_v45, %v149_v48  ;;  %5869 = vst [vmem:[#allocation62_spill] sm:$0xff] %v5063_v3  ;;  %v161_v41 = vld [vmem:[#allocation5 + $0x360] sm:$0xff] }
 0x16f   :  { %5863 = vst [vmem:[#allocation56_spill] sm:$0xff] %v5045_v40  ;;  %v5073_v48 = vpack.c.bf16 %v161_v41, %v157_v5  ;;  %v169_v27 = vld [vmem:[#allocation5 + $0x3a0] sm:$0xff] }
 0x170   :  { %3557 = vmatpush1.bf16.msra.mxu0 %v5023_v46  ;;  %3589 = vmatpush1.bf16.msra.mxu1 %v5025_v56  ;;  %v154_v46 = vld [vmem:[#allocation5 + $0x328] sm:$0xff]  ;;  %v156_v56 = vld [vmem:[#allocation5 + $0x338] sm:$0xff]  ;;  %5865 = vst [vmem:[#allocation58_spill] sm:$0xff] %v5051_v9  ;;  %5868 = vst [vmem:[#allocation61_spill] sm:$0xff] %v5061_v1  ;;  %v5085_v5 = vpack.c.bf16 %v169_v27, %v165_v20 }
 0x171   :  { %3559 = vmatprep.subr.bf16.mxu0 %v5029_v33  ;;  %3591 = vmatprep.subr.bf16.mxu1 %v5031_v47  ;;  %v5055_v60 = vpack.c.bf16 %v154_v46, %v150_v57  ;;  %v5057_v30 = vpack.c.bf16 %v156_v56, %v152_v44  ;;  %v158_v47 = vld [vmem:[#allocation5 + $0x348] sm:$0xff]  ;;  %v160_v33 = vld [vmem:[#allocation5 + $0x358] sm:$0xff]  ;;  %v159_v46 = vld [vmem:[#allocation5 + $0x350] sm:$0xff] }
 0x172   :  { %v163_v56 = vld [vmem:[#allocation5 + $0x370] sm:$0xff] }
 0x173   :  { %5866 = vst [vmem:[#allocation59_spill] sm:$0xff] %v5055_v60  ;;  %5867 = vst [vmem:[#allocation60_spill] sm:$0xff] %v5057_v30  ;;  %v5075_v45 = vpack.c.bf16 %v163_v56, %v159_v46  ;;  %v173_v46 = vld [vmem:[#allocation5 + $0x3c0] sm:$0xff]  ;;  %v179_v56 = vld [vmem:[#allocation5 + $0x3f0] sm:$0xff] }
 0x174   :  { %3561 = vmatpush1.bf16.msra.mxu0 %v5037_v39  ;;  %3593 = vmatpush1.bf16.msra.mxu1 %v5039_v0  ;;  %v162_v39 = vld [vmem:[#allocation5 + $0x368] sm:$0xff]  ;;  %v164_v0 = vld [vmem:[#allocation5 + $0x378] sm:$0xff] }
 0x175   :  { %3563 = vmatprep.subr.bf16.mxu0 %v5043_v11  ;;  %3595 = vmatprep.subr.bf16.mxu1 %v5045_v40  ;;  %v5067_v44 = vpack.c.bf16 %v162_v39, %v158_v47  ;;  %v5069_v57 = vpack.c.bf16 %v164_v0, %v160_v33  ;;  %v166_v40 = vld [vmem:[#allocation5 + $0x388] sm:$0xff]  ;;  %v168_v11 = vld [vmem:[#allocation5 + $0x398] sm:$0xff]  ;;  %v167_v39 = vld [vmem:[#allocation5 + $0x390] sm:$0xff] }
 0x176   :  { %v171_v0 = vld [vmem:[#allocation5 + $0x3b0] sm:$0xff] }
 0x177   :  { %v5087_v41 = vpack.c.bf16 %v171_v0, %v167_v39 }
 0x178   :  { %3565 = vmatpush1.bf16.msra.mxu0 %v5049_v22  ;;  %3597 = vmatpush1.bf16.msra.mxu1 %v5051_v9  ;;  %v170_v22 = vld [vmem:[#allocation5 + $0x3a8] sm:$0xff]  ;;  %v172_v9 = vld [vmem:[#allocation5 + $0x3b8] sm:$0xff] }
 0x179   :  { %3567 = vmatprep.subr.bf16.mxu0 %v5055_v60  ;;  %3599 = vmatprep.subr.bf16.mxu1 %v5057_v30  ;;  %v5079_v33 = vpack.c.bf16 %v170_v22, %v166_v40  ;;  %v5081_v47 = vpack.c.bf16 %v172_v9, %v168_v11  ;;  %v174_v30 = vld [vmem:[#allocation5 + $0x3c8] sm:$0xff]  ;;  %v176_v60 = vld [vmem:[#allocation5 + $0x3d8] sm:$0xff]  ;;  %v177_v22 = vld [vmem:[#allocation5 + $0x3e0] sm:$0xff] }
 0x17a   :  { %v175_v9 = vld [vmem:[#allocation5 + $0x3d0] sm:$0xff]  ;;  %v5097_v20 = vpack.c.bf16 %v177_v22, %v173_v46 }
 0x17b   :  { %5870 = vst [vmem:[#allocation63_spill] sm:$0xff] %v5081_v47  ;;  %v5099_v27 = vpack.c.bf16 %v179_v56, %v175_v9 }
 0x17c   :  { %3569 = vmatpush1.bf16.msra.mxu0 %v5061_v1  ;;  %3601 = vmatpush1.bf16.msra.mxu1 %v5063_v3  ;;  %v178_v1 = vld [vmem:[#allocation5 + $0x3e8] sm:$0xff]  ;;  %v180_v3 = vld [vmem:[#allocation5 + $0x3f8] sm:$0xff] }
 0x17d   :  { %3571 = vmatprep.subr.bf16.mxu0 %v5067_v44  ;;  %3603 = vmatprep.subr.bf16.mxu1 %v5069_v57  ;;  %v5091_v11 = vpack.c.bf16 %v178_v1, %v174_v30  ;;  %v5093_v40 = vpack.c.bf16 %v180_v3, %v176_v60 }
 0x180   :  { %3573 = vmatpush1.bf16.msra.mxu0 %v5073_v48  ;;  %3605 = vmatpush1.bf16.msra.mxu1 %v5075_v45 }
 0x181   :  { %3575 = vmatprep.subr.bf16.mxu0 %v5079_v33  ;;  %3607 = vmatprep.subr.bf16.mxu1 %v5081_v47 }
 0x184   :  { %3577 = vmatpush1.bf16.msra.mxu0 %v5085_v5  ;;  %3609 = vmatpush1.bf16.msra.mxu1 %v5087_v41 }
 0x185   :  { %3579 = vmatprep.subr.bf16.mxu0 %v5091_v11  ;;  %3611 = vmatprep.subr.bf16.mxu1 %v5093_v40 }
 0x188   :  { %3581 = vmatpush1.bf16.msra.mxu0 %v5097_v20  ;;  %3613 = vmatpush1.bf16.msra.mxu1 %v5099_v27 }
 0x189   :  { %3615 = vmatprep.subr.bf16.mxu0 %v4821_v38  ;;  %3647 = vmatprep.subr.bf16.mxu1 %v4823_v42 }
 0x18b   :  { %867 = vmatmul.mubr.f32.vlgmr.msra.gmra.mrb[8].mxu0 %v5013_v58  ;;  %938 = vmatmul.mubr.f32.vlgmr.msra.gmra.mrb[8].mxu1 %v5013_v58 }
 0x18c   :  { %3617 = vmatpush1.bf16.msra.mxu0 %v4828_v49  ;;  %3649 = vmatpush1.bf16.msra.mxu1 %v4831_v50 }
 0x18d   :  { %3619 = vmatprep.subr.bf16.mxu0 %v4833_v51  ;;  %3651 = vmatprep.subr.bf16.mxu1 %v4836_v55 }
 0x18e   :  { %1035 = vmatprep.mubr.f32.mxu0 %v5859_v21  ;;  %1106 = vmatprep.mubr.f32.mxu1 %v5859_v21 }
 0x190   :  { %3621 = vmatpush1.bf16.msra.mxu0 %v4839_v61  ;;  %3653 = vmatpush1.bf16.msra.mxu1 %v4843_v62 }
 0x191   :  { %3623 = vmatprep.subr.bf16.mxu0 %v4845_v63  ;;  %3655 = vmatprep.subr.bf16.mxu1 %v4848_v4 }
 0x194   :  { %3625 = vmatpush1.bf16.msra.mxu0 %v4853_v10  ;;  %3657 = vmatpush1.bf16.msra.mxu1 %v4860_v12 }
 0x195   :  { %3627 = vmatprep.subr.bf16.mxu0 %v4862_v13  ;;  %3659 = vmatprep.subr.bf16.mxu1 %v4865_v17 }
 0x198   :  { %3629 = vmatpush1.bf16.msra.mxu0 %v4869_v23  ;;  %3661 = vmatpush1.bf16.msra.mxu1 %v4874_v24 }
 0x199   :  { %3631 = vmatprep.subr.bf16.mxu0 %v4876_v25  ;;  %3663 = vmatprep.subr.bf16.mxu1 %v4879_v29 }
 0x19c   :  { %3633 = vmatpush1.bf16.msra.mxu0 %v4882_v35  ;;  %3665 = vmatpush1.bf16.msra.mxu1 %v4886_v36 }
 0x19d   :  { %3635 = vmatprep.subr.bf16.mxu0 %v4888_v37  ;;  %3667 = vmatprep.subr.bf16.mxu1 %v4891_v43 }
 0x1a0   :  { %3637 = vmatpush1.bf16.msra.mxu0 %v4894_v52  ;;  %3669 = vmatpush1.bf16.msra.mxu1 %v4898_v53 }
 0x1a1   :  { %3639 = vmatprep.subr.bf16.mxu0 %v4900_v54  ;;  %3671 = vmatprep.subr.bf16.mxu1 %v4903_v59 }
 0x1a4   :  { %3641 = vmatpush1.bf16.msra.mxu0 %v4906_v6  ;;  %3673 = vmatpush1.bf16.msra.mxu1 %v4910_v7 }
 0x1a5   :  { %3643 = vmatprep.subr.bf16.mxu0 %v4912_v8  ;;  %3675 = vmatprep.subr.bf16.mxu1 %v4915_v14 }
 0x1a8   :  { %3645 = vmatpush1.bf16.msra.mxu0 %v4918_v18  ;;  %3677 = vmatpush1.bf16.msra.mxu1 %v4922_v19 }
 0x1a9   :  { %3679 = vmatprep.subr.bf16.mxu0 %v4963_v26  ;;  %3711 = vmatprep.subr.bf16.mxu1 %v4965_v28 }
 0x23e   :  { %v682_v58 = vpop.f32.mrb[6].mxu0  ;;  %v753_v60 = vpop.f32.mrb[6].mxu1 }
 0x23f   :  { %v762_v30 = vrot.slane %v682_v58, 6  ;;  %v684_v1 = vpop.f32.mrb[7].mxu0  ;;  %v755_v3 = vpop.f32.mrb[7].mxu1  ;;  %v764_v26 = vrot.slane %v753_v60, 6 }
 0x240   :  { %v763_v39 = vrot.slane %v684_v1, 6  ;;  %v765_v56 = vrot.slane %v755_v3, 6 }
 0x241   :  { %v770_v0 = vadd.f32 %v762_v30, %v4994_v15  ;;  %v772_v28 = vadd.f32 %v764_v26, %v5003_v32  ;;  %v3308_v30 = vld [vmem:[%s5697_s3 + $0x4] sm:$0xf]  ;;  %v5872_v26 = vsub.s32 1, %v4969_v31 }
 0x242   :  { %v771_v46 = vadd.f32 %v763_v39, %v4996_v16  ;;  %v773_v19 = vadd.f32 %v765_v56, %v5000_v2 }
 0x243   :  { %v3312_v22 = vmul.f32 -1.442695, %v770_v0  ;;  %v5871_v0 = vsub.s32 0, %v4969_v31 }
 0x244   :  { %v3313_v9 = vmul.f32 -1.442695, %v771_v46  ;;  %v3314_v18 = vmul.f32 -1.442695, %v773_v19  ;;  %v5156_v46 = vrot.slane %v3308_v30, %v5872_v26  ;;  %v5873_v26 = vsub.s32 3, %v4969_v31 }
 0x245   :  { %4467 = vpow2.f32 %v3312_v22  ;;  %v5152_v60 = vrot.slane %v3308_v30, %v5871_v0 }
 0x246   :  { %4469 = vpow2.f32 %v3313_v9  ;;  %v5165_v15 = vrot.slane %v3308_v30, %v5873_v26  ;;  %v5879_v26 = vld [vmem:[#allocation49_spill] sm:$0xff] }
 0x247   :  { %4471 = vpow2.f32 %v3314_v18 }
 0x248   :  { %4473 = vtanh.f32 %v772_v28 }
 0x24f   :  { %v4468_v14 = vpop.eup %4467 }
 0x250   :  { %v4470_v58 = vpop.eup %4469  ;;  %v777_v8 = vadd.f32 1.0, %v4468_v14  ;;  %v794_v14 = vrot.slane %v5006_v34, 6 }
 0x251   :  { %v783_v1 = vadd.f32 1.0, %v4470_v58  ;;  %v4472_v3 = vpop.eup %4471 }
 0x252   :  { %4475 = vrcp.f32 %v777_v8  ;;  %v4474_v39 = vpop.eup %4473  ;;  %v790_v28 = vadd.f32 1.0, %v4472_v3 }
 0x253   :  { %4477 = vrcp.f32 %v783_v1 }
 0x254   :  { %4479 = vrcp.f32 %v790_v28 }
 0x25c   :  { %v4476_v19 = vpop.eup %4475 }
 0x25d   :  { %v4478_v18 = vpop.eup %4477  ;;  %v797_v8 = vmul.f32 %v4476_v19, %v4474_v39  ;;  %v5874_v39 = vsub.s32 2, %v4969_v31  ;;  %v5875_v31 = vld [vmem:[#allocation45_spill] sm:$0xff] }
 0x25e   :  { %v796_v22 = vmul.f32 %v4478_v18, %v794_v14  ;;  %v868_v9 = vpop.f32.mrb[8].mxu0  ;;  %v939_v56 = vpop.f32.mrb[8].mxu1 }
 0x25f   :  { %v869_v58 = vadd.f32 %v868_v9, %v5152_v60  ;;  %v870_v1 = vpop.f32.mrb[9].mxu0  ;;  %v941_v32 = vpop.f32.mrb[9].mxu1  ;;  %v5171_v19 = vrot.slane %v3308_v30, %v5874_v39  ;;  %v5877_v30 = vld [vmem:[#allocation47_spill] sm:$0xff]  ;;  %v5882_v39 = vld [vmem:[#allocation52_spill] sm:$0xff] }
 0x260   :  { %v5160_v2 = vadd.f32 %v797_v8, %v796_v22  ;;  %v871_v0 = vadd.f32 %v870_v1, %v5156_v46  ;;  %v942_v3 = vadd.f32 %v941_v32, %v5165_v15  ;;  %v4480_v18 = vpop.eup %4479  ;;  %v5876_v32 = vld [vmem:[#allocation46_spill] sm:$0xff] }
 0x261   :  { %v3315_v16 = vmul.f32 -1.442695, %v869_v58  ;;  %v940_v8 = vadd.f32 %v939_v56, %v5171_v19  ;;  %v5878_v56 = vld [vmem:[#allocation48_spill] sm:$0xff] }
 0x262   :  { %v3316_v34 = vmul.f32 -1.442695, %v871_v0  ;;  %4481 = vtanh.f32 %v5160_v2  ;;  %v3317_v14 = vmul.f32 -1.442695, %v942_v3  ;;  %v5881_v3 = vld [vmem:[#allocation51_spill] sm:$0xff] }
 0x263   :  { %4483 = vpow2.f32 %v3315_v16 }
 0x264   :  { %4485 = vpow2.f32 %v3316_v34  ;;  %v5880_v34 = vld [vmem:[#allocation50_spill] sm:$0xff] }
 0x265   :  { %4487 = vpow2.f32 %v3317_v14 }
 0x266   :  { %4489 = vtanh.f32 %v940_v8 }
 0x26c   :  { %v4482_v28 = vpop.eup %4481 }
 0x26d   :  { %v4484_v22 = vpop.eup %4483  ;;  %v800_v9 = vmul.f32 %v4482_v28, %v4480_v18  ;;  %v5883_v28 = vld [vmem:[#allocation53_spill] sm:$0xff] }
 0x26e   :  { %v4486_v58 = vpop.eup %4485  ;;  %v947_v1 = vadd.f32 1.0, %v4484_v22  ;;  %v5884_v22 = vld [vmem:[#allocation54_spill] sm:$0xff] }
 0x26f   :  { %v953_v0 = vadd.f32 1.0, %v4486_v58  ;;  %v969_v16 = vrot.slane %v800_v9, 2  ;;  %v4488_v14 = vpop.eup %4487 }
 0x270   :  { %4491 = vrcp.f32 %v947_v1  ;;  %v4490_v18 = vpop.eup %4489 }
 0x271   :  { %4493 = vrcp.f32 %v953_v0  ;;  %1036 = vmatmul.mubr.f32.vlgmr.msra.gmra.mrb[10].mxu0 %v969_v16  ;;  %1107 = vmatmul.mubr.f32.vlgmr.msra.gmra.mrb[10].mxu1 %v969_v16  ;;  %v960_v0 = vadd.f32 1.0, %v4488_v14  ;;  %v5885_v16 = vld [vmem:[#allocation55_spill] sm:$0xff]  ;;  %v5892_v14 = vld [vmem:[#allocation62_spill] sm:$0xff] }
 0x272   :  { %3681 = vmatpush1.bf16.msra.mxu0 %v5875_v31  ;;  %3713 = vmatpush1.bf16.msra.mxu1 %v5876_v32 }
 0x273   :  { %3683 = vmatprep.subr.bf16.mxu0 %v5877_v30  ;;  %3715 = vmatprep.subr.bf16.mxu1 %v5878_v56  ;;  %v5886_v56 = vld [vmem:[#allocation56_spill] sm:$0xff]  ;;  %4495 = vrcp.f32 %v960_v0  ;;  %v5889_v30 = vld [vmem:[#allocation59_spill] sm:$0xff] }
 0x274   :  { %1227 = vmatprep.mubr.f32.mxu0 %v5859_v21  ;;  %1298 = vmatprep.mubr.f32.mxu1 %v5859_v21 }
 0x276   :  { %3685 = vmatpush1.bf16.msra.mxu0 %v5879_v26  ;;  %3717 = vmatpush1.bf16.msra.mxu1 %v5880_v34 }
 0x277   :  { %3687 = vmatprep.subr.bf16.mxu0 %v5881_v3  ;;  %3719 = vmatprep.subr.bf16.mxu1 %v5882_v39  ;;  %v5887_v3 = vld [vmem:[#allocation57_spill] sm:$0xff]  ;;  %v5888_v39 = vld [vmem:[#allocation58_spill] sm:$0xff] }
 0x27a   :  { %v4492_v8 = vpop.eup %4491  ;;  %3689 = vmatpush1.bf16.msra.mxu0 %v5883_v28  ;;  %3721 = vmatpush1.bf16.msra.mxu1 %v5884_v22  ;;  %v5890_v28 = vld [vmem:[#allocation60_spill] sm:$0xff] }
 0x27b   :  { %v4494_v58 = vpop.eup %4493  ;;  %v964_v1 = vmul.f32 %v4492_v8, %v4490_v18  ;;  %3691 = vmatprep.subr.bf16.mxu0 %v5885_v16  ;;  %3723 = vmatprep.subr.bf16.mxu1 %v5886_v56  ;;  %v5891_v18 = vld [vmem:[#allocation61_spill] sm:$0xff] }
 0x27c   :  { %v963_v26 = vmul.f32 0.0, %v4494_v58 }
 0x27e   :  { %v5188_v34 = vadd.f32 %v964_v1, %v963_v26  ;;  %3693 = vmatpush1.bf16.msra.mxu0 %v5887_v3  ;;  %3725 = vmatpush1.bf16.msra.mxu1 %v5888_v39  ;;  %v4496_v26 = vpop.eup %4495 }
 0x27f   :  { %3695 = vmatprep.subr.bf16.mxu0 %v5889_v30  ;;  %3727 = vmatprep.subr.bf16.mxu1 %v5890_v28 }
 0x280   :  { %4497 = vtanh.f32 %v5188_v34 }
 0x282   :  { %3697 = vmatpush1.bf16.msra.mxu0 %v5891_v18  ;;  %3729 = vmatpush1.bf16.msra.mxu1 %v5892_v14 }
 0x283   :  { %3699 = vmatprep.subr.bf16.mxu0 %v5067_v44  ;;  %3731 = vmatprep.subr.bf16.mxu1 %v5069_v57 }
 0x286   :  { %3701 = vmatpush1.bf16.msra.mxu0 %v5073_v48  ;;  %3733 = vmatpush1.bf16.msra.mxu1 %v5075_v45 }
 0x287   :  { %3703 = vmatprep.subr.bf16.mxu0 %v5079_v33  ;;  %3735 = vmatprep.subr.bf16.mxu1 %v5081_v47 }
 0x28a   :  { %v4498_v8 = vpop.eup %4497  ;;  %3705 = vmatpush1.bf16.msra.mxu0 %v5085_v5  ;;  %3737 = vmatpush1.bf16.msra.mxu1 %v5087_v41 }
 0x28b   :  { %3707 = vmatprep.subr.bf16.mxu0 %v5091_v11  ;;  %3739 = vmatprep.subr.bf16.mxu1 %v5093_v40  ;;  %v967_v58 = vmul.f32 %v4498_v8, %v4496_v26  ;;  %v5895_v26 = vld [vmem:[#allocation33_spill] sm:$0xff]  ;;  %v5896_v8 = vld [vmem:[#allocation34_spill] sm:$0xff] }
 0x28d   :  { %v1157_v1 = vrot.slane %v967_v58, 6  ;;  %v5897_v58 = vld [vmem:[#allocation35_spill] sm:$0xff] }
 0x28e   :  { %3709 = vmatpush1.bf16.msra.mxu0 %v5097_v20  ;;  %3741 = vmatpush1.bf16.msra.mxu1 %v5099_v27 }
 0x28f   :  { %v1159_v0 = vadd.f32 %v1157_v1, %v800_v9  ;;  %3743 = vmatprep.subr.bf16.mxu0 %v4821_v38  ;;  %3775 = vmatprep.subr.bf16.mxu1 %v4823_v42  ;;  %v5894_v9 = vld [vmem:[#allocation32_spill] sm:$0xff] }
 0x290   :  { %v5898_v1 = vld [vmem:[#allocation36_spill] sm:$0xff] }
 0x291   :  { %v1161_v47 = vrot.slane %v1159_v0, 2 }
 0x293   :  { %1228 = vmatmul.mubr.f32.vlgmr.msra.gmra.mrb[12].mxu0 %v1161_v47  ;;  %1299 = vmatmul.mubr.f32.vlgmr.msra.gmra.mrb[12].mxu1 %v1161_v47  ;;  %v5893_v47 = vld [vmem:[#allocation31_spill] sm:$0xff] }
 0x294   :  { %3745 = vmatpush1.bf16.msra.mxu0 %v4828_v49  ;;  %3777 = vmatpush1.bf16.msra.mxu1 %v4831_v50 }
 0x295   :  { %3747 = vmatprep.subr.bf16.mxu0 %v4833_v51  ;;  %3779 = vmatprep.subr.bf16.mxu1 %v4836_v55 }
 0x296   :  { %1396 = vmatprep.mubr.f32.mxu0 %v5859_v21  ;;  %1467 = vmatprep.mubr.f32.mxu1 %v5859_v21 }
 0x298   :  { %3749 = vmatpush1.bf16.msra.mxu0 %v4839_v61  ;;  %3781 = vmatpush1.bf16.msra.mxu1 %v4843_v62 }
 0x299   :  { %3751 = vmatprep.subr.bf16.mxu0 %v4845_v63  ;;  %3783 = vmatprep.subr.bf16.mxu1 %v4848_v4 }
 0x29c   :  { %3753 = vmatpush1.bf16.msra.mxu0 %v4853_v10  ;;  %3785 = vmatpush1.bf16.msra.mxu1 %v4860_v12 }
 0x29d   :  { %3755 = vmatprep.subr.bf16.mxu0 %v4862_v13  ;;  %3787 = vmatprep.subr.bf16.mxu1 %v4865_v17 }
 0x2a0   :  { %3757 = vmatpush1.bf16.msra.mxu0 %v4869_v23  ;;  %3789 = vmatpush1.bf16.msra.mxu1 %v4874_v24 }
 0x2a1   :  { %3759 = vmatprep.subr.bf16.mxu0 %v4876_v25  ;;  %3791 = vmatprep.subr.bf16.mxu1 %v4879_v29 }
 0x2a4   :  { %3761 = vmatpush1.bf16.msra.mxu0 %v4882_v35  ;;  %3793 = vmatpush1.bf16.msra.mxu1 %v4886_v36 }
 0x2a5   :  { %3763 = vmatprep.subr.bf16.mxu0 %v4888_v37  ;;  %3795 = vmatprep.subr.bf16.mxu1 %v4891_v43  ;;  %v5899_v43 = vld [vmem:[#allocation41_spill] sm:$0xff]  ;;  %v5900_v37 = vld [vmem:[#allocation42_spill] sm:$0xff] }
 0x2a8   :  { %3765 = vmatpush1.bf16.msra.mxu0 %v4894_v52  ;;  %3797 = vmatpush1.bf16.msra.mxu1 %v4898_v53 }
 0x2a9   :  { %3767 = vmatprep.subr.bf16.mxu0 %v4900_v54  ;;  %3799 = vmatprep.subr.bf16.mxu1 %v4903_v59 }
 0x2ac   :  { %3769 = vmatpush1.bf16.msra.mxu0 %v4906_v6  ;;  %3801 = vmatpush1.bf16.msra.mxu1 %v4910_v7 }
 0x2ad   :  { %3771 = vmatprep.subr.bf16.mxu0 %v5893_v47  ;;  %3803 = vmatprep.subr.bf16.mxu1 %v5894_v9 }
 0x2b0   :  { %3773 = vmatpush1.bf16.msra.mxu0 %v5895_v26  ;;  %3805 = vmatpush1.bf16.msra.mxu1 %v5896_v8  ;;  %v5901_v8 = vld [vmem:[#allocation43_spill] sm:$0xff] }
 0x2b1   :  { %3807 = vmatprep.subr.bf16.mxu0 %v5897_v58  ;;  %3839 = vmatprep.subr.bf16.mxu1 %v5898_v1  ;;  %v5902_v1 = vld [vmem:[#allocation44_spill] sm:$0xff] }
 0x344   :  { %v1037_v0 = vpop.f32.mrb[10].mxu0  ;;  %v1108_v54 = vpop.f32.mrb[10].mxu1 }
 0x345   :  { %v1117_v53 = vrot.slane %v1037_v0, 4  ;;  %v1039_v59 = vpop.f32.mrb[11].mxu0  ;;  %v1110_v52 = vpop.f32.mrb[11].mxu1  ;;  %v1119_v58 = vrot.slane %v1108_v54, 4 }
 0x346   :  { %v1118_v6 = vrot.slane %v1039_v59, 4  ;;  %v1120_v35 = vrot.slane %v1110_v52, 4 }
 0x347   :  { %v1125_v7 = vadd.f32 %v1117_v53, %v5899_v43  ;;  %v1127_v25 = vadd.f32 %v1119_v58, %v5902_v1 }
 0x348   :  { %v1126_v47 = vadd.f32 %v1118_v6, %v5900_v37  ;;  %v1128_v26 = vadd.f32 %v1120_v35, %v5901_v8 }
 0x349   :  { %v3318_v36 = vmul.f32 -1.442695, %v1125_v7 }
 0x34a   :  { %v3319_v9 = vmul.f32 -1.442695, %v1126_v47  ;;  %v3320_v29 = vmul.f32 -1.442695, %v1128_v26 }
 0x34b   :  { %4499 = vpow2.f32 %v3318_v36  ;;  %v1149_v36 = vrot.slane %v5160_v2, 6 }
 0x34c   :  { %4501 = vpow2.f32 %v3319_v9 }
 0x34d   :  { %4503 = vpow2.f32 %v3320_v29 }
 0x34e   :  { %4505 = vtanh.f32 %v1127_v25 }
 0x355   :  { %v4500_v24 = vpop.eup %4499 }
 0x356   :  { %v4502_v0 = vpop.eup %4501  ;;  %v1132_v23 = vadd.f32 1.0, %v4500_v24 }
 0x357   :  { %v1138_v59 = vadd.f32 1.0, %v4502_v0  ;;  %v4504_v53 = vpop.eup %4503 }
 0x358   :  { %4507 = vrcp.f32 %v1132_v23  ;;  %v4506_v6 = vpop.eup %4505  ;;  %v1145_v35 = vadd.f32 1.0, %v4504_v53 }
 0x359   :  { %4509 = vrcp.f32 %v1138_v59 }
 0x35a   :  { %4511 = vrcp.f32 %v1145_v35 }
 0x362   :  { %v4508_v7 = vpop.eup %4507 }
 0x363   :  { %v4510_v52 = vpop.eup %4509  ;;  %v1152_v47 = vmul.f32 %v4508_v7, %v4506_v6 }
 0x364   :  { %v1151_v54 = vmul.f32 %v4510_v52, %v1149_v36  ;;  %v4512_v53 = vpop.eup %4511 }
 0x366   :  { %v5250_v9 = vadd.f32 %v1152_v47, %v1151_v54  ;;  %v1229_v26 = vpop.f32.mrb[12].mxu0  ;;  %v1300_v58 = vpop.f32.mrb[12].mxu1 }
 0x367   :  { %v1230_v24 = vadd.f32 %v1229_v26, %v5152_v60  ;;  %v1231_v25 = vpop.f32.mrb[13].mxu0  ;;  %v1302_v29 = vpop.f32.mrb[13].mxu1  ;;  %v1301_v36 = vadd.f32 %v1300_v58, %v5171_v19  ;;  %v5905_v58 = vld [vmem:[#allocation49_spill] sm:$0xff] }
 0x368   :  { %v1232_v23 = vadd.f32 %v1231_v25, %v5156_v46  ;;  %4513 = vtanh.f32 %v5250_v9  ;;  %v1303_v2 = vadd.f32 %v1302_v29, %v5165_v15  ;;  %v5904_v29 = vld [vmem:[#allocation48_spill] sm:$0xff] }
 0x369   :  { %v3321_v0 = vmul.f32 -1.442695, %v1230_v24  ;;  %v5903_v24 = vld [vmem:[#allocation47_spill] sm:$0xff] }
 0x36a   :  { %v3322_v59 = vmul.f32 -1.442695, %v1232_v23  ;;  %v3323_v7 = vmul.f32 -1.442695, %v1303_v2  ;;  %v5906_v23 = vld [vmem:[#allocation50_spill] sm:$0xff] }
 0x36b   :  { %4515 = vpow2.f32 %v3321_v0  ;;  %v5907_v0 = vld [vmem:[#allocation51_spill] sm:$0xff] }
 0x36c   :  { %4517 = vpow2.f32 %v3322_v59  ;;  %v5908_v59 = vld [vmem:[#allocation52_spill] sm:$0xff] }
 0x36d   :  { %4519 = vpow2.f32 %v3323_v7 }
 0x36e   :  { %4521 = vtanh.f32 %v1301_v36 }
 0x372   :  { %v4514_v6 = vpop.eup %4513 }
 0x373   :  { %v1155_v52 = vmul.f32 %v4514_v6, %v4512_v53  ;;  %v5909_v53 = vld [vmem:[#allocation53_spill] sm:$0xff] }
 0x375   :  { %v4516_v47 = vpop.eup %4515  ;;  %v1330_v35 = vrot.slane %v1155_v52, 4 }
 0x376   :  { %v4518_v54 = vpop.eup %4517  ;;  %v1308_v26 = vadd.f32 1.0, %v4516_v47 }
 0x377   :  { %v1314_v25 = vadd.f32 1.0, %v4518_v54  ;;  %1397 = vmatmul.mubr.f32.vlgmr.msra.gmra.mrb[14].mxu0 %v1330_v35  ;;  %1468 = vmatmul.mubr.f32.vlgmr.msra.gmra.mrb[14].mxu1 %v1330_v35  ;;  %v4520_v2 = vpop.eup %4519 }
 0x378   :  { %4523 = vrcp.f32 %v1308_v26  ;;  %3809 = vmatpush1.bf16.msra.mxu0 %v5875_v31  ;;  %3841 = vmatpush1.bf16.msra.mxu1 %v5876_v32  ;;  %v4522_v6 = vpop.eup %4521  ;;  %v1321_v35 = vadd.f32 1.0, %v4520_v2 }
 0x379   :  { %4525 = vrcp.f32 %v1314_v25  ;;  %3811 = vmatprep.subr.bf16.mxu0 %v5903_v24  ;;  %3843 = vmatprep.subr.bf16.mxu1 %v5904_v29 }
 0x37a   :  { %1588 = vmatprep.mubr.f32.mxu0 %v5859_v21  ;;  %1659 = vmatprep.mubr.f32.mxu1 %v5859_v21  ;;  %4527 = vrcp.f32 %v1321_v35  ;;  %v5912_v35 = vld [vmem:[#allocation18_spill] sm:$0xff] }
 0x37c   :  { %3813 = vmatpush1.bf16.msra.mxu0 %v5905_v58  ;;  %3845 = vmatpush1.bf16.msra.mxu1 %v5906_v23 }
 0x37d   :  { %3815 = vmatprep.subr.bf16.mxu0 %v5907_v0  ;;  %3847 = vmatprep.subr.bf16.mxu1 %v5908_v59 }
 0x380   :  { %3817 = vmatpush1.bf16.msra.mxu0 %v5909_v53  ;;  %3849 = vmatpush1.bf16.msra.mxu1 %v5884_v22 }
 0x381   :  { %3819 = vmatprep.subr.bf16.mxu0 %v5885_v16  ;;  %3851 = vmatprep.subr.bf16.mxu1 %v5886_v56 }
 0x382   :  { %v4524_v7 = vpop.eup %4523 }
 0x383   :  { %v4526_v36 = vpop.eup %4525  ;;  %v1325_v47 = vmul.f32 %v4524_v7, %v4522_v6 }
 0x384   :  { %v1324_v54 = vmul.f32 %v4526_v36, %v5188_v34  ;;  %3821 = vmatpush1.bf16.msra.mxu0 %v5887_v3  ;;  %3853 = vmatpush1.bf16.msra.mxu1 %v5888_v39  ;;  %v5910_v34 = vld [vmem:[#allocation63_spill] sm:$0xff]  ;;  %v4528_v25 = vpop.eup %4527 }
 0x385   :  { %3823 = vmatprep.subr.bf16.mxu0 %v5889_v30  ;;  %3855 = vmatprep.subr.bf16.mxu1 %v5890_v28 }
 0x386   :  { %v5276_v26 = vadd.f32 %v1325_v47, %v1324_v54  ;;  %v5913_v54 = vld [vmem:[#allocation19_spill] sm:$0xff] }
 0x388   :  { %4529 = vtanh.f32 %v5276_v26  ;;  %3825 = vmatpush1.bf16.msra.mxu0 %v5891_v18  ;;  %3857 = vmatpush1.bf16.msra.mxu1 %v5892_v14 }
 0x389   :  { %3827 = vmatprep.subr.bf16.mxu0 %v5067_v44  ;;  %3859 = vmatprep.subr.bf16.mxu1 %v5069_v57 }
 0x38c   :  { %3829 = vmatpush1.bf16.msra.mxu0 %v5073_v48  ;;  %3861 = vmatpush1.bf16.msra.mxu1 %v5075_v45 }
 0x38d   :  { %3831 = vmatprep.subr.bf16.mxu0 %v5079_v33  ;;  %3863 = vmatprep.subr.bf16.mxu1 %v5910_v34 }
 0x390   :  { %3833 = vmatpush1.bf16.msra.mxu0 %v5085_v5  ;;  %3865 = vmatpush1.bf16.msra.mxu1 %v5087_v41 }
 0x391   :  { %3835 = vmatprep.subr.bf16.mxu0 %v5091_v11  ;;  %3867 = vmatprep.subr.bf16.mxu1 %v5093_v40 }
 0x392   :  { %v4530_v2 = vpop.eup %4529 }
 0x393   :  { %v1328_v6 = vmul.f32 %v4530_v2, %v4528_v25  ;;  %v5914_v25 = vld [vmem:[#allocation20_spill] sm:$0xff]  ;;  %v5915_v2 = vld [vmem:[#allocation21_spill] sm:$0xff] }
 0x394   :  { %3837 = vmatpush1.bf16.msra.mxu0 %v5097_v20  ;;  %3869 = vmatpush1.bf16.msra.mxu1 %v5099_v27 }
 0x395   :  { %v1518_v7 = vrot.slane %v1328_v6, 4  ;;  %3871 = vmatprep.subr.bf16.mxu0 %v4821_v38  ;;  %3903 = vmatprep.subr.bf16.mxu1 %v4823_v42  ;;  %v5916_v6 = vld [vmem:[#allocation22_spill] sm:$0xff] }
 0x397   :  { %v1520_v36 = vadd.f32 %v1518_v7, %v1155_v52  ;;  %v5911_v52 = vld [vmem:[#allocation17_spill] sm:$0xff]  ;;  %v5917_v7 = vld [vmem:[#allocation23_spill] sm:$0xff] }
 0x399   :  { %v1522_v47 = vrot.slane %v1520_v36, 4  ;;  %v5918_v36 = vld [vmem:[#allocation24_spill] sm:$0xff] }
 0x39b   :  { %1589 = vmatmul.mubr.f32.vlgmr.msra.gmra.mrb[16].mxu0 %v1522_v47  ;;  %1660 = vmatmul.mubr.f32.vlgmr.msra.gmra.mrb[16].mxu1 %v1522_v47  ;;  %v5919_v47 = vld [vmem:[#allocation25_spill] sm:$0xff] }
 0x39c   :  { %3873 = vmatpush1.bf16.msra.mxu0 %v4828_v49  ;;  %3905 = vmatpush1.bf16.msra.mxu1 %v4831_v50 }
 0x39d   :  { %3875 = vmatprep.subr.bf16.mxu0 %v4833_v51  ;;  %3907 = vmatprep.subr.bf16.mxu1 %v4836_v55 }
 0x39e   :  { %1757 = vmatprep.mubr.f32.mxu0 %v5859_v21  ;;  %1828 = vmatprep.mubr.f32.mxu1 %v5859_v21 }
 0x3a0   :  { %3877 = vmatpush1.bf16.msra.mxu0 %v4839_v61  ;;  %3909 = vmatpush1.bf16.msra.mxu1 %v4843_v62 }
 0x3a1   :  { %3879 = vmatprep.subr.bf16.mxu0 %v4845_v63  ;;  %3911 = vmatprep.subr.bf16.mxu1 %v4848_v4 }
 0x3a4   :  { %3881 = vmatpush1.bf16.msra.mxu0 %v4853_v10  ;;  %3913 = vmatpush1.bf16.msra.mxu1 %v4860_v12 }
 0x3a5   :  { %3883 = vmatprep.subr.bf16.mxu0 %v4862_v13  ;;  %3915 = vmatprep.subr.bf16.mxu1 %v4865_v17  ;;  %v5920_v13 = vld [vmem:[#allocation26_spill] sm:$0xff]  ;;  %v5921_v17 = vld [vmem:[#allocation27_spill] sm:$0xff] }
 0x3a8   :  { %3885 = vmatpush1.bf16.msra.mxu0 %v5911_v52  ;;  %3917 = vmatpush1.bf16.msra.mxu1 %v5912_v35  ;;  %v5922_v52 = vld [vmem:[#allocation28_spill] sm:$0xff]  ;;  %v5923_v35 = vld [vmem:[#allocation29_spill] sm:$0xff] }
 0x3a9   :  { %3887 = vmatprep.subr.bf16.mxu0 %v5913_v54  ;;  %3919 = vmatprep.subr.bf16.mxu1 %v5914_v25  ;;  %v5924_v54 = vld [vmem:[#allocation30_spill] sm:$0xff]  ;;  %v5925_v25 = vld [vmem:[#allocation31_spill] sm:$0xff] }
 0x3ac   :  { %3889 = vmatpush1.bf16.msra.mxu0 %v5915_v2  ;;  %3921 = vmatpush1.bf16.msra.mxu1 %v5916_v6  ;;  %v5926_v2 = vld [vmem:[#allocation32_spill] sm:$0xff]  ;;  %v5927_v6 = vld [vmem:[#allocation33_spill] sm:$0xff] }
 0x3ad   :  { %3891 = vmatprep.subr.bf16.mxu0 %v5917_v7  ;;  %3923 = vmatprep.subr.bf16.mxu1 %v5918_v36  ;;  %v5928_v7 = vld [vmem:[#allocation34_spill] sm:$0xff]  ;;  %v5929_v36 = vld [vmem:[#allocation35_spill] sm:$0xff] }
 0x3b0   :  { %3893 = vmatpush1.bf16.msra.mxu0 %v5919_v47  ;;  %3925 = vmatpush1.bf16.msra.mxu1 %v5920_v13  ;;  %v5930_v47 = vld [vmem:[#allocation36_spill] sm:$0xff] }
 0x3b1   :  { %3895 = vmatprep.subr.bf16.mxu0 %v5921_v17  ;;  %3927 = vmatprep.subr.bf16.mxu1 %v5922_v52 }
 0x3b4   :  { %3897 = vmatpush1.bf16.msra.mxu0 %v5923_v35  ;;  %3929 = vmatpush1.bf16.msra.mxu1 %v5924_v54 }
 0x3b5   :  { %3899 = vmatprep.subr.bf16.mxu0 %v5925_v25  ;;  %3931 = vmatprep.subr.bf16.mxu1 %v5926_v2 }
 0x3b8   :  { %3901 = vmatpush1.bf16.msra.mxu0 %v5927_v6  ;;  %3933 = vmatpush1.bf16.msra.mxu1 %v5928_v7 }
 0x3b9   :  { %3935 = vmatprep.subr.bf16.mxu0 %v5929_v36  ;;  %3967 = vmatprep.subr.bf16.mxu1 %v5930_v47 }
 0x44a   :  { %v1398_v13 = vpop.f32.mrb[14].mxu0  ;;  %v1469_v17 = vpop.f32.mrb[14].mxu1 }
 0x44b   :  { %v1478_v12 = vrot.slane %v1398_v13, 2  ;;  %v1400_v52 = vpop.f32.mrb[15].mxu0  ;;  %v1471_v10 = vpop.f32.mrb[15].mxu1  ;;  %v1480_v36 = vrot.slane %v1469_v17, 2 }
 0x44c   :  { %v1479_v35 = vrot.slane %v1400_v52, 2  ;;  %v1481_v63 = vrot.slane %v1471_v10, 2 }
 0x44d   :  { %v1486_v54 = vadd.f32 %v1478_v12, %v5899_v43  ;;  %v1488_v47 = vadd.f32 %v1480_v36, %v5902_v1 }
 0x44e   :  { %v1487_v25 = vadd.f32 %v1479_v35, %v5900_v37  ;;  %v1489_v7 = vadd.f32 %v1481_v63, %v5901_v8 }
 0x44f   :  { %v3324_v4 = vmul.f32 -1.442695, %v1486_v54 }
 0x450   :  { %v3325_v2 = vmul.f32 -1.442695, %v1487_v25  ;;  %v3326_v6 = vmul.f32 -1.442695, %v1489_v7 }
 0x451   :  { %4531 = vpow2.f32 %v3324_v4  ;;  %v1510_v4 = vrot.slane %v5250_v9, 6 }
 0x452   :  { %4533 = vpow2.f32 %v3325_v2 }
 0x453   :  { %4535 = vpow2.f32 %v3326_v6 }
 0x454   :  { %4537 = vtanh.f32 %v1488_v47 }
 0x45b   :  { %v4532_v62 = vpop.eup %4531 }
 0x45c   :  { %v4534_v13 = vpop.eup %4533  ;;  %v1493_v61 = vadd.f32 1.0, %v4532_v62 }
 0x45d   :  { %v1499_v52 = vadd.f32 1.0, %v4534_v13  ;;  %v4536_v12 = vpop.eup %4535 }
 0x45e   :  { %4539 = vrcp.f32 %v1493_v61  ;;  %v4538_v37 = vpop.eup %4537  ;;  %v1506_v63 = vadd.f32 1.0, %v4536_v12 }
 0x45f   :  { %4541 = vrcp.f32 %v1499_v52 }
 0x460   :  { %4543 = vrcp.f32 %v1506_v63 }
 0x468   :  { %v4540_v43 = vpop.eup %4539 }
 0x469   :  { %v4542_v10 = vpop.eup %4541  ;;  %v1513_v35 = vmul.f32 %v4540_v43, %v4538_v37 }
 0x46a   :  { %v1512_v17 = vmul.f32 %v4542_v10, %v1510_v4  ;;  %v4544_v36 = vpop.eup %4543 }
 0x46c   :  { %v5334_v8 = vadd.f32 %v1513_v35, %v1512_v17 }
 0x46e   :  { %v1590_v1 = vpop.f32.mrb[16].mxu0  ;;  %v1661_v54 = vpop.f32.mrb[16].mxu1  ;;  %4545 = vtanh.f32 %v5334_v8 }
 0x46f   :  { %v1591_v62 = vadd.f32 %v1590_v1, %v5152_v60  ;;  %v1592_v61 = vpop.f32.mrb[17].mxu0  ;;  %v1663_v25 = vpop.f32.mrb[17].mxu1  ;;  %v1662_v12 = vadd.f32 %v1661_v54, %v5171_v19 }
 0x470   :  { %v1593_v2 = vadd.f32 %v1592_v61, %v5156_v46  ;;  %v1664_v9 = vadd.f32 %v1663_v25, %v5165_v15 }
 0x471   :  { %v3327_v6 = vmul.f32 -1.442695, %v1591_v62 }
 0x472   :  { %v3328_v7 = vmul.f32 -1.442695, %v1593_v2  ;;  %v3329_v52 = vmul.f32 -1.442695, %v1664_v9 }
 0x473   :  { %4547 = vpow2.f32 %v3327_v6 }
 0x474   :  { %4549 = vpow2.f32 %v3328_v7 }
 0x475   :  { %4551 = vpow2.f32 %v3329_v52  ;;  %v5931_v52 = vld [vmem:[#allocation9_spill] sm:$0xff] }
 0x476   :  { %4553 = vtanh.f32 %v1662_v12  ;;  %v5932_v12 = vld [vmem:[#allocation10_spill] sm:$0xff] }
 0x478   :  { %v4546_v47 = vpop.eup %4545 }
 0x479   :  { %v1516_v13 = vmul.f32 %v4546_v47, %v4544_v36 }
 0x47b   :  { %v1691_v37 = vrot.slane %v1516_v13, 6 }
 0x47d   :  { %v4548_v43 = vpop.eup %4547  ;;  %1758 = vmatmul.mubr.f32.vlgmr.msra.gmra.mrb[18].mxu0 %v1691_v37  ;;  %1829 = vmatmul.mubr.f32.vlgmr.msra.gmra.mrb[18].mxu1 %v1691_v37  ;;  %v5934_v37 = vld [vmem:[#allocation12_spill] sm:$0xff] }
 0x47e   :  { %v4550_v4 = vpop.eup %4549  ;;  %v1669_v10 = vadd.f32 1.0, %v4548_v43  ;;  %3937 = vmatpush1.bf16.msra.mxu0 %v5875_v31  ;;  %3969 = vmatpush1.bf16.msra.mxu1 %v5876_v32  ;;  %v5935_v43 = vld [vmem:[#allocation13_spill] sm:$0xff] }
 0x47f   :  { %v1675_v35 = vadd.f32 1.0, %v4550_v4  ;;  %3939 = vmatprep.subr.bf16.mxu0 %v5903_v24  ;;  %3971 = vmatprep.subr.bf16.mxu1 %v5904_v29  ;;  %v4552_v63 = vpop.eup %4551  ;;  %v5936_v4 = vld [vmem:[#allocation14_spill] sm:$0xff] }
 0x480   :  { %4555 = vrcp.f32 %v1669_v10  ;;  %1937 = vmatprep.mubr.f32.mxu0 %v5859_v21  ;;  %2008 = vmatprep.mubr.f32.mxu1 %v5859_v21  ;;  %v4554_v17 = vpop.eup %4553  ;;  %v1682_v61 = vadd.f32 1.0, %v4552_v63  ;;  %v5937_v10 = vld [vmem:[#allocation15_spill] sm:$0xff]  ;;  %v5939_v63 = vld [vmem:[#allocation17_spill] sm:$0xff] }
 0x481   :  { %4557 = vrcp.f32 %v1675_v35  ;;  %v5938_v35 = vld [vmem:[#allocation16_spill] sm:$0xff] }
 0x482   :  { %3941 = vmatpush1.bf16.msra.mxu0 %v5905_v58  ;;  %3973 = vmatpush1.bf16.msra.mxu1 %v5906_v23  ;;  %4559 = vrcp.f32 %v1682_v61  ;;  %v5944_v61 = vld [vmem:[#allocation22_spill] sm:$0xff] }
 0x483   :  { %3943 = vmatprep.subr.bf16.mxu0 %v5907_v0  ;;  %3975 = vmatprep.subr.bf16.mxu1 %v5908_v59 }
 0x486   :  { %3945 = vmatpush1.bf16.msra.mxu0 %v5909_v53  ;;  %3977 = vmatpush1.bf16.msra.mxu1 %v5884_v22 }
 0x487   :  { %3947 = vmatprep.subr.bf16.mxu0 %v5885_v16  ;;  %3979 = vmatprep.subr.bf16.mxu1 %v5886_v56 }
 0x48a   :  { %v4556_v1 = vpop.eup %4555  ;;  %3949 = vmatpush1.bf16.msra.mxu0 %v5887_v3  ;;  %3981 = vmatpush1.bf16.msra.mxu1 %v5888_v39 }
 0x48b   :  { %v4558_v54 = vpop.eup %4557  ;;  %v1686_v62 = vmul.f32 %v4556_v1, %v4554_v17  ;;  %3951 = vmatprep.subr.bf16.mxu0 %v5889_v30  ;;  %3983 = vmatprep.subr.bf16.mxu1 %v5890_v28  ;;  %v5940_v17 = vld [vmem:[#allocation18_spill] sm:$0xff]  ;;  %v5941_v1 = vld [vmem:[#allocation19_spill] sm:$0xff] }
 0x48c   :  { %v1685_v25 = vmul.f32 %v4558_v54, %v5276_v26  ;;  %v4560_v26 = vpop.eup %4559  ;;  %v5942_v54 = vld [vmem:[#allocation20_spill] sm:$0xff] }
 0x48e   :  { %v5360_v2 = vadd.f32 %v1686_v62, %v1685_v25  ;;  %3953 = vmatpush1.bf16.msra.mxu0 %v5891_v18  ;;  %3985 = vmatpush1.bf16.msra.mxu1 %v5892_v14  ;;  %v5943_v62 = vld [vmem:[#allocation21_spill] sm:$0xff]  ;;  %v5945_v25 = vld [vmem:[#allocation23_spill] sm:$0xff] }
 0x48f   :  { %3955 = vmatprep.subr.bf16.mxu0 %v5067_v44  ;;  %3987 = vmatprep.subr.bf16.mxu1 %v5069_v57 }
 0x490   :  { %4561 = vtanh.f32 %v5360_v2 }
 0x492   :  { %3957 = vmatpush1.bf16.msra.mxu0 %v5073_v48  ;;  %3989 = vmatpush1.bf16.msra.mxu1 %v5075_v45 }
 0x493   :  { %3959 = vmatprep.subr.bf16.mxu0 %v5079_v33  ;;  %3991 = vmatprep.subr.bf16.mxu1 %v5910_v34 }
 0x496   :  { %3961 = vmatpush1.bf16.msra.mxu0 %v5085_v5  ;;  %3993 = vmatpush1.bf16.msra.mxu1 %v5087_v41 }
 0x497   :  { %3963 = vmatprep.subr.bf16.mxu0 %v5091_v11  ;;  %3995 = vmatprep.subr.bf16.mxu1 %v5093_v40 }
 0x49a   :  { %v4562_v6 = vpop.eup %4561  ;;  %3965 = vmatpush1.bf16.msra.mxu0 %v5097_v20  ;;  %3997 = vmatpush1.bf16.msra.mxu1 %v5099_v27 }
 0x49b   :  { %v1689_v7 = vmul.f32 %v4562_v6, %v4560_v26  ;;  %3999 = vmatprep.subr.bf16.mxu0 %v4821_v38  ;;  %4031 = vmatprep.subr.bf16.mxu1 %v4823_v42  ;;  %v5946_v26 = vld [vmem:[#allocation24_spill] sm:$0xff]  ;;  %v5947_v6 = vld [vmem:[#allocation25_spill] sm:$0xff] }
 0x49d   :  { %v1867_v9 = vrot.slane %v1689_v7, 2  ;;  %v5948_v7 = vld [vmem:[#allocation26_spill] sm:$0xff] }
 0x49f   :  { %v1869_v36 = vadd.f32 %v1867_v9, %v1516_v13  ;;  %v5933_v13 = vld [vmem:[#allocation11_spill] sm:$0xff] }
 0x4a0   :  { %v5949_v9 = vld [vmem:[#allocation27_spill] sm:$0xff] }
 0x4a1   :  { %v1871_v47 = vrot.slane %v1869_v36, 6  ;;  %v5950_v36 = vld [vmem:[#allocation28_spill] sm:$0xff] }
 0x4a3   :  { %1938 = vmatmul.mubr.f32.vlgmr.msra.gmra.mrb[20].mxu0 %v1871_v47  ;;  %2009 = vmatmul.mubr.f32.vlgmr.msra.gmra.mrb[20].mxu1 %v1871_v47  ;;  %v5951_v47 = vld [vmem:[#allocation29_spill] sm:$0xff] }
 0x4a4   :  { %4001 = vmatpush1.bf16.msra.mxu0 %v4828_v49  ;;  %4033 = vmatpush1.bf16.msra.mxu1 %v4831_v50 }
 0x4a5   :  { %4003 = vmatprep.subr.bf16.mxu0 %v4833_v51  ;;  %4035 = vmatprep.subr.bf16.mxu1 %v4836_v55 }
 0x4a6   :  { %2103 = vmatprep.mubr.f32.mxu0 %v5859_v21  ;;  %2174 = vmatprep.mubr.f32.mxu1 %v5859_v21 }
 0x4a8   :  { %4005 = vmatpush1.bf16.msra.mxu0 %v5931_v52  ;;  %4037 = vmatpush1.bf16.msra.mxu1 %v5932_v12 }
 0x4a9   :  { %4007 = vmatprep.subr.bf16.mxu0 %v5933_v13  ;;  %4039 = vmatprep.subr.bf16.mxu1 %v5934_v37 }
 0x4ac   :  { %4009 = vmatpush1.bf16.msra.mxu0 %v5935_v43  ;;  %4041 = vmatpush1.bf16.msra.mxu1 %v5936_v4 }
 0x4ad   :  { %4011 = vmatprep.subr.bf16.mxu0 %v5937_v10  ;;  %4043 = vmatprep.subr.bf16.mxu1 %v5938_v35  ;;  %v5960_v35 = vld [vmem:[#allocation38_spill] sm:$0xff] }
 0x4b0   :  { %4013 = vmatpush1.bf16.msra.mxu0 %v5939_v63  ;;  %4045 = vmatpush1.bf16.msra.mxu1 %v5940_v17  ;;  %v5959_v17 = vld [vmem:[#allocation37_spill] sm:$0xff] }
 0x4b1   :  { %4015 = vmatprep.subr.bf16.mxu0 %v5941_v1  ;;  %4047 = vmatprep.subr.bf16.mxu1 %v5942_v54  ;;  %v5952_v1 = vld [vmem:[#allocation30_spill] sm:$0xff]  ;;  %v5953_v54 = vld [vmem:[#allocation31_spill] sm:$0xff] }
 0x4b4   :  { %4017 = vmatpush1.bf16.msra.mxu0 %v5943_v62  ;;  %4049 = vmatpush1.bf16.msra.mxu1 %v5944_v61  ;;  %v5954_v62 = vld [vmem:[#allocation32_spill] sm:$0xff]  ;;  %v5955_v61 = vld [vmem:[#allocation33_spill] sm:$0xff] }
 0x4b5   :  { %4019 = vmatprep.subr.bf16.mxu0 %v5945_v25  ;;  %4051 = vmatprep.subr.bf16.mxu1 %v5946_v26  ;;  %v5956_v25 = vld [vmem:[#allocation34_spill] sm:$0xff]  ;;  %v5957_v26 = vld [vmem:[#allocation35_spill] sm:$0xff] }
 0x4b8   :  { %4021 = vmatpush1.bf16.msra.mxu0 %v5947_v6  ;;  %4053 = vmatpush1.bf16.msra.mxu1 %v5948_v7  ;;  %v5958_v6 = vld [vmem:[#allocation36_spill] sm:$0xff] }
 0x4b9   :  { %4023 = vmatprep.subr.bf16.mxu0 %v5949_v9  ;;  %4055 = vmatprep.subr.bf16.mxu1 %v5950_v36 }
 0x4bc   :  { %4025 = vmatpush1.bf16.msra.mxu0 %v5951_v47  ;;  %4057 = vmatpush1.bf16.msra.mxu1 %v5952_v1 }
 0x4bd   :  { %4027 = vmatprep.subr.bf16.mxu0 %v5953_v54  ;;  %4059 = vmatprep.subr.bf16.mxu1 %v5954_v62  ;;  %v5961_v62 = vld [vmem:[#allocation40_spill] sm:$0xff] }
 0x4c0   :  { %4029 = vmatpush1.bf16.msra.mxu0 %v5955_v61  ;;  %4061 = vmatpush1.bf16.msra.mxu1 %v5956_v25  ;;  %v5962_v25 = vld [vmem:[#allocation39_spill] sm:$0xff] }
 0x4c1   :  { %4063 = vmatprep.subr.bf16.mxu0 %v5957_v26  ;;  %4095 = vmatprep.subr.bf16.mxu1 %v5958_v6 }
 0x550   :  { %v1759_v7 = vpop.f32.mrb[18].mxu0  ;;  %v1830_v9 = vpop.f32.mrb[18].mxu1 }
 0x551   :  { %v1835_v36 = vadd.f32 %v1759_v7, %v5959_v17  ;;  %v1761_v63 = vpop.f32.mrb[19].mxu0  ;;  %v1832_v47 = vpop.f32.mrb[19].mxu1  ;;  %v1837_v43 = vadd.f32 %v1830_v9, %v5962_v25 }
 0x552   :  { %v1836_v1 = vadd.f32 %v1761_v63, %v5960_v35  ;;  %v1838_v61 = vadd.f32 %v1832_v47, %v5961_v62 }
 0x553   :  { %v3330_v10 = vmul.f32 -1.442695, %v1835_v36 }
 0x554   :  { %v3331_v54 = vmul.f32 -1.442695, %v1836_v1  ;;  %v3332_v4 = vmul.f32 -1.442695, %v1838_v61  ;;  %v1859_v1 = vrot.slane %v5334_v8, 6 }
 0x555   :  { %4563 = vpow2.f32 %v3330_v10 }
 0x556   :  { %4565 = vpow2.f32 %v3331_v54 }
 0x557   :  { %4567 = vpow2.f32 %v3332_v4 }
 0x558   :  { %4569 = vtanh.f32 %v1837_v43 }
 0x55f   :  { %v4564_v26 = vpop.eup %4563 }
 0x560   :  { %v4566_v37 = vpop.eup %4565  ;;  %v1842_v6 = vadd.f32 1.0, %v4564_v26 }
 0x561   :  { %v1848_v13 = vadd.f32 1.0, %v4566_v37  ;;  %v4568_v7 = vpop.eup %4567 }
 0x562   :  { %4571 = vrcp.f32 %v1842_v6  ;;  %v4570_v17 = vpop.eup %4569  ;;  %v1855_v36 = vadd.f32 1.0, %v4568_v7 }
 0x563   :  { %4573 = vrcp.f32 %v1848_v13 }
 0x564   :  { %4575 = vrcp.f32 %v1855_v36 }
 0x56c   :  { %v4572_v63 = vpop.eup %4571 }
 0x56d   :  { %v4574_v10 = vpop.eup %4573  ;;  %v1862_v54 = vmul.f32 %v4572_v63, %v4570_v17 }
 0x56e   :  { %v1861_v47 = vmul.f32 %v4574_v10, %v1859_v1  ;;  %v4576_v8 = vpop.eup %4575 }
 0x570   :  { %v5418_v61 = vadd.f32 %v1862_v54, %v1861_v47 }
 0x572   :  { %4577 = vtanh.f32 %v5418_v61 }
 0x576   :  { %v1939_v26 = vpop.f32.mrb[20].mxu0  ;;  %v2010_v4 = vpop.f32.mrb[20].mxu1 }
 0x577   :  { %v1940_v37 = vadd.f32 %v1939_v26, %v5152_v60  ;;  %v1941_v43 = vpop.f32.mrb[21].mxu0  ;;  %v2012_v13 = vpop.f32.mrb[21].mxu1 }
 0x578   :  { %v1942_v6 = vadd.f32 %v1941_v43, %v5156_v46  ;;  %v2013_v63 = vadd.f32 %v2012_v13, %v5165_v15 }
 0x579   :  { %v3333_v9 = vmul.f32 -1.442695, %v1940_v37 }
 0x57a   :  { %v3334_v25 = vmul.f32 -1.442695, %v1942_v6  ;;  %v3335_v1 = vmul.f32 -1.442695, %v2013_v63 }
 0x57b   :  { %4579 = vpow2.f32 %v3333_v9 }
 0x57c   :  { %v4578_v17 = vpop.eup %4577  ;;  %4581 = vpow2.f32 %v3334_v25  ;;  %v2011_v25 = vadd.f32 %v2010_v4, %v5171_v19 }
 0x57d   :  { %v1865_v7 = vmul.f32 %v4578_v17, %v4576_v8  ;;  %4583 = vpow2.f32 %v3335_v1 }
 0x57e   :  { %4585 = vtanh.f32 %v2011_v25  ;;  %v5963_v25 = vld [vmem:[#allocation11_spill] sm:$0xff] }
 0x57f   :  { %2104 = vmatmul.mubr.f32.vlgmr.msra.gmra.mrb[22].mxu0 %v1865_v7  ;;  %2175 = vmatmul.mubr.f32.vlgmr.msra.gmra.mrb[22].mxu1 %v1865_v7 }
 0x580   :  { %4065 = vmatpush1.bf16.msra.mxu0 %v5875_v31  ;;  %4097 = vmatpush1.bf16.msra.mxu1 %v5876_v32 }
 0x581   :  { %4067 = vmatprep.subr.bf16.mxu0 %v5903_v24  ;;  %4099 = vmatprep.subr.bf16.mxu1 %v5904_v29 }
 0x582   :  { %2289 = vmatprep.mubr.f32.mxu0 %v5859_v21  ;;  %2360 = vmatprep.mubr.f32.mxu1 %v5859_v21 }
 0x584   :  { %4069 = vmatpush1.bf16.msra.mxu0 %v5905_v58  ;;  %4101 = vmatpush1.bf16.msra.mxu1 %v5906_v23 }
 0x585   :  { %v4580_v10 = vpop.eup %4579  ;;  %4071 = vmatprep.subr.bf16.mxu0 %v5907_v0  ;;  %4103 = vmatprep.subr.bf16.mxu1 %v5908_v59 }
 0x586   :  { %v4582_v54 = vpop.eup %4581  ;;  %v2018_v36 = vadd.f32 1.0, %v4580_v10  ;;  %v5965_v10 = vld [vmem:[#allocation13_spill] sm:$0xff] }
 0x587   :  { %v2024_v47 = vadd.f32 1.0, %v4582_v54  ;;  %v4584_v26 = vpop.eup %4583  ;;  %v5966_v54 = vld [vmem:[#allocation14_spill] sm:$0xff] }
 0x588   :  { %4587 = vrcp.f32 %v2018_v36  ;;  %4073 = vmatpush1.bf16.msra.mxu0 %v5909_v53  ;;  %4105 = vmatpush1.bf16.msra.mxu1 %v5884_v22  ;;  %v4586_v4 = vpop.eup %4585  ;;  %v2031_v6 = vadd.f32 1.0, %v4584_v26  ;;  %v5967_v36 = vld [vmem:[#allocation15_spill] sm:$0xff]  ;;  %v5969_v26 = vld [vmem:[#allocation17_spill] sm:$0xff] }
 0x589   :  { %4589 = vrcp.f32 %v2024_v47  ;;  %4075 = vmatprep.subr.bf16.mxu0 %v5885_v16  ;;  %4107 = vmatprep.subr.bf16.mxu1 %v5886_v56  ;;  %v5968_v47 = vld [vmem:[#allocation16_spill] sm:$0xff] }
 0x58a   :  { %4591 = vrcp.f32 %v2031_v6  ;;  %v5974_v6 = vld [vmem:[#allocation22_spill] sm:$0xff] }
 0x58c   :  { %4077 = vmatpush1.bf16.msra.mxu0 %v5887_v3  ;;  %4109 = vmatpush1.bf16.msra.mxu1 %v5888_v39 }
 0x58d   :  { %4079 = vmatprep.subr.bf16.mxu0 %v5889_v30  ;;  %4111 = vmatprep.subr.bf16.mxu1 %v5890_v28 }
 0x590   :  { %4081 = vmatpush1.bf16.msra.mxu0 %v5891_v18  ;;  %4113 = vmatpush1.bf16.msra.mxu1 %v5892_v14 }
 0x591   :  { %4083 = vmatprep.subr.bf16.mxu0 %v5067_v44  ;;  %4115 = vmatprep.subr.bf16.mxu1 %v5069_v57 }
 0x592   :  { %v4588_v37 = vpop.eup %4587 }
 0x593   :  { %v4590_v43 = vpop.eup %4589  ;;  %v2035_v13 = vmul.f32 %v4588_v37, %v4586_v4  ;;  %v5970_v4 = vld [vmem:[#allocation18_spill] sm:$0xff]  ;;  %v5971_v37 = vld [vmem:[#allocation19_spill] sm:$0xff] }
 0x594   :  { %v2034_v9 = vmul.f32 %v4590_v43, %v5360_v2  ;;  %4085 = vmatpush1.bf16.msra.mxu0 %v5073_v48  ;;  %4117 = vmatpush1.bf16.msra.mxu1 %v5075_v45  ;;  %v4592_v2 = vpop.eup %4591  ;;  %v5972_v43 = vld [vmem:[#allocation20_spill] sm:$0xff] }
 0x595   :  { %4087 = vmatprep.subr.bf16.mxu0 %v5079_v33  ;;  %4119 = vmatprep.subr.bf16.mxu1 %v5910_v34 }
 0x596   :  { %v5452_v8 = vadd.f32 %v2035_v13, %v2034_v9  ;;  %v5973_v13 = vld [vmem:[#allocation21_spill] sm:$0xff]  ;;  %v5975_v9 = vld [vmem:[#allocation23_spill] sm:$0xff] }
 0x598   :  { %4593 = vtanh.f32 %v5452_v8  ;;  %4089 = vmatpush1.bf16.msra.mxu0 %v5085_v5  ;;  %4121 = vmatpush1.bf16.msra.mxu1 %v5087_v41 }
 0x599   :  { %4091 = vmatprep.subr.bf16.mxu0 %v5091_v11  ;;  %4123 = vmatprep.subr.bf16.mxu1 %v5093_v40 }
 0x59c   :  { %4093 = vmatpush1.bf16.msra.mxu0 %v5097_v20  ;;  %4125 = vmatpush1.bf16.msra.mxu1 %v5099_v27 }
 0x59d   :  { %4127 = vmatprep.subr.bf16.mxu0 %v4821_v38  ;;  %4159 = vmatprep.subr.bf16.mxu1 %v4823_v42 }
 0x5a2   :  { %v4594_v17 = vpop.eup %4593 }
 0x5a3   :  { %v2038_v63 = vmul.f32 %v4594_v17, %v4592_v2  ;;  %v5976_v2 = vld [vmem:[#allocation24_spill] sm:$0xff]  ;;  %v5977_v17 = vld [vmem:[#allocation25_spill] sm:$0xff] }
 0x5a5   :  { %v2224_v1 = vadd.f32 %v2038_v63, %v1865_v7  ;;  %v5964_v7 = vld [vmem:[#allocation12_spill] sm:$0xff]  ;;  %v5978_v63 = vld [vmem:[#allocation26_spill] sm:$0xff] }
 0x5a7   :  { %2290 = vmatmul.mubr.f32.vlgmr.msra.gmra.mrb[24].mxu0 %v2224_v1  ;;  %2361 = vmatmul.mubr.f32.vlgmr.msra.gmra.mrb[24].mxu1 %v2224_v1  ;;  %v5979_v1 = vld [vmem:[#allocation27_spill] sm:$0xff] }
 0x5a8   :  { %4129 = vmatpush1.bf16.msra.mxu0 %v4828_v49  ;;  %4161 = vmatpush1.bf16.msra.mxu1 %v4831_v50 }
 0x5a9   :  { %4131 = vmatprep.subr.bf16.mxu0 %v4833_v51  ;;  %4163 = vmatprep.subr.bf16.mxu1 %v4836_v55 }
 0x5aa   :  { %2458 = vmatprep.mubr.f32.mxu0 %v5859_v21  ;;  %2529 = vmatprep.mubr.f32.mxu1 %v5859_v21 }
 0x5ac   :  { %4133 = vmatpush1.bf16.msra.mxu0 %v5931_v52  ;;  %4165 = vmatpush1.bf16.msra.mxu1 %v5932_v12 }
 0x5ad   :  { %4135 = vmatprep.subr.bf16.mxu0 %v5963_v25  ;;  %4167 = vmatprep.subr.bf16.mxu1 %v5964_v7 }
 0x5b0   :  { %4137 = vmatpush1.bf16.msra.mxu0 %v5965_v10  ;;  %4169 = vmatpush1.bf16.msra.mxu1 %v5966_v54  ;;  %v5989_v54 = vld [vmem:[#allocation37_spill] sm:$0xff] }
 0x5b1   :  { %4139 = vmatprep.subr.bf16.mxu0 %v5967_v36  ;;  %4171 = vmatprep.subr.bf16.mxu1 %v5968_v47 }
 0x5b4   :  { %4141 = vmatpush1.bf16.msra.mxu0 %v5969_v26  ;;  %4173 = vmatpush1.bf16.msra.mxu1 %v5970_v4  ;;  %v5980_v26 = vld [vmem:[#allocation28_spill] sm:$0xff]  ;;  %v5981_v4 = vld [vmem:[#allocation29_spill] sm:$0xff] }
 0x5b5   :  { %4143 = vmatprep.subr.bf16.mxu0 %v5971_v37  ;;  %4175 = vmatprep.subr.bf16.mxu1 %v5972_v43  ;;  %v5982_v37 = vld [vmem:[#allocation30_spill] sm:$0xff]  ;;  %v5983_v43 = vld [vmem:[#allocation31_spill] sm:$0xff] }
 0x5b8   :  { %4145 = vmatpush1.bf16.msra.mxu0 %v5973_v13  ;;  %4177 = vmatpush1.bf16.msra.mxu1 %v5974_v6  ;;  %v5984_v13 = vld [vmem:[#allocation32_spill] sm:$0xff]  ;;  %v5985_v6 = vld [vmem:[#allocation33_spill] sm:$0xff] }
 0x5b9   :  { %4147 = vmatprep.subr.bf16.mxu0 %v5975_v9  ;;  %4179 = vmatprep.subr.bf16.mxu1 %v5976_v2  ;;  %v5986_v9 = vld [vmem:[#allocation34_spill] sm:$0xff]  ;;  %v5987_v2 = vld [vmem:[#allocation35_spill] sm:$0xff] }
 0x5bc   :  { %4149 = vmatpush1.bf16.msra.mxu0 %v5977_v17  ;;  %4181 = vmatpush1.bf16.msra.mxu1 %v5978_v63  ;;  %v5988_v17 = vld [vmem:[#allocation36_spill] sm:$0xff] }
 0x5bd   :  { %4151 = vmatprep.subr.bf16.mxu0 %v5979_v1  ;;  %4183 = vmatprep.subr.bf16.mxu1 %v5980_v26 }
 0x5c0   :  { %4153 = vmatpush1.bf16.msra.mxu0 %v5981_v4  ;;  %4185 = vmatpush1.bf16.msra.mxu1 %v5982_v37 }
 0x5c1   :  { %4155 = vmatprep.subr.bf16.mxu0 %v5983_v43  ;;  %4187 = vmatprep.subr.bf16.mxu1 %v5984_v13 }
 0x5c4   :  { %4157 = vmatpush1.bf16.msra.mxu0 %v5985_v6  ;;  %4189 = vmatpush1.bf16.msra.mxu1 %v5986_v9 }
 0x5c5   :  { %4191 = vmatprep.subr.bf16.mxu0 %v5987_v2  ;;  %4223 = vmatprep.subr.bf16.mxu1 %v5988_v17  ;;  %v5990_v17 = vld [vmem:[#allocation39_spill] sm:$0xff] }
 0x652   :  { %v2105_v63 = vpop.f32.mrb[22].mxu0  ;;  %v2176_v1 = vpop.f32.mrb[22].mxu1 }
 0x653   :  { %v2185_v47 = vrot.slane %v2105_v63, 6  ;;  %v2107_v26 = vpop.f32.mrb[23].mxu0  ;;  %v2178_v36 = vpop.f32.mrb[23].mxu1  ;;  %v2187_v2 = vrot.slane %v2176_v1, 6 }
 0x654   :  { %v2186_v4 = vrot.slane %v2107_v26, 6  ;;  %v2188_v7 = vrot.slane %v2178_v36, 6 }
 0x655   :  { %v2193_v37 = vadd.f32 %v2185_v47, %v5989_v54  ;;  %v2195_v25 = vadd.f32 %v2187_v2, %v5990_v17 }
 0x656   :  { %v2194_v43 = vadd.f32 %v2186_v4, %v5960_v35  ;;  %v2196_v9 = vadd.f32 %v2188_v7, %v5961_v62 }
 0x657   :  { %v3336_v10 = vmul.f32 -1.442695, %v2193_v37 }
 0x658   :  { %v3337_v13 = vmul.f32 -1.442695, %v2194_v43  ;;  %v3338_v6 = vmul.f32 -1.442695, %v2196_v9 }
 0x659   :  { %4595 = vpow2.f32 %v3336_v10  ;;  %v2217_v10 = vrot.slane %v5418_v61, 6 }
 0x65a   :  { %4597 = vpow2.f32 %v3337_v13 }
 0x65b   :  { %4599 = vpow2.f32 %v3338_v6 }
 0x65c   :  { %4601 = vtanh.f32 %v2195_v25 }
 0x663   :  { %v4596_v12 = vpop.eup %4595 }
 0x664   :  { %v4598_v63 = vpop.eup %4597  ;;  %v2200_v52 = vadd.f32 1.0, %v4596_v12 }
 0x665   :  { %v2206_v26 = vadd.f32 1.0, %v4598_v63  ;;  %v4600_v47 = vpop.eup %4599 }
 0x666   :  { %4603 = vrcp.f32 %v2200_v52  ;;  %v4602_v4 = vpop.eup %4601  ;;  %v2213_v7 = vadd.f32 1.0, %v4600_v47 }
 0x667   :  { %4605 = vrcp.f32 %v2206_v26 }
 0x668   :  { %4607 = vrcp.f32 %v2213_v7 }
 0x670   :  { %v4604_v37 = vpop.eup %4603 }
 0x671   :  { %v4606_v36 = vpop.eup %4605  ;;  %v2220_v43 = vmul.f32 %v4604_v37, %v4602_v4 }
 0x672   :  { %v2219_v13 = vmul.f32 %v4606_v36, %v2217_v10  ;;  %v4608_v61 = vpop.eup %4607 }
 0x674   :  { %v5502_v9 = vadd.f32 %v2220_v43, %v2219_v13 }
 0x676   :  { %4609 = vtanh.f32 %v5502_v9 }
 0x67a   :  { %v2291_v12 = vpop.f32.mrb[24].mxu0  ;;  %v2362_v6 = vpop.f32.mrb[24].mxu1 }
 0x67b   :  { %v2292_v25 = vadd.f32 %v2291_v12, %v5152_v60  ;;  %v2293_v52 = vpop.f32.mrb[25].mxu0  ;;  %v2364_v2 = vpop.f32.mrb[25].mxu1  ;;  %v2363_v43 = vadd.f32 %v2362_v6, %v5171_v19 }
 0x67c   :  { %v2294_v1 = vadd.f32 %v2293_v52, %v5156_v46  ;;  %v2365_v37 = vadd.f32 %v2364_v2, %v5165_v15 }
 0x67d   :  { %v3339_v63 = vmul.f32 -1.442695, %v2292_v25 }
 0x67e   :  { %v3340_v26 = vmul.f32 -1.442695, %v2294_v1  ;;  %v3341_v36 = vmul.f32 -1.442695, %v2365_v37 }
 0x67f   :  { %4611 = vpow2.f32 %v3339_v63 }
 0x680   :  { %v4610_v4 = vpop.eup %4609  ;;  %4613 = vpow2.f32 %v3340_v26 }
 0x681   :  { %v5507_v47 = vmul.f32 %v4610_v4, %v4608_v61  ;;  %4615 = vpow2.f32 %v3341_v36 }
 0x682   :  { %4617 = vtanh.f32 %v2363_v43 }
 0x683   :  { %v2392_v10 = vrot.slane %v5507_v47, 2 }
 0x685   :  { %2459 = vmatmul.mubr.f32.vlgmr.msra.gmra.mrb[26].mxu0 %v2392_v10  ;;  %2530 = vmatmul.mubr.f32.vlgmr.msra.gmra.mrb[26].mxu1 %v2392_v10 }
 0x686   :  { %4193 = vmatpush1.bf16.msra.mxu0 %v5875_v31  ;;  %4225 = vmatpush1.bf16.msra.mxu1 %v5876_v32 }
 0x687   :  { %4195 = vmatprep.subr.bf16.mxu0 %v5903_v24  ;;  %4227 = vmatprep.subr.bf16.mxu1 %v5904_v29 }
 0x688   :  { %2650 = vmatprep.mubr.f32.mxu0 %v5859_v21  ;;  %2721 = vmatprep.mubr.f32.mxu1 %v5859_v21 }
 0x689   :  { %v4612_v7 = vpop.eup %4611 }
 0x68a   :  { %v4614_v13 = vpop.eup %4613  ;;  %v2370_v12 = vadd.f32 1.0, %v4612_v7  ;;  %4197 = vmatpush1.bf16.msra.mxu0 %v5905_v58  ;;  %4229 = vmatpush1.bf16.msra.mxu1 %v5906_v23 }
 0x68b   :  { %v2376_v25 = vadd.f32 1.0, %v4614_v13  ;;  %4199 = vmatprep.subr.bf16.mxu0 %v5907_v0  ;;  %4231 = vmatprep.subr.bf16.mxu1 %v5908_v59  ;;  %v4616_v6 = vpop.eup %4615  ;;  %v5994_v13 = vld [vmem:[#allocation12_spill] sm:$0xff] }
 0x68c   :  { %4619 = vrcp.f32 %v2370_v12  ;;  %v4618_v52 = vpop.eup %4617  ;;  %v2383_v26 = vadd.f32 1.0, %v4616_v6  ;;  %v5995_v12 = vld [vmem:[#allocation13_spill] sm:$0xff]  ;;  %v6001_v6 = vld [vmem:[#allocation19_spill] sm:$0xff] }
 0x68d   :  { %4621 = vrcp.f32 %v2376_v25  ;;  %v6000_v25 = vld [vmem:[#allocation18_spill] sm:$0xff] }
 0x68e   :  { %4201 = vmatpush1.bf16.msra.mxu0 %v5909_v53  ;;  %4233 = vmatpush1.bf16.msra.mxu1 %v5884_v22  ;;  %4623 = vrcp.f32 %v2383_v26  ;;  %v6006_v26 = vld [vmem:[#allocation24_spill] sm:$0xff] }
 0x68f   :  { %4203 = vmatprep.subr.bf16.mxu0 %v5885_v16  ;;  %4235 = vmatprep.subr.bf16.mxu1 %v5886_v56 }
 0x692   :  { %4205 = vmatpush1.bf16.msra.mxu0 %v5887_v3  ;;  %4237 = vmatpush1.bf16.msra.mxu1 %v5888_v39 }
 0x693   :  { %4207 = vmatprep.subr.bf16.mxu0 %v5889_v30  ;;  %4239 = vmatprep.subr.bf16.mxu1 %v5890_v28 }
 0x696   :  { %v4620_v2 = vpop.eup %4619  ;;  %4209 = vmatpush1.bf16.msra.mxu0 %v5891_v18  ;;  %4241 = vmatpush1.bf16.msra.mxu1 %v5892_v14 }
 0x697   :  { %v4622_v1 = vpop.eup %4621  ;;  %v2387_v63 = vmul.f32 %v4620_v2, %v4618_v52  ;;  %4211 = vmatprep.subr.bf16.mxu0 %v5067_v44  ;;  %4243 = vmatprep.subr.bf16.mxu1 %v5069_v57  ;;  %v6002_v52 = vld [vmem:[#allocation20_spill] sm:$0xff]  ;;  %v6003_v2 = vld [vmem:[#allocation21_spill] sm:$0xff] }
 0x698   :  { %v2386_v61 = vmul.f32 %v4622_v1, %v5452_v8  ;;  %v4624_v8 = vpop.eup %4623  ;;  %v6004_v1 = vld [vmem:[#allocation22_spill] sm:$0xff] }
 0x69a   :  { %v5535_v4 = vadd.f32 %v2387_v63, %v2386_v61  ;;  %4213 = vmatpush1.bf16.msra.mxu0 %v5073_v48  ;;  %4245 = vmatpush1.bf16.msra.mxu1 %v5075_v45  ;;  %v6005_v63 = vld [vmem:[#allocation23_spill] sm:$0xff]  ;;  %v6007_v61 = vld [vmem:[#allocation25_spill] sm:$0xff] }
 0x69b   :  { %4215 = vmatprep.subr.bf16.mxu0 %v5079_v33  ;;  %4247 = vmatprep.subr.bf16.mxu1 %v5910_v34 }
 0x69c   :  { %4625 = vtanh.f32 %v5535_v4 }
 0x69e   :  { %4217 = vmatpush1.bf16.msra.mxu0 %v5085_v5  ;;  %4249 = vmatpush1.bf16.msra.mxu1 %v5087_v41 }
 0x69f   :  { %4219 = vmatprep.subr.bf16.mxu0 %v5091_v11  ;;  %4251 = vmatprep.subr.bf16.mxu1 %v5093_v40 }
 0x6a2   :  { %4221 = vmatpush1.bf16.msra.mxu0 %v5097_v20  ;;  %4253 = vmatpush1.bf16.msra.mxu1 %v5099_v27 }
 0x6a3   :  { %4255 = vmatprep.subr.bf16.mxu0 %v4821_v38  ;;  %4287 = vmatprep.subr.bf16.mxu1 %v4823_v42  ;;  %v5991_v38 = vld [vmem:[#allocation9_spill] sm:$0xff]  ;;  %v5992_v42 = vld [vmem:[#allocation10_spill] sm:$0xff] }
 0x6a6   :  { %v4626_v37 = vpop.eup %4625 }
 0x6a7   :  { %v2390_v10 = vmul.f32 %v4626_v37, %v4624_v8  ;;  %v6008_v8 = vld [vmem:[#allocation26_spill] sm:$0xff]  ;;  %v6009_v37 = vld [vmem:[#allocation27_spill] sm:$0xff] }
 0x6a9   :  { %v2580_v36 = vrot.slane %v2390_v10, 6  ;;  %v6010_v10 = vld [vmem:[#allocation28_spill] sm:$0xff] }
 0x6ab   :  { %v2582_v43 = vadd.f32 %v2580_v36, %v5507_v47  ;;  %v5993_v47 = vld [vmem:[#allocation11_spill] sm:$0xff]  ;;  %v6011_v36 = vld [vmem:[#allocation29_spill] sm:$0xff] }
 0x6ad   :  { %v2584_v7 = vrot.slane %v2582_v43, 2  ;;  %v6012_v43 = vld [vmem:[#allocation30_spill] sm:$0xff] }
 0x6af   :  { %2651 = vmatmul.mubr.f32.vlgmr.msra.gmra.mrb[28].mxu0 %v2584_v7  ;;  %2722 = vmatmul.mubr.f32.vlgmr.msra.gmra.mrb[28].mxu1 %v2584_v7  ;;  %v6013_v7 = vld [vmem:[#allocation31_spill] sm:$0xff] }
 0x6b0   :  { %4257 = vmatpush1.bf16.msra.mxu0 %v4828_v49  ;;  %4289 = vmatpush1.bf16.msra.mxu1 %v4831_v50  ;;  %v5996_v49 = vld [vmem:[#allocation14_spill] sm:$0xff]  ;;  %v5997_v50 = vld [vmem:[#allocation15_spill] sm:$0xff] }
 0x6b1   :  { %4259 = vmatprep.subr.bf16.mxu0 %v4833_v51  ;;  %4291 = vmatprep.subr.bf16.mxu1 %v4836_v55  ;;  %v5998_v51 = vld [vmem:[#allocation16_spill] sm:$0xff]  ;;  %v5999_v55 = vld [vmem:[#allocation17_spill] sm:$0xff] }
 0x6b2   :  { %2819 = vmatprep.mubr.f32.mxu0 %v5859_v21  ;;  %2890 = vmatprep.mubr.f32.mxu1 %v5859_v21 }
 0x6b4   :  { %4261 = vmatpush1.bf16.msra.mxu0 %v5991_v38  ;;  %4293 = vmatpush1.bf16.msra.mxu1 %v5992_v42  ;;  %v6014_v38 = vld [vmem:[#allocation32_spill] sm:$0xff]  ;;  %v6015_v42 = vld [vmem:[#allocation33_spill] sm:$0xff] }
 0x6b5   :  { %4263 = vmatprep.subr.bf16.mxu0 %v5993_v47  ;;  %4295 = vmatprep.subr.bf16.mxu1 %v5994_v13  ;;  %v6016_v47 = vld [vmem:[#allocation34_spill] sm:$0xff]  ;;  %v6017_v13 = vld [vmem:[#allocation35_spill] sm:$0xff] }
 0x6b8   :  { %4265 = vmatpush1.bf16.msra.mxu0 %v5995_v12  ;;  %4297 = vmatpush1.bf16.msra.mxu1 %v5996_v49  ;;  %v6018_v12 = vld [vmem:[#allocation36_spill] sm:$0xff] }
 0x6b9   :  { %4267 = vmatprep.subr.bf16.mxu0 %v5997_v50  ;;  %4299 = vmatprep.subr.bf16.mxu1 %v5998_v51 }
 0x6bc   :  { %4269 = vmatpush1.bf16.msra.mxu0 %v5999_v55  ;;  %4301 = vmatpush1.bf16.msra.mxu1 %v6000_v25 }
 0x6bd   :  { %4271 = vmatprep.subr.bf16.mxu0 %v6001_v6  ;;  %4303 = vmatprep.subr.bf16.mxu1 %v6002_v52 }
 0x6c0   :  { %4273 = vmatpush1.bf16.msra.mxu0 %v6003_v2  ;;  %4305 = vmatpush1.bf16.msra.mxu1 %v6004_v1 }
 0x6c1   :  { %4275 = vmatprep.subr.bf16.mxu0 %v6005_v63  ;;  %4307 = vmatprep.subr.bf16.mxu1 %v6006_v26 }
 0x6c4   :  { %4277 = vmatpush1.bf16.msra.mxu0 %v6007_v61  ;;  %4309 = vmatpush1.bf16.msra.mxu1 %v6008_v8 }
 0x6c5   :  { %4279 = vmatprep.subr.bf16.mxu0 %v6009_v37  ;;  %4311 = vmatprep.subr.bf16.mxu1 %v6010_v10 }
 0x6c8   :  { %4281 = vmatpush1.bf16.msra.mxu0 %v6011_v36  ;;  %4313 = vmatpush1.bf16.msra.mxu1 %v6012_v43 }
 0x6c9   :  { %4283 = vmatprep.subr.bf16.mxu0 %v6013_v7  ;;  %4315 = vmatprep.subr.bf16.mxu1 %v6014_v38 }
 0x6cc   :  { %4285 = vmatpush1.bf16.msra.mxu0 %v6015_v42  ;;  %4317 = vmatpush1.bf16.msra.mxu1 %v6016_v47 }
 0x6cd   :  { %4319 = vmatprep.subr.bf16.mxu0 %v6017_v13  ;;  %4351 = vmatprep.subr.bf16.mxu1 %v6018_v12 }
 0x758   :  { %v2460_v49 = vpop.f32.mrb[26].mxu0  ;;  %v2531_v50 = vpop.f32.mrb[26].mxu1 }
 0x759   :  { %v2540_v51 = vrot.slane %v2460_v49, 4  ;;  %v2462_v55 = vpop.f32.mrb[27].mxu0  ;;  %v2533_v25 = vpop.f32.mrb[27].mxu1  ;;  %v2542_v8 = vrot.slane %v2531_v50, 4 }
 0x75a   :  { %v2541_v6 = vrot.slane %v2462_v55, 4  ;;  %v2543_v26 = vrot.slane %v2533_v25, 4 }
 0x75b   :  { %v2548_v52 = vadd.f32 %v2540_v51, %v5989_v54  ;;  %v2550_v10 = vadd.f32 %v2542_v8, %v5990_v17  ;;  %v2572_v51 = vrot.slane %v5502_v9, 6 }
 0x75c   :  { %v2549_v2 = vadd.f32 %v2541_v6, %v5960_v35  ;;  %v2551_v61 = vadd.f32 %v2543_v26, %v5961_v62 }
 0x75d   :  { %v3342_v1 = vmul.f32 -1.442695, %v2548_v52 }
 0x75e   :  { %v3343_v63 = vmul.f32 -1.442695, %v2549_v2  ;;  %v3344_v37 = vmul.f32 -1.442695, %v2551_v61 }
 0x75f   :  { %4627 = vpow2.f32 %v3342_v1 }
 0x760   :  { %4629 = vpow2.f32 %v3343_v63 }
 0x761   :  { %4631 = vpow2.f32 %v3344_v37 }
 0x762   :  { %4633 = vtanh.f32 %v2550_v10 }
 0x769   :  { %v4628_v36 = vpop.eup %4627 }
 0x76a   :  { %v4630_v43 = vpop.eup %4629  ;;  %v2555_v7 = vadd.f32 1.0, %v4628_v36 }
 0x76b   :  { %v2561_v38 = vadd.f32 1.0, %v4630_v43  ;;  %v4632_v42 = vpop.eup %4631 }
 0x76c   :  { %4635 = vrcp.f32 %v2555_v7  ;;  %v4634_v47 = vpop.eup %4633  ;;  %v2568_v6 = vadd.f32 1.0, %v4632_v42 }
 0x76d   :  { %4637 = vrcp.f32 %v2561_v38 }
 0x76e   :  { %4639 = vrcp.f32 %v2568_v6 }
 0x776   :  { %v4636_v49 = vpop.eup %4635 }
 0x777   :  { %v4638_v55 = vpop.eup %4637  ;;  %v2575_v25 = vmul.f32 %v4636_v49, %v4634_v47 }
 0x778   :  { %v2574_v50 = vmul.f32 %v4638_v55, %v2572_v51  ;;  %v4640_v37 = vpop.eup %4639 }
 0x77a   :  { %v5590_v52 = vadd.f32 %v2575_v25, %v2574_v50 }
 0x77c   :  { %4641 = vtanh.f32 %v5590_v52 }
 0x782   :  { %v2652_v2 = vpop.f32.mrb[28].mxu0  ;;  %v2723_v1 = vpop.f32.mrb[28].mxu1 }
 0x783   :  { %v2653_v63 = vadd.f32 %v2652_v2, %v5152_v60  ;;  %v2654_v26 = vpop.f32.mrb[29].mxu0  ;;  %v2725_v61 = vpop.f32.mrb[29].mxu1  ;;  %v2724_v47 = vadd.f32 %v2723_v1, %v5171_v19 }
 0x784   :  { %v2655_v8 = vadd.f32 %v2654_v26, %v5156_v46  ;;  %v2726_v38 = vadd.f32 %v2725_v61, %v5165_v15 }
 0x785   :  { %v3345_v10 = vmul.f32 -1.442695, %v2653_v63 }
 0x786   :  { %v4642_v9 = vpop.eup %4641  ;;  %v3346_v36 = vmul.f32 -1.442695, %v2655_v8  ;;  %v3347_v42 = vmul.f32 -1.442695, %v2726_v38 }
 0x787   :  { %4643 = vpow2.f32 %v3345_v10  ;;  %v5595_v43 = vmul.f32 %v4642_v9, %v4640_v37 }
 0x788   :  { %4645 = vpow2.f32 %v3346_v36 }
 0x789   :  { %v2753_v7 = vrot.slane %v5595_v43, 4  ;;  %4647 = vpow2.f32 %v3347_v42 }
 0x78a   :  { %4649 = vtanh.f32 %v2724_v47 }
 0x78b   :  { %2820 = vmatmul.mubr.f32.vlgmr.msra.gmra.mrb[30].mxu0 %v2753_v7  ;;  %2891 = vmatmul.mubr.f32.vlgmr.msra.gmra.mrb[30].mxu1 %v2753_v7 }
 0x78c   :  { %4321 = vmatpush1.bf16.msra.mxu0 %v5875_v31  ;;  %4353 = vmatpush1.bf16.msra.mxu1 %v5876_v32 }
 0x78d   :  { %4323 = vmatprep.subr.bf16.mxu0 %v5903_v24  ;;  %4355 = vmatprep.subr.bf16.mxu1 %v5904_v29 }
 0x78e   :  { %3011 = vmatprep.mubr.f32.mxu0 %v5859_v21  ;;  %3082 = vmatprep.mubr.f32.mxu1 %v5859_v21 }
 0x790   :  { %4325 = vmatpush1.bf16.msra.mxu0 %v5905_v58  ;;  %4357 = vmatpush1.bf16.msra.mxu1 %v5906_v23 }
 0x791   :  { %v4644_v49 = vpop.eup %4643  ;;  %4327 = vmatprep.subr.bf16.mxu0 %v5907_v0  ;;  %4359 = vmatprep.subr.bf16.mxu1 %v5908_v59 }
 0x792   :  { %v4646_v51 = vpop.eup %4645  ;;  %v2731_v55 = vadd.f32 1.0, %v4644_v49 }
 0x793   :  { %v2737_v25 = vadd.f32 1.0, %v4646_v51  ;;  %v4648_v6 = vpop.eup %4647 }
 0x794   :  { %4651 = vrcp.f32 %v2731_v55  ;;  %4329 = vmatpush1.bf16.msra.mxu0 %v5909_v53  ;;  %4361 = vmatpush1.bf16.msra.mxu1 %v5884_v22  ;;  %v4650_v50 = vpop.eup %4649  ;;  %v2744_v26 = vadd.f32 1.0, %v4648_v6 }
 0x795   :  { %4653 = vrcp.f32 %v2737_v25  ;;  %4331 = vmatprep.subr.bf16.mxu0 %v5885_v16  ;;  %4363 = vmatprep.subr.bf16.mxu1 %v5886_v56 }
 0x796   :  { %4655 = vrcp.f32 %v2744_v26 }
 0x798   :  { %4333 = vmatpush1.bf16.msra.mxu0 %v5887_v3  ;;  %4365 = vmatpush1.bf16.msra.mxu1 %v5888_v39 }
 0x799   :  { %4335 = vmatprep.subr.bf16.mxu0 %v5889_v30  ;;  %4367 = vmatprep.subr.bf16.mxu1 %v5890_v28 }
 0x79c   :  { %4337 = vmatpush1.bf16.msra.mxu0 %v5891_v18  ;;  %4369 = vmatpush1.bf16.msra.mxu1 %v5892_v14 }
 0x79d   :  { %4339 = vmatprep.subr.bf16.mxu0 %v5067_v44  ;;  %4371 = vmatprep.subr.bf16.mxu1 %v5069_v57 }
 0x79e   :  { %v4652_v2 = vpop.eup %4651 }
 0x79f   :  { %v4654_v1 = vpop.eup %4653  ;;  %v2748_v63 = vmul.f32 %v4652_v2, %v4650_v50 }
 0x7a0   :  { %v2747_v61 = vmul.f32 %v4654_v1, %v5535_v4  ;;  %4341 = vmatpush1.bf16.msra.mxu0 %v5073_v48  ;;  %4373 = vmatpush1.bf16.msra.mxu1 %v5075_v45  ;;  %v4656_v4 = vpop.eup %4655 }
 0x7a1   :  { %4343 = vmatprep.subr.bf16.mxu0 %v5079_v33  ;;  %4375 = vmatprep.subr.bf16.mxu1 %v5910_v34 }
 0x7a2   :  { %v5627_v8 = vadd.f32 %v2748_v63, %v2747_v61 }
 0x7a4   :  { %4657 = vtanh.f32 %v5627_v8  ;;  %4345 = vmatpush1.bf16.msra.mxu0 %v5085_v5  ;;  %4377 = vmatpush1.bf16.msra.mxu1 %v5087_v41 }
 0x7a5   :  { %4347 = vmatprep.subr.bf16.mxu0 %v5091_v11  ;;  %4379 = vmatprep.subr.bf16.mxu1 %v5093_v40 }
 0x7a8   :  { %4349 = vmatpush1.bf16.msra.mxu0 %v5097_v20  ;;  %4381 = vmatpush1.bf16.msra.mxu1 %v5099_v27 }
 0x7a9   :  { %4383 = vmatprep.subr.bf16.mxu0 %v6017_v13  ;;  %4415 = vmatprep.subr.bf16.mxu1 %v6018_v12 }
 0x7ae   :  { %v4658_v37 = vpop.eup %4657 }
 0x7af   :  { %v2751_v10 = vmul.f32 %v4658_v37, %v4656_v4 }
 0x7b1   :  { %v2941_v9 = vrot.slane %v2751_v10, 4 }
 0x7b3   :  { %v2943_v36 = vadd.f32 %v2941_v9, %v5595_v43 }
 0x7b5   :  { %v2945_v7 = vrot.slane %v2943_v36, 4 }
 0x7b7   :  { %3012 = vmatmul.mubr.f32.vlgmr.msra.gmra.mrb[32].mxu0 %v2945_v7  ;;  %3083 = vmatmul.mubr.f32.vlgmr.msra.gmra.mrb[32].mxu1 %v2945_v7 }
 0x7b8   :  { %4385 = vmatpush1.bf16.msra.mxu0 %v5875_v31  ;;  %4417 = vmatpush1.bf16.msra.mxu1 %v5876_v32 }
 0x7b9   :  { %4387 = vmatprep.subr.bf16.mxu0 %v5903_v24  ;;  %4419 = vmatprep.subr.bf16.mxu1 %v5904_v29 }
 0x7ba   :  { %3184 = vmatprep.mubr.f32.mxu0 %v5859_v21  ;;  %3255 = vmatprep.mubr.f32.mxu1 %v5859_v21 }
 0x7bc   :  { %4389 = vmatpush1.bf16.msra.mxu0 %v5905_v58  ;;  %4421 = vmatpush1.bf16.msra.mxu1 %v5906_v23 }
 0x7bd   :  { %4391 = vmatprep.subr.bf16.mxu0 %v5907_v0  ;;  %4423 = vmatprep.subr.bf16.mxu1 %v5908_v59 }
 0x7c0   :  { %4393 = vmatpush1.bf16.msra.mxu0 %v5909_v53  ;;  %4425 = vmatpush1.bf16.msra.mxu1 %v5884_v22 }
 0x7c1   :  { %4395 = vmatprep.subr.bf16.mxu0 %v5885_v16  ;;  %4427 = vmatprep.subr.bf16.mxu1 %v5886_v56 }
 0x7c4   :  { %4397 = vmatpush1.bf16.msra.mxu0 %v5887_v3  ;;  %4429 = vmatpush1.bf16.msra.mxu1 %v5888_v39 }
 0x7c5   :  { %4399 = vmatprep.subr.bf16.mxu0 %v5889_v30  ;;  %4431 = vmatprep.subr.bf16.mxu1 %v5890_v28 }
 0x7c8   :  { %4401 = vmatpush1.bf16.msra.mxu0 %v5891_v18  ;;  %4433 = vmatpush1.bf16.msra.mxu1 %v5892_v14  ;;  %v2933_v14 = vrot.slane %v5590_v52, 6 }
 0x7c9   :  { %4403 = vmatprep.subr.bf16.mxu0 %v5067_v44  ;;  %4435 = vmatprep.subr.bf16.mxu1 %v5069_v57 }
 0x7cc   :  { %4405 = vmatpush1.bf16.msra.mxu0 %v5073_v48  ;;  %4437 = vmatpush1.bf16.msra.mxu1 %v5075_v45 }
 0x7cd   :  { %4407 = vmatprep.subr.bf16.mxu0 %v5079_v33  ;;  %4439 = vmatprep.subr.bf16.mxu1 %v5910_v34 }
 0x7d0   :  { %4409 = vmatpush1.bf16.msra.mxu0 %v5085_v5  ;;  %4441 = vmatpush1.bf16.msra.mxu1 %v5087_v41 }
 0x7d1   :  { %4411 = vmatprep.subr.bf16.mxu0 %v5091_v11  ;;  %4443 = vmatprep.subr.bf16.mxu1 %v5093_v40 }
 0x7d4   :  { %4413 = vmatpush1.bf16.msra.mxu0 %v5097_v20  ;;  %4445 = vmatpush1.bf16.msra.mxu1 %v5099_v27 }
 0x85e   :  { %v2821_v21 = vpop.f32.mrb[30].mxu0  ;;  %v2892_v44 = vpop.f32.mrb[30].mxu1 }
 0x85f   :  { %v2901_v57 = vrot.slane %v2821_v21, 2  ;;  %v2823_v48 = vpop.f32.mrb[31].mxu0  ;;  %v2894_v45 = vpop.f32.mrb[31].mxu1  ;;  %v2903_v40 = vrot.slane %v2892_v44, 2 }
 0x860   :  { %v2902_v33 = vrot.slane %v2823_v48, 2  ;;  %v2904_v30 = vrot.slane %v2894_v45, 2 }
 0x861   :  { %v2909_v31 = vadd.f32 %v2901_v57, %v5989_v54  ;;  %v2911_v27 = vadd.f32 %v2903_v40, %v5990_v17 }
 0x862   :  { %v2910_v5 = vadd.f32 %v2902_v33, %v5960_v35  ;;  %v2912_v11 = vadd.f32 %v2904_v30, %v5961_v62 }
 0x863   :  { %v3348_v32 = vmul.f32 -1.442695, %v2909_v31 }
 0x864   :  { %v3349_v41 = vmul.f32 -1.442695, %v2910_v5  ;;  %v3350_v20 = vmul.f32 -1.442695, %v2912_v11 }
 0x865   :  { %4659 = vpow2.f32 %v3348_v32 }
 0x866   :  { %4661 = vpow2.f32 %v3349_v41 }
 0x867   :  { %4663 = vpow2.f32 %v3350_v20 }
 0x868   :  { %4665 = vtanh.f32 %v2911_v27 }
 0x86f   :  { %v4660_v56 = vpop.eup %4659 }
 0x870   :  { %v4662_v3 = vpop.eup %4661  ;;  %v2916_v39 = vadd.f32 1.0, %v4660_v56 }
 0x871   :  { %v2922_v28 = vadd.f32 1.0, %v4662_v3  ;;  %v4664_v22 = vpop.eup %4663 }
 0x872   :  { %4667 = vrcp.f32 %v2916_v39  ;;  %v4666_v16 = vpop.eup %4665  ;;  %v2929_v58 = vadd.f32 1.0, %v4664_v22 }
 0x873   :  { %4669 = vrcp.f32 %v2922_v28 }
 0x874   :  { %4671 = vrcp.f32 %v2929_v58  ;;  %v3299_v58 = vstv %s5699_s5 }
 0x87c   :  { %v4668_v18 = vpop.eup %4667 }
 0x87d   :  { %v4670_v24 = vpop.eup %4669  ;;  %v2936_v29 = vmul.f32 %v4668_v18, %v4666_v16  ;;  %v3357_v18 = vld [vmem:[%s5698_s4] ss:$0 sm:$0xff] }
 0x87e   :  { %v2935_v23 = vmul.f32 %v4670_v24, %v2933_v14  ;;  %v4672_v34 = vpop.eup %4671 }
 0x880   :  { %v2937_v0 = vadd.f32 %v2936_v29, %v2935_v23 }
 0x882   :  { %4673 = vtanh.f32 %v2937_v0 }
 0x88a   :  { %v3013_v59 = vpop.f32.mrb[32].mxu0  ;;  %v3084_v53 = vpop.f32.mrb[32].mxu1 }
 0x88b   :  { %v3014_v35 = vadd.f32 %v3013_v59, %v5152_v60  ;;  %v3015_v62 = vpop.f32.mrb[33].mxu0  ;;  %v3086_v54 = vpop.f32.mrb[33].mxu1  ;;  %v3085_v47 = vadd.f32 %v3084_v53, %v5171_v19 }
 0x88c   :  { %v4674_v17 = vpop.eup %4673  ;;  %v3016_v13 = vadd.f32 %v3015_v62, %v5156_v46  ;;  %v3087_v38 = vadd.f32 %v3086_v54, %v5165_v15 }
 0x88d   :  { %v3351_v12 = vmul.f32 -1.442695, %v3014_v35  ;;  %v2939_v43 = vmul.f32 %v4674_v17, %v4672_v34 }
 0x88e   :  { %v3352_v52 = vmul.f32 -1.442695, %v3016_v13  ;;  %v3353_v42 = vmul.f32 -1.442695, %v3087_v38 }
 0x88f   :  { %4675 = vpow2.f32 %v3351_v12 }
 0x890   :  { %4677 = vpow2.f32 %v3352_v52 }
 0x891   :  { %4679 = vpow2.f32 %v3353_v42 }
 0x892   :  { %4681 = vtanh.f32 %v3085_v47 }
 0x899   :  { %v4676_v49 = vpop.eup %4675 }
 0x89a   :  { %v4678_v51 = vpop.eup %4677  ;;  %v3092_v55 = vadd.f32 1.0, %v4676_v49 }
 0x89b   :  { %v3098_v25 = vadd.f32 1.0, %v4678_v51  ;;  %v4680_v6 = vpop.eup %4679 }
 0x89c   :  { %4683 = vrcp.f32 %v3092_v55  ;;  %v4682_v50 = vpop.eup %4681  ;;  %v3105_v26 = vadd.f32 1.0, %v4680_v6 }
 0x89d   :  { %4685 = vrcp.f32 %v3098_v25 }
 0x89e   :  { %4687 = vrcp.f32 %v3105_v26 }
 0x8a6   :  { %v4684_v2 = vpop.eup %4683 }
 0x8a7   :  { %v4686_v1 = vpop.eup %4685  ;;  %v3109_v63 = vmul.f32 %v4684_v2, %v4682_v50 }
 0x8a8   :  { %v3108_v61 = vmul.f32 %v4686_v1, %v5627_v8  ;;  %v4688_v37 = vpop.eup %4687 }
 0x8aa   :  { %v3110_v4 = vadd.f32 %v3109_v63, %v3108_v61 }
 0x8ac   :  { %4689 = vtanh.f32 %v3110_v4 }
 0x8b6   :  { %v4690_v10 = vpop.eup %4689 }
 0x8b7   :  { %v3112_v9 = vmul.f32 %v4690_v10, %v4688_v37 }
 0x8b9   :  { %v3114_v36 = vrot.slane %v3112_v9, 2 }
 0x8bb   :  { %v3116_v7 = vadd.f32 %v3114_v36, %v2939_v43 }
 0x8bd   :  { %v3118_v21 = vrot.slane %v3116_v7, 6 }
 0x8bf   :  { %3185 = vmatmul.mubr.f32.vlgmr.msra.gmra.mrb[34].mxu0 %v3118_v21  ;;  %3256 = vmatmul.mubr.f32.vlgmr.msra.gmra.mrb[34].mxu1 %v3118_v21 }
 0x992   :  { %v3186_v44 = vpop.f32.mrb[34].mxu0  ;;  %v3257_v57 = vpop.f32.mrb[34].mxu1 }
 0x993   :  { %v3187_v48 = vadd.f32 %v3186_v44, %v5152_v60  ;;  %v3188_v45 = vpop.f32.mrb[35].mxu0  ;;  %v3259_v33 = vpop.f32.mrb[35].mxu1  ;;  %v3258_v30 = vadd.f32 %v3257_v57, %v5171_v19 }
 0x994   :  { %v3189_v31 = vadd.f32 %v3188_v45, %v5156_v46  ;;  %v3260_v32 = vadd.f32 %v3259_v33, %v5165_v15 }
 0x995   :  { %v3354_v8 = vmul.f32 -1.442695, %v3187_v48 }
 0x996   :  { %v3355_v5 = vmul.f32 -1.442695, %v3189_v31  ;;  %v3356_v41 = vmul.f32 -1.442695, %v3260_v32 }
 0x997   :  { %4691 = vpow2.f32 %v3354_v8 }
 0x998   :  { %4693 = vpow2.f32 %v3355_v5 }
 0x999   :  { %4695 = vpow2.f32 %v3356_v41 }
 0x99a   :  { %4697 = vtanh.f32 %v3258_v30 }
 0x9a1   :  { %v4692_v11 = vpop.eup %4691 }
 0x9a2   :  { %v4694_v40 = vpop.eup %4693  ;;  %v3265_v20 = vadd.f32 1.0, %v4692_v11 }
 0x9a3   :  { %v3271_v27 = vadd.f32 1.0, %v4694_v40  ;;  %v4696_v60 = vpop.eup %4695 }
 0x9a4   :  { %4699 = vrcp.f32 %v3265_v20  ;;  %v4698_v56 = vpop.eup %4697  ;;  %v3278_v28 = vadd.f32 1.0, %v4696_v60 }
 0x9a5   :  { %4701 = vrcp.f32 %v3271_v27 }
 0x9a6   :  { %4703 = vrcp.f32 %v3278_v28 }
 0x9ae   :  { %v4700_v46 = vpop.eup %4699 }
 0x9af   :  { %v4702_v3 = vpop.eup %4701  ;;  %v3282_v39 = vmul.f32 %v4700_v46, %v4698_v56 }
 0x9b0   :  { %v3281_v22 = vmul.f32 %v4702_v3, %v3110_v4  ;;  %v4704_v15 = vpop.eup %4703 }
 0x9b2   :  { %v3283_v16 = vadd.f32 %v3282_v39, %v3281_v22 }
 0x9b4   :  { %4705 = vtanh.f32 %v3283_v16 }
 0x9be   :  { %v4706_v19 = vpop.eup %4705 }
 0x9bf   :  { %v3285_v14 = vmul.f32 %v4706_v19, %v4704_v15 }
 0x9c1   :  { %v3293_v24 = vmul.f32 %v3357_v18, %v3285_v14 }
 0x9c3   :  { %v3295_v29 = vsel %vm3294_vm0, %v3293_v24, 0.0 }
 0x9c4   :  { %3296 = vadd.xlane.f32.xlu0 %v3295_v29 }
 0xa51   :  { %v3297_v23 = vpop.xlane.xlu0 %3296 }
 0xa52   :  { %v3300_v0 = vadd.f32 %v3299_v58, %v3297_v23 }
 0xa54   :  { %3301 = vst [vmem:[%s5700_s6] sm:$0x3] %v3300_v0 }
 0xa55   :  { %3306 = vsyncpa [#allocation4], 1 }
 0xa56   :  { %3307 = vsyncpa [#allocation6], 1 }

</bundles_post_ra>
